<compile_context>
chip_gen: v7x
topology: tpu7x:2x2x1
jax: 0.10.0
libtpu: 0.0.40
codegen_flags: <defaults>
</compile_context>

<pallas_src>
import functools
import math

import jax
import jax.numpy as jnp
from jax.experimental import pallas as pl
from jax.experimental.pallas import tpu as pltpu


_VMEM_LIMIT = 64 * 1024 * 1024   # raise v5e's 16 MiB scoped default; <= v7x physical


# ----------------------------------------------------------------------------
# helpers
# ----------------------------------------------------------------------------
def _row_tile(M, max_tm=512):
    """Row-tile size for the [M, *] activation slab (full rows per tile).

    max_tm=512: LN/GELU epilogues are HBM-streaming, bigger tiles amortize the
    ~0.35us/step grid overhead.  If the whole slab fits in one tile we still
    split it in two (when the half keeps 16-sublane bf16 tiling) so a
    'parallel' row axis has >=2 steps and both v7x TensorCores get work.
    """
    tm = M if M <= max_tm else max_tm
    assert M % tm == 0, "demo assumes M divisible by the row tile"
    if M == tm and M % 32 == 0:
        tm = M // 2
    return tm, M // tm


# ----------------------------------------------------------------------------
# Pallas kernels
# ----------------------------------------------------------------------------
def qkv_linear(x, w, b, out_dtype=jnp.bfloat16):
    """Fused QKV projection: x [M,H] @ w [H,3H] + b, emitted as [3, M, H].

    The q|k|v split happens on the store side (three lane-dense [tm, H] stores)
    so the attention kernel can DMA head-group-aligned q/k/v blocks directly,
    with no XLA split/transpose relayout in between.
    """
    M, K = x.shape
    N3 = w.shape[1]
    H = N3 // 3
    tm, gm = _row_tile(M)

    def kernel(x_ref, w_ref, b_ref, o_ref):
        y = jnp.dot(x_ref[...], w_ref[...], preferred_element_type=jnp.float32)
        y = (y + b_ref[...]).astype(o_ref.dtype)
        o_ref[0] = y[:, 0 * H:1 * H]
        o_ref[1] = y[:, 1 * H:2 * H]
        o_ref[2] = y[:, 2 * H:3 * H]

    return pl.pallas_call(
        kernel,
        out_shape=jax.ShapeDtypeStruct((3, M, H), out_dtype),
        grid=(gm,),
        in_specs=[pl.BlockSpec((tm, K), lambda i: (i, 0)),
                  pl.BlockSpec((K, N3), lambda i: (0, 0)),
                  pl.BlockSpec((1, N3), lambda i: (0, 0))],
        out_specs=pl.BlockSpec((3, tm, H), lambda i: (0, i, 0)),
        compiler_params=pltpu.CompilerParams(
            dimension_semantics=("parallel",), vmem_limit_bytes=_VMEM_LIMIT),
    )(x, w, b.reshape(1, N3))


def linear(x, w, b, activation=None, out_dtype=jnp.bfloat16):
    """y = act(x @ w + b).  bf16 operands on the MXU, f32 accumulate, row-tiled."""
    M, K = x.shape
    N = w.shape[1]
    tm, gm = _row_tile(M)

    def kernel(x_ref, w_ref, b_ref, o_ref):
        y = jnp.dot(x_ref[...], w_ref[...], preferred_element_type=jnp.float32)
        y = y + b_ref[...]
        if activation == "gelu":
            # TODO(synk): HF BERT uses exact erf-GELU; tanh approximation used here.
            y = jax.nn.gelu(y, approximate=True)
        o_ref[...] = y.astype(o_ref.dtype)

    return pl.pallas_call(
        kernel,
        out_shape=jax.ShapeDtypeStruct((M, N), out_dtype),
        grid=(gm,),
        in_specs=[pl.BlockSpec((tm, K), lambda i: (i, 0)),
                  pl.BlockSpec((K, N), lambda i: (0, 0)),
                  pl.BlockSpec((1, N), lambda i: (0, 0))],
        out_specs=pl.BlockSpec((tm, N), lambda i: (i, 0)),
        compiler_params=pltpu.CompilerParams(
            dimension_semantics=("parallel",), vmem_limit_bytes=_VMEM_LIMIT),
    )(x, w, b.reshape(1, N))


def linear_add_ln(x, w, b, res, gamma, beta, eps=1e-12, out_dtype=jnp.bfloat16):
    """y = LayerNorm((x @ w + b) + res) * gamma + beta, fused in one kernel."""
    M, K = x.shape
    N = w.shape[1]
    tm, gm = _row_tile(M)

    def kernel(x_ref, w_ref, b_ref, r_ref, g_ref, be_ref, o_ref):
        y = jnp.dot(x_ref[...], w_ref[...], preferred_element_type=jnp.float32)
        y = y + b_ref[...] + r_ref[...].astype(jnp.float32)
        mean = jnp.mean(y, axis=-1, keepdims=True)
        var = jnp.mean(jnp.square(y - mean), axis=-1, keepdims=True)
        out = (y - mean) * jax.lax.rsqrt(var + eps) * g_ref[...] + be_ref[...]
        o_ref[...] = out.astype(o_ref.dtype)

    return pl.pallas_call(
        kernel,
        out_shape=jax.ShapeDtypeStruct((M, N), out_dtype),
        grid=(gm,),
        in_specs=[pl.BlockSpec((tm, K), lambda i: (i, 0)),
                  pl.BlockSpec((K, N), lambda i: (0, 0)),
                  pl.BlockSpec((1, N), lambda i: (0, 0)),
                  pl.BlockSpec((tm, N), lambda i: (i, 0)),
                  pl.BlockSpec((1, N), lambda i: (0, 0)),
                  pl.BlockSpec((1, N), lambda i: (0, 0))],
        out_specs=pl.BlockSpec((tm, N), lambda i: (i, 0)),
        compiler_params=pltpu.CompilerParams(
            dimension_semantics=("parallel",), vmem_limit_bytes=_VMEM_LIMIT),
    )(x, w, b.reshape(1, N), res, gamma.reshape(1, N), beta.reshape(1, N))


def layernorm(x, gamma, beta, eps=1e-12, out_dtype=jnp.bfloat16):
    """LayerNorm(x) * gamma + beta (no residual input — embeddings path).

    Accepts bf16 input (HBM-bound kernel); statistics are computed in f32.
    """
    M, H = x.shape
    tm, gm = _row_tile(M)

    def kernel(x_ref, g_ref, b_ref, o_ref):
        xv = x_ref[...].astype(jnp.float32)
        mean = jnp.mean(xv, axis=-1, keepdims=True)
        var = jnp.mean(jnp.square(xv - mean), axis=-1, keepdims=True)
        out = (xv - mean) * jax.lax.rsqrt(var + eps) * g_ref[...] + b_ref[...]
        o_ref[...] = out.astype(o_ref.dtype)

    return pl.pallas_call(
        kernel,
        out_shape=jax.ShapeDtypeStruct((M, H), out_dtype),
        grid=(gm,),
        in_specs=[pl.BlockSpec((tm, H), lambda i: (i, 0)),
                  pl.BlockSpec((1, H), lambda i: (0, 0)),
                  pl.BlockSpec((1, H), lambda i: (0, 0))],
        out_specs=pl.BlockSpec((tm, H), lambda i: (i, 0)),
        compiler_params=pltpu.CompilerParams(
            dimension_semantics=("parallel",), vmem_limit_bytes=_VMEM_LIMIT),
    )(x, gamma.reshape(1, H), beta.reshape(1, H))


def attention(qkv3, mask_bias, num_heads, out_dtype=jnp.bfloat16):
    """Softmax attention, grid over (batch, head group).

    qkv3:      [3, B, S, H]  bf16 — q/k/v stacked on the leading dim.
               1/sqrt(dH) is already folded into the q projection weights.
    mask_bias: [B, 1, S]     f32 — (1 - mask) * -10000.
    returns    [B, S, H]     context, already in [S, H] layout.

    A head group spans up to 128 lanes (2 heads at BERT-base, all heads here),
    so q/k/v blocks and the output block are lane-aligned.  Each head's context
    is stored directly into its o_ref lane slice (no concatenate), bounding the
    live f32 state to a single head and letting the scheduler overlap the next
    head's MXU pushes with the current head's exp (EUP) / reduces (XLU).
    """
    _, B, S, H = qkv3.shape
    dH = H // num_heads
    if H <= 128:
        gw = H                       # all heads fit one lane-aligned group
    elif 128 % dH == 0 and H % 128 == 0:
        gw = 128                     # e.g. BERT-base: 2 heads per group
    else:
        gw = H                       # fallback: single group
    hpg = gw // dH                   # heads per group
    G = H // gw                      # head groups

    def kernel(q_ref, k_ref, v_ref, m_ref, o_ref):
        bias = m_ref[0]              # [1, S] f32, broadcast over query rows
        q = q_ref[0, 0]              # [S, gw] bf16
        k = k_ref[0, 0]
        v = v_ref[0, 0]
        for h in range(hpg):         # static unroll inside the group
            sl = slice(h * dH, (h + 1) * dH)
            s = jax.lax.dot_general(q[:, sl], k[:, sl], (((1,), (1,)), ((), ())),
                                    preferred_element_type=jnp.float32)
            s = s + bias
            s = s - jnp.max(s, axis=-1, keepdims=True)
            p = jnp.exp(s)
            p = p * pl.reciprocal(jnp.sum(p, axis=-1, keepdims=True), approx=True)
            ctx = jnp.dot(p.astype(v.dtype), v[:, sl],
                          preferred_element_type=jnp.float32)
            o_ref[0, :, sl] = ctx.astype(o_ref.dtype)   # direct per-head store

    q_spec = pl.BlockSpec((1, 1, S, gw), lambda b, g: (0, b, 0, g))
    k_spec = pl.BlockSpec((1, 1, S, gw), lambda b, g: (1, b, 0, g))
    v_spec = pl.BlockSpec((1, 1, S, gw), lambda b, g: (2, b, 0, g))
    m_spec = pl.BlockSpec((1, 1, S), lambda b, g: (b, 0, 0))

    return pl.pallas_call(
        kernel,
        out_shape=jax.ShapeDtypeStruct((B, S, H), out_dtype),
        grid=(B, G),
        in_specs=[q_spec, k_spec, v_spec, m_spec],
        out_specs=pl.BlockSpec((1, S, gw), lambda b, g: (b, 0, g)),
        compiler_params=pltpu.CompilerParams(
            dimension_semantics=("parallel", "parallel"),
            vmem_limit_bytes=_VMEM_LIMIT),
    )(qkv3, qkv3, qkv3, mask_bias)


# ----------------------------------------------------------------------------
# Mini-BERT forward (TextEncoder.forward semantics)
# ----------------------------------------------------------------------------
def text_encoder_forward(params, text_ids, text_masks, cfg):
    B, S = text_ids.shape
    H, nH = cfg["hidden"], cfg["heads"]

    # --- embeddings (gathers are XLA glue; LayerNorm is a kernel) ---
    pos_ids = jnp.arange(S)
    emb = (params["word_emb"][text_ids]
           + params["pos_emb"][pos_ids][None, :, :]
           + params["type_emb"][0][None, None, :])            # token_type_ids = 0
    # bf16 into the memory-bound LN kernel (stats computed in f32 internally).
    x = layernorm(emb.reshape(B * S, H).astype(jnp.bfloat16),
                  params["emb_ln_g"], params["emb_ln_b"])      # bf16 [B*S, H]

    # BERT extended attention mask: (1 - mask) * -10000, broadcast over heads/queries.
    mask_bias = ((1.0 - text_masks.astype(jnp.float32)) * -10000.0).reshape(B, 1, S)

    n_layers = len(params["layers"])
    for li, layer in enumerate(params["layers"]):
        last = li == n_layers - 1
        # fused QKV projection -> [3, B, S, H] (free reshape of the kernel output)
        qkv3 = qkv_linear(x, layer["wqkv"], layer["bqkv"]).reshape(3, B, S, H)
        ctx = attention(qkv3, mask_bias, nH).reshape(B * S, H)
        # attn output proj + residual + LayerNorm fused
        x = linear_add_ln(ctx, layer["wo"], layer["bo"], x,
                          layer["ln1_g"], layer["ln1_b"])
        # FFN: up-proj + GELU fused; down-proj + residual + LayerNorm fused.
        # Final layer emits f32 directly: last_hidden_state needs no extra XLA cast.
        ffn = linear(x, layer["w1"], layer["b1"], activation="gelu")
        x = linear_add_ln(ffn, layer["w2"], layer["b2"], x,
                          layer["ln2_g"], layer["ln2_b"],
                          out_dtype=jnp.float32 if last else jnp.bfloat16)

    text_embed = x.reshape(B, S, H)                            # last_hidden_state (f32)
    cls = text_embed[:, 0, :]                                  # [CLS] token
    # Pooler: [B, H] x [H, H] with B=2 is far below one MXU pass; plain XLA dot.
    text_pooler = jnp.tanh(cls @ params["pooler_w"] + params["pooler_b"])
    return text_embed, text_pooler


# ----------------------------------------------------------------------------
# Deterministic parameter init (synthetic — no checkpoint loading)
# ----------------------------------------------------------------------------
def init_params(key, cfg):
    H, I, nH = cfg["hidden"], cfg["inter"], cfg["heads"]
    scale = 1.0 / math.sqrt(H // nH)
    keys = iter(jax.random.split(key, 8 + 8 * cfg["layers"]))

    def dense(k, fi, fo, dtype=jnp.bfloat16, col_scale=1.0):
        w = jax.random.normal(k, (fi, fo), jnp.float32) * 0.02 * col_scale
        return w.astype(dtype)

    params = {
        "word_emb": jax.random.normal(next(keys), (cfg["vocab"], H), jnp.float32) * 0.02,
        "pos_emb": jax.random.normal(next(keys), (cfg["max_pos"], H), jnp.float32) * 0.02,
        "type_emb": jax.random.normal(next(keys), (cfg["type_vocab"], H), jnp.float32) * 0.02,
        "emb_ln_g": jnp.ones((H,), jnp.float32),
        "emb_ln_b": jnp.zeros((H,), jnp.float32),
        "pooler_w": dense(next(keys), H, H, jnp.float32),
        "pooler_b": jnp.zeros((H,), jnp.float32),
        "layers": [],
    }
    for _ in range(cfg["layers"]):
        # 1/sqrt(dH) folded into the q projection (would also apply to the q bias,
        # which is zero here) so the attention kernel never scales the [S,S] scores.
        wq = dense(next(keys), H, H, col_scale=scale)
        wk = dense(next(keys), H, H)
        wv = dense(next(keys), H, H)
        params["layers"].append({
            # fused QKV weight [H, 3H] (bf16), fused bias [3H] (f32)
            "wqkv": jnp.concatenate([wq, wk, wv], axis=1),
            "bqkv": jnp.zeros((3 * H,), jnp.float32),
            "wo": dense(next(keys), H, H), "bo": jnp.zeros((H,), jnp.float32),
            "ln1_g": jnp.ones((H,), jnp.float32), "ln1_b": jnp.zeros((H,), jnp.float32),
            "w1": dense(next(keys), H, I), "b1": jnp.zeros((I,), jnp.float32),
            "w2": dense(next(keys), I, H), "b2": jnp.zeros((H,), jnp.float32),
            "ln2_g": jnp.ones((H,), jnp.float32), "ln2_b": jnp.zeros((H,), jnp.float32),
        })
    return params


if __name__ == "__main__":
    # Small BERT config (args.text_num_hidden_layers = 2).
    cfg = dict(hidden=32, heads=4, inter=64, layers=2,
               vocab=50, max_pos=16, type_vocab=2)
    B, S = 2, 8

    root = jax.random.PRNGKey(0)
    k_params, k_ids = jax.random.split(root)
    params = init_params(k_params, cfg)

    text_ids = jax.random.randint(k_ids, (B, S), 0, cfg["vocab"], dtype=jnp.int32)
    text_masks = jnp.array([[1] * S, [1] * (S - 2) + [0, 0]], dtype=jnp.int32)

    fwd = jax.jit(functools.partial(text_encoder_forward, cfg=cfg))
    text_embed, text_pooler = fwd(params, text_ids, text_masks)
    jax.block_until_ready((text_embed, text_pooler))

    assert text_embed.shape == (B, S, cfg["hidden"])
    assert text_pooler.shape == (B, cfg["hidden"])
    assert bool(jnp.all(jnp.isfinite(text_embed))) and bool(jnp.all(jnp.isfinite(text_pooler)))
    print("KERNEL_OK")
</pallas_src>

<mosaic_0001>
module attributes {stable_mosaic.version = 11 : i64} {
  func.func @kernel(%arg0: i32, %arg1: memref<16x32xbf16, #tpu.memory_space<vmem>>, %arg2: memref<32x96xbf16, #tpu.memory_space<vmem>>, %arg3: memref<1x96xf32, #tpu.memory_space<vmem>>, %arg4: memref<3x16x32xbf16, #tpu.memory_space<vmem>>) attributes {dimension_semantics = [#tpu.dimension_semantics<parallel>], iteration_bounds = array<i64: 1>, scalar_prefetch = 0 : i64, scratch_operands = 0 : i64, tpu.core_type = #tpu.core_type<tc>, window_params = [{transform_indices = @transform_0, window_bounds = array<i64: 16, 32>}, {pipeline_mode = #tpu.pipeline_mode<synchronous>, transform_indices = @transform_1, window_bounds = array<i64: 32, 96>}, {pipeline_mode = #tpu.pipeline_mode<synchronous>, transform_indices = @transform_2, window_bounds = array<i64: 1, 96>}, {transform_indices = @transform_3, window_bounds = array<i64: 3, 16, 32>}]} {
    %c0 = arith.constant 0 : index
    %c0_0 = arith.constant 0 : index
    %0 = vector.load %arg1[%c0, %c0_0] : memref<16x32xbf16, #tpu.memory_space<vmem>>, vector<16x32xbf16>
    %c0_1 = arith.constant 0 : index
    %c0_2 = arith.constant 0 : index
    %1 = vector.load %arg2[%c0_1, %c0_2] : memref<32x96xbf16, #tpu.memory_space<vmem>>, vector<32x96xbf16>
    %cst = arith.constant dense<0.000000e+00> : vector<16x96xf32>
    %2 = tpu.matmul %0, %1, %cst {dimension_numbers = #tpu.dot_dimension_numbers<[1], [0], [0], [1], [0, 0, 1, 1], [], []>} : vector<16x32xbf16>, vector<32x96xbf16>, vector<16x96xf32> -> vector<16x96xf32>
    %c0_3 = arith.constant 0 : index
    %c0_4 = arith.constant 0 : index
    %3 = vector.load %arg3[%c0_3, %c0_4] : memref<1x96xf32, #tpu.memory_space<vmem>>, vector<1x96xf32>
    %4 = vector.broadcast %3 : vector<1x96xf32> to vector<16x96xf32>
    %5 = arith.addf %2, %4 : vector<16x96xf32>
    %6 = arith.truncf %5 : vector<16x96xf32> to vector<16x96xbf16>
    %7 = vector.extract_strided_slice %6 {offsets = [0, 0], sizes = [16, 32], strides = [1, 1]} : vector<16x96xbf16> to vector<16x32xbf16>
    %c0_5 = arith.constant 0 : index
    %c0_6 = arith.constant 0 : index
    %c0_7 = arith.constant 0 : index
    %8 = vector.load %arg4[%c0_5, %c0_6, %c0_7] : memref<3x16x32xbf16, #tpu.memory_space<vmem>>, vector<1x16x32xbf16>
    %9 = vector.shape_cast %8 : vector<1x16x32xbf16> to vector<16x32xbf16>
    %10 = vector.shape_cast %7 : vector<16x32xbf16> to vector<1x16x32xbf16>
    tpu.vector_store %arg4[%c0_5, %c0_6, %c0_7], %10 {strides = array<i32>} : memref<3x16x32xbf16, #tpu.memory_space<vmem>>, vector<1x16x32xbf16>,
    %11 = vector.extract_strided_slice %6 {offsets = [0, 32], sizes = [16, 32], strides = [1, 1]} : vector<16x96xbf16> to vector<16x32xbf16>
    %c1 = arith.constant 1 : index
    %c0_8 = arith.constant 0 : index
    %c0_9 = arith.constant 0 : index
    %12 = vector.load %arg4[%c1, %c0_8, %c0_9] : memref<3x16x32xbf16, #tpu.memory_space<vmem>>, vector<1x16x32xbf16>
    %13 = vector.shape_cast %12 : vector<1x16x32xbf16> to vector<16x32xbf16>
    %14 = vector.shape_cast %11 : vector<16x32xbf16> to vector<1x16x32xbf16>
    tpu.vector_store %arg4[%c1, %c0_8, %c0_9], %14 {strides = array<i32>} : memref<3x16x32xbf16, #tpu.memory_space<vmem>>, vector<1x16x32xbf16>,
    %15 = vector.extract_strided_slice %6 {offsets = [0, 64], sizes = [16, 32], strides = [1, 1]} : vector<16x96xbf16> to vector<16x32xbf16>
    %c2 = arith.constant 2 : index
    %c0_10 = arith.constant 0 : index
    %c0_11 = arith.constant 0 : index
    %16 = vector.load %arg4[%c2, %c0_10, %c0_11] : memref<3x16x32xbf16, #tpu.memory_space<vmem>>, vector<1x16x32xbf16>
    %17 = vector.shape_cast %16 : vector<1x16x32xbf16> to vector<16x32xbf16>
    %18 = vector.shape_cast %15 : vector<16x32xbf16> to vector<1x16x32xbf16>
    tpu.vector_store %arg4[%c2, %c0_10, %c0_11], %18 {strides = array<i32>} : memref<3x16x32xbf16, #tpu.memory_space<vmem>>, vector<1x16x32xbf16>,
    return
  }
  func.func @transform_0(%arg0: i32) -> (i32, i32) {
    %c0_i32 = arith.constant 0 : i32
    %c0_i32_0 = arith.constant 0 : i32
    return %arg0, %c0_i32 : i32, i32
  }
  func.func @transform_1(%arg0: i32) -> (i32, i32) {
    %c0_i32 = arith.constant 0 : i32
    %c0_i32_0 = arith.constant 0 : i32
    %c0_i32_1 = arith.constant 0 : i32
    return %c0_i32, %c0_i32_0 : i32, i32
  }
  func.func @transform_2(%arg0: i32) -> (i32, i32) {
    %c0_i32 = arith.constant 0 : i32
    %c0_i32_0 = arith.constant 0 : i32
    %c0_i32_1 = arith.constant 0 : i32
    return %c0_i32, %c0_i32_0 : i32, i32
  }
  func.func @transform_3(%arg0: i32) -> (i32, i32, i32) {
    %c0_i32 = arith.constant 0 : i32
    %c0_i32_0 = arith.constant 0 : i32
    %c0_i32_1 = arith.constant 0 : i32
    return %c0_i32, %arg0, %c0_i32_0 : i32, i32, i32
  }
}

module attributes {stable_mosaic.version = 11 : i64} {
  func.func @kernel(%arg0: i32, %arg1: memref<16x32xbf16, #tpu.memory_space<vmem>>, %arg2: memref<1x32xf32, #tpu.memory_space<vmem>>, %arg3: memref<1x32xf32, #tpu.memory_space<vmem>>, %arg4: memref<16x32xbf16, #tpu.memory_space<vmem>>) attributes {dimension_semantics = [#tpu.dimension_semantics<parallel>], iteration_bounds = array<i64: 1>, scalar_prefetch = 0 : i64, scratch_operands = 0 : i64, tpu.core_type = #tpu.core_type<tc>, window_params = [{transform_indices = @transform_0, window_bounds = array<i64: 16, 32>}, {pipeline_mode = #tpu.pipeline_mode<synchronous>, transform_indices = @transform_1, window_bounds = array<i64: 1, 32>}, {pipeline_mode = #tpu.pipeline_mode<synchronous>, transform_indices = @transform_2, window_bounds = array<i64: 1, 32>}, {transform_indices = @transform_3, window_bounds = array<i64: 16, 32>}]} {
    %c0 = arith.constant 0 : index
    %c0_0 = arith.constant 0 : index
    %0 = vector.load %arg1[%c0, %c0_0] : memref<16x32xbf16, #tpu.memory_space<vmem>>, vector<16x32xbf16>
    %1 = arith.extf %0 : vector<16x32xbf16> to vector<16x32xf32>
    %cst = arith.constant dense<0.000000e+00> : vector<16xf32>
    %2 = vector.multi_reduction <add>, %1, %cst [1] : vector<16x32xf32> to vector<16xf32>
    %3 = vector.shape_cast %2 : vector<16xf32> to vector<16x1xf32>
    %cst_1 = arith.constant 3.200000e+01 : f32
    %4 = vector.broadcast %cst_1 : f32 to vector<16x1xf32>
    %5 = arith.divf %3, %4 : vector<16x1xf32>
    %6 = vector.broadcast %5 : vector<16x1xf32> to vector<16x32xf32>
    %7 = arith.subf %1, %6 : vector<16x32xf32>
    %8 = arith.mulf %7, %7 : vector<16x32xf32>
    %cst_2 = arith.constant dense<0.000000e+00> : vector<16xf32>
    %9 = vector.multi_reduction <add>, %8, %cst_2 [1] : vector<16x32xf32> to vector<16xf32>
    %10 = vector.shape_cast %9 : vector<16xf32> to vector<16x1xf32>
    %cst_3 = arith.constant 3.200000e+01 : f32
    %11 = vector.broadcast %cst_3 : f32 to vector<16x1xf32>
    %12 = arith.divf %10, %11 : vector<16x1xf32>
    %13 = vector.broadcast %5 : vector<16x1xf32> to vector<16x32xf32>
    %14 = arith.subf %1, %13 : vector<16x32xf32>
    %cst_4 = arith.constant 9.99999996E-13 : f32
    %15 = vector.broadcast %cst_4 : f32 to vector<16x1xf32>
    %16 = arith.addf %12, %15 : vector<16x1xf32>
    %17 = math.rsqrt %16 : vector<16x1xf32>
    %18 = vector.broadcast %17 : vector<16x1xf32> to vector<16x32xf32>
    %19 = arith.mulf %14, %18 : vector<16x32xf32>
    %c0_5 = arith.constant 0 : index
    %c0_6 = arith.constant 0 : index
    %20 = vector.load %arg2[%c0_5, %c0_6] : memref<1x32xf32, #tpu.memory_space<vmem>>, vector<1x32xf32>
    %21 = vector.broadcast %20 : vector<1x32xf32> to vector<16x32xf32>
    %22 = arith.mulf %19, %21 : vector<16x32xf32>
    %c0_7 = arith.constant 0 : index
    %c0_8 = arith.constant 0 : index
    %23 = vector.load %arg3[%c0_7, %c0_8] : memref<1x32xf32, #tpu.memory_space<vmem>>, vector<1x32xf32>
    %24 = vector.broadcast %23 : vector<1x32xf32> to vector<16x32xf32>
    %25 = arith.addf %22, %24 : vector<16x32xf32>
    %26 = arith.truncf %25 : vector<16x32xf32> to vector<16x32xbf16>
    %c0_9 = arith.constant 0 : index
    %c0_10 = arith.constant 0 : index
    %27 = vector.load %arg4[%c0_9, %c0_10] : memref<16x32xbf16, #tpu.memory_space<vmem>>, vector<16x32xbf16>
    tpu.vector_store %arg4[%c0_9, %c0_10], %26 {strides = array<i32>} : memref<16x32xbf16, #tpu.memory_space<vmem>>, vector<16x32xbf16>,
    return
  }
  func.func @transform_0(%arg0: i32) -> (i32, i32) {
    %c0_i32 = arith.constant 0 : i32
    %c0_i32_0 = arith.constant 0 : i32
    return %arg0, %c0_i32 : i32, i32
  }
  func.func @transform_1(%arg0: i32) -> (i32, i32) {
    %c0_i32 = arith.constant 0 : i32
    %c0_i32_0 = arith.constant 0 : i32
    %c0_i32_1 = arith.constant 0 : i32
    return %c0_i32, %c0_i32_0 : i32, i32
  }
  func.func @transform_2(%arg0: i32) -> (i32, i32) {
    %c0_i32 = arith.constant 0 : i32
    %c0_i32_0 = arith.constant 0 : i32
    %c0_i32_1 = arith.constant 0 : i32
    return %c0_i32, %c0_i32_0 : i32, i32
  }
  func.func @transform_3(%arg0: i32) -> (i32, i32) {
    %c0_i32 = arith.constant 0 : i32
    %c0_i32_0 = arith.constant 0 : i32
    return %arg0, %c0_i32 : i32, i32
  }
}

module attributes {stable_mosaic.version = 11 : i64} {
  func.func @kernel(%arg0: i32, %arg1: i32, %arg2: memref<1x1x8x32xbf16, #tpu.memory_space<vmem>>, %arg3: memref<1x1x8x32xbf16, #tpu.memory_space<vmem>>, %arg4: memref<1x1x8x32xbf16, #tpu.memory_space<vmem>>, %arg5: memref<1x1x8xf32, #tpu.memory_space<vmem>>, %arg6: memref<1x8x32xbf16, #tpu.memory_space<vmem>>) attributes {dimension_semantics = [#tpu.dimension_semantics<parallel>, #tpu.dimension_semantics<parallel>], iteration_bounds = array<i64: 2, 1>, scalar_prefetch = 0 : i64, scratch_operands = 0 : i64, tpu.core_type = #tpu.core_type<tc>, window_params = [{transform_indices = @transform_0, window_bounds = array<i64: 1, 1, 8, 32>}, {transform_indices = @transform_1, window_bounds = array<i64: 1, 1, 8, 32>}, {transform_indices = @transform_2, window_bounds = array<i64: 1, 1, 8, 32>}, {transform_indices = @transform_3, window_bounds = array<i64: 1, 1, 8>}, {transform_indices = @transform_4, window_bounds = array<i64: 1, 8, 32>}]} {
    %c0 = arith.constant 0 : index
    %c0_0 = arith.constant 0 : index
    %c0_1 = arith.constant 0 : index
    %0 = vector.load %arg5[%c0, %c0_0, %c0_1] : memref<1x1x8xf32, #tpu.memory_space<vmem>>, vector<1x1x8xf32>
    %1 = vector.shape_cast %0 : vector<1x1x8xf32> to vector<1x8xf32>
    %c0_2 = arith.constant 0 : index
    %c0_3 = arith.constant 0 : index
    %c0_4 = arith.constant 0 : index
    %c0_5 = arith.constant 0 : index
    %2 = vector.load %arg2[%c0_2, %c0_3, %c0_4, %c0_5] : memref<1x1x8x32xbf16, #tpu.memory_space<vmem>>, vector<1x1x8x32xbf16>
    %3 = vector.shape_cast %2 : vector<1x1x8x32xbf16> to vector<8x32xbf16>
    %c0_6 = arith.constant 0 : index
    %c0_7 = arith.constant 0 : index
    %c0_8 = arith.constant 0 : index
    %c0_9 = arith.constant 0 : index
    %4 = vector.load %arg3[%c0_6, %c0_7, %c0_8, %c0_9] : memref<1x1x8x32xbf16, #tpu.memory_space<vmem>>, vector<1x1x8x32xbf16>
    %5 = vector.shape_cast %4 : vector<1x1x8x32xbf16> to vector<8x32xbf16>
    %c0_10 = arith.constant 0 : index
    %c0_11 = arith.constant 0 : index
    %c0_12 = arith.constant 0 : index
    %c0_13 = arith.constant 0 : index
    %6 = vector.load %arg4[%c0_10, %c0_11, %c0_12, %c0_13] : memref<1x1x8x32xbf16, #tpu.memory_space<vmem>>, vector<1x1x8x32xbf16>
    %7 = vector.shape_cast %6 : vector<1x1x8x32xbf16> to vector<8x32xbf16>
    %8 = vector.extract_strided_slice %3 {offsets = [0, 0], sizes = [8, 8], strides = [1, 1]} : vector<8x32xbf16> to vector<8x8xbf16>
    %9 = vector.extract_strided_slice %5 {offsets = [0, 0], sizes = [8, 8], strides = [1, 1]} : vector<8x32xbf16> to vector<8x8xbf16>
    %cst = arith.constant dense<0.000000e+00> : vector<8x8xf32>
    %10 = tpu.matmul %8, %9, %cst {dimension_numbers = #tpu.dot_dimension_numbers<[1], [1], [0], [0], [0, 0, 1, 0], [], []>} : vector<8x8xbf16>, vector<8x8xbf16>, vector<8x8xf32> -> vector<8x8xf32>
    %11 = vector.broadcast %1 : vector<1x8xf32> to vector<8x8xf32>
    %12 = arith.addf %10, %11 : vector<8x8xf32>
    %cst_14 = arith.constant dense<0xFF800000> : vector<8xf32>
    %13 = vector.multi_reduction <maximumf>, %12, %cst_14 [1] : vector<8x8xf32> to vector<8xf32>
    %14 = vector.shape_cast %13 : vector<8xf32> to vector<8x1xf32>
    %15 = vector.broadcast %14 : vector<8x1xf32> to vector<8x8xf32>
    %16 = arith.subf %12, %15 : vector<8x8xf32>
    %17 = math.exp %16 : vector<8x8xf32>
    %cst_15 = arith.constant dense<0.000000e+00> : vector<8xf32>
    %18 = vector.multi_reduction <add>, %17, %cst_15 [1] : vector<8x8xf32> to vector<8xf32>
    %19 = vector.shape_cast %18 : vector<8xf32> to vector<8x1xf32>
    %20 = tpu.reciprocal %19 {approx = true} : vector<8x1xf32> -> vector<8x1xf32>
    %21 = vector.broadcast %20 : vector<8x1xf32> to vector<8x8xf32>
    %22 = arith.mulf %17, %21 : vector<8x8xf32>
    %23 = arith.truncf %22 : vector<8x8xf32> to vector<8x8xbf16>
    %24 = vector.extract_strided_slice %7 {offsets = [0, 0], sizes = [8, 8], strides = [1, 1]} : vector<8x32xbf16> to vector<8x8xbf16>
    %cst_16 = arith.constant dense<0.000000e+00> : vector<8x8xf32>
    %25 = tpu.matmul %23, %24, %cst_16 {dimension_numbers = #tpu.dot_dimension_numbers<[1], [0], [0], [1], [0, 0, 1, 1], [], []>} : vector<8x8xbf16>, vector<8x8xbf16>, vector<8x8xf32> -> vector<8x8xf32>
    %26 = arith.truncf %25 : vector<8x8xf32> to vector<8x8xbf16>
    %c0_17 = arith.constant 0 : index
    %c0_18 = arith.constant 0 : index
    %c0_19 = arith.constant 0 : index
    %27 = vector.load %arg6[%c0_17, %c0_18, %c0_19] : memref<1x8x32xbf16, #tpu.memory_space<vmem>>, vector<1x8x8xbf16>
    %28 = vector.shape_cast %27 : vector<1x8x8xbf16> to vector<8x8xbf16>
    %29 = vector.shape_cast %26 : vector<8x8xbf16> to vector<1x8x8xbf16>
    tpu.vector_store %arg6[%c0_17, %c0_18, %c0_19], %29 {strides = array<i32>} : memref<1x8x32xbf16, #tpu.memory_space<vmem>>, vector<1x8x8xbf16>,
    %30 = vector.extract_strided_slice %3 {offsets = [0, 8], sizes = [8, 8], strides = [1, 1]} : vector<8x32xbf16> to vector<8x8xbf16>
    %31 = vector.extract_strided_slice %5 {offsets = [0, 8], sizes = [8, 8], strides = [1, 1]} : vector<8x32xbf16> to vector<8x8xbf16>
    %cst_20 = arith.constant dense<0.000000e+00> : vector<8x8xf32>
    %32 = tpu.matmul %30, %31, %cst_20 {dimension_numbers = #tpu.dot_dimension_numbers<[1], [1], [0], [0], [0, 0, 1, 0], [], []>} : vector<8x8xbf16>, vector<8x8xbf16>, vector<8x8xf32> -> vector<8x8xf32>
    %33 = vector.broadcast %1 : vector<1x8xf32> to vector<8x8xf32>
    %34 = arith.addf %32, %33 : vector<8x8xf32>
    %cst_21 = arith.constant dense<0xFF800000> : vector<8xf32>
    %35 = vector.multi_reduction <maximumf>, %34, %cst_21 [1] : vector<8x8xf32> to vector<8xf32>
    %36 = vector.shape_cast %35 : vector<8xf32> to vector<8x1xf32>
    %37 = vector.broadcast %36 : vector<8x1xf32> to vector<8x8xf32>
    %38 = arith.subf %34, %37 : vector<8x8xf32>
    %39 = math.exp %38 : vector<8x8xf32>
    %cst_22 = arith.constant dense<0.000000e+00> : vector<8xf32>
    %40 = vector.multi_reduction <add>, %39, %cst_22 [1] : vector<8x8xf32> to vector<8xf32>
    %41 = vector.shape_cast %40 : vector<8xf32> to vector<8x1xf32>
    %42 = tpu.reciprocal %41 {approx = true} : vector<8x1xf32> -> vector<8x1xf32>
    %43 = vector.broadcast %42 : vector<8x1xf32> to vector<8x8xf32>
    %44 = arith.mulf %39, %43 : vector<8x8xf32>
    %45 = arith.truncf %44 : vector<8x8xf32> to vector<8x8xbf16>
    %46 = vector.extract_strided_slice %7 {offsets = [0, 8], sizes = [8, 8], strides = [1, 1]} : vector<8x32xbf16> to vector<8x8xbf16>
    %cst_23 = arith.constant dense<0.000000e+00> : vector<8x8xf32>
    %47 = tpu.matmul %45, %46, %cst_23 {dimension_numbers = #tpu.dot_dimension_numbers<[1], [0], [0], [1], [0, 0, 1, 1], [], []>} : vector<8x8xbf16>, vector<8x8xbf16>, vector<8x8xf32> -> vector<8x8xf32>
    %48 = arith.truncf %47 : vector<8x8xf32> to vector<8x8xbf16>
    %c0_24 = arith.constant 0 : index
    %c0_25 = arith.constant 0 : index
    %c8 = arith.constant 8 : index
    %49 = vector.load %arg6[%c0_24, %c0_25, %c8] : memref<1x8x32xbf16, #tpu.memory_space<vmem>>, vector<1x8x8xbf16>
    %50 = vector.shape_cast %49 : vector<1x8x8xbf16> to vector<8x8xbf16>
    %51 = vector.shape_cast %48 : vector<8x8xbf16> to vector<1x8x8xbf16>
    tpu.vector_store %arg6[%c0_24, %c0_25, %c8], %51 {strides = array<i32>} : memref<1x8x32xbf16, #tpu.memory_space<vmem>>, vector<1x8x8xbf16>,
    %52 = vector.extract_strided_slice %3 {offsets = [0, 16], sizes = [8, 8], strides = [1, 1]} : vector<8x32xbf16> to vector<8x8xbf16>
    %53 = vector.extract_strided_slice %5 {offsets = [0, 16], sizes = [8, 8], strides = [1, 1]} : vector<8x32xbf16> to vector<8x8xbf16>
    %cst_26 = arith.constant dense<0.000000e+00> : vector<8x8xf32>
    %54 = tpu.matmul %52, %53, %cst_26 {dimension_numbers = #tpu.dot_dimension_numbers<[1], [1], [0], [0], [0, 0, 1, 0], [], []>} : vector<8x8xbf16>, vector<8x8xbf16>, vector<8x8xf32> -> vector<8x8xf32>
    %55 = vector.broadcast %1 : vector<1x8xf32> to vector<8x8xf32>
    %56 = arith.addf %54, %55 : vector<8x8xf32>
    %cst_27 = arith.constant dense<0xFF800000> : vector<8xf32>
    %57 = vector.multi_reduction <maximumf>, %56, %cst_27 [1] : vector<8x8xf32> to vector<8xf32>
    %58 = vector.shape_cast %57 : vector<8xf32> to vector<8x1xf32>
    %59 = vector.broadcast %58 : vector<8x1xf32> to vector<8x8xf32>
    %60 = arith.subf %56, %59 : vector<8x8xf32>
    %61 = math.exp %60 : vector<8x8xf32>
    %cst_28 = arith.constant dense<0.000000e+00> : vector<8xf32>
    %62 = vector.multi_reduction <add>, %61, %cst_28 [1] : vector<8x8xf32> to vector<8xf32>
    %63 = vector.shape_cast %62 : vector<8xf32> to vector<8x1xf32>
    %64 = tpu.reciprocal %63 {approx = true} : vector<8x1xf32> -> vector<8x1xf32>
    %65 = vector.broadcast %64 : vector<8x1xf32> to vector<8x8xf32>
    %66 = arith.mulf %61, %65 : vector<8x8xf32>
    %67 = arith.truncf %66 : vector<8x8xf32> to vector<8x8xbf16>
    %68 = vector.extract_strided_slice %7 {offsets = [0, 16], sizes = [8, 8], strides = [1, 1]} : vector<8x32xbf16> to vector<8x8xbf16>
    %cst_29 = arith.constant dense<0.000000e+00> : vector<8x8xf32>
    %69 = tpu.matmul %67, %68, %cst_29 {dimension_numbers = #tpu.dot_dimension_numbers<[1], [0], [0], [1], [0, 0, 1, 1], [], []>} : vector<8x8xbf16>, vector<8x8xbf16>, vector<8x8xf32> -> vector<8x8xf32>
    %70 = arith.truncf %69 : vector<8x8xf32> to vector<8x8xbf16>
    %c0_30 = arith.constant 0 : index
    %c0_31 = arith.constant 0 : index
    %c16 = arith.constant 16 : index
    %71 = vector.load %arg6[%c0_30, %c0_31, %c16] : memref<1x8x32xbf16, #tpu.memory_space<vmem>>, vector<1x8x8xbf16>
    %72 = vector.shape_cast %71 : vector<1x8x8xbf16> to vector<8x8xbf16>
    %73 = vector.shape_cast %70 : vector<8x8xbf16> to vector<1x8x8xbf16>
    tpu.vector_store %arg6[%c0_30, %c0_31, %c16], %73 {strides = array<i32>} : memref<1x8x32xbf16, #tpu.memory_space<vmem>>, vector<1x8x8xbf16>,
    %74 = vector.extract_strided_slice %3 {offsets = [0, 24], sizes = [8, 8], strides = [1, 1]} : vector<8x32xbf16> to vector<8x8xbf16>
    %75 = vector.extract_strided_slice %5 {offsets = [0, 24], sizes = [8, 8], strides = [1, 1]} : vector<8x32xbf16> to vector<8x8xbf16>
    %cst_32 = arith.constant dense<0.000000e+00> : vector<8x8xf32>
    %76 = tpu.matmul %74, %75, %cst_32 {dimension_numbers = #tpu.dot_dimension_numbers<[1], [1], [0], [0], [0, 0, 1, 0], [], []>} : vector<8x8xbf16>, vector<8x8xbf16>, vector<8x8xf32> -> vector<8x8xf32>
    %77 = vector.broadcast %1 : vector<1x8xf32> to vector<8x8xf32>
    %78 = arith.addf %76, %77 : vector<8x8xf32>
    %cst_33 = arith.constant dense<0xFF800000> : vector<8xf32>
    %79 = vector.multi_reduction <maximumf>, %78, %cst_33 [1] : vector<8x8xf32> to vector<8xf32>
    %80 = vector.shape_cast %79 : vector<8xf32> to vector<8x1xf32>
    %81 = vector.broadcast %80 : vector<8x1xf32> to vector<8x8xf32>
    %82 = arith.subf %78, %81 : vector<8x8xf32>
    %83 = math.exp %82 : vector<8x8xf32>
    %cst_34 = arith.constant dense<0.000000e+00> : vector<8xf32>
    %84 = vector.multi_reduction <add>, %83, %cst_34 [1] : vector<8x8xf32> to vector<8xf32>
    %85 = vector.shape_cast %84 : vector<8xf32> to vector<8x1xf32>
    %86 = tpu.reciprocal %85 {approx = true} : vector<8x1xf32> -> vector<8x1xf32>
    %87 = vector.broadcast %86 : vector<8x1xf32> to vector<8x8xf32>
    %88 = arith.mulf %83, %87 : vector<8x8xf32>
    %89 = arith.truncf %88 : vector<8x8xf32> to vector<8x8xbf16>
    %90 = vector.extract_strided_slice %7 {offsets = [0, 24], sizes = [8, 8], strides = [1, 1]} : vector<8x32xbf16> to vector<8x8xbf16>
    %cst_35 = arith.constant dense<0.000000e+00> : vector<8x8xf32>
    %91 = tpu.matmul %89, %90, %cst_35 {dimension_numbers = #tpu.dot_dimension_numbers<[1], [0], [0], [1], [0, 0, 1, 1], [], []>} : vector<8x8xbf16>, vector<8x8xbf16>, vector<8x8xf32> -> vector<8x8xf32>
    %92 = arith.truncf %91 : vector<8x8xf32> to vector<8x8xbf16>
    %c0_36 = arith.constant 0 : index
    %c0_37 = arith.constant 0 : index
    %c24 = arith.constant 24 : index
    %93 = vector.load %arg6[%c0_36, %c0_37, %c24] : memref<1x8x32xbf16, #tpu.memory_space<vmem>>, vector<1x8x8xbf16>
    %94 = vector.shape_cast %93 : vector<1x8x8xbf16> to vector<8x8xbf16>
    %95 = vector.shape_cast %92 : vector<8x8xbf16> to vector<1x8x8xbf16>
    tpu.vector_store %arg6[%c0_36, %c0_37, %c24], %95 {strides = array<i32>} : memref<1x8x32xbf16, #tpu.memory_space<vmem>>, vector<1x8x8xbf16>,
    return
  }
  func.func @transform_0(%arg0: i32, %arg1: i32) -> (i32, i32, i32, i32) {
    %c0_i32 = arith.constant 0 : i32
    %c0_i32_0 = arith.constant 0 : i32
    %c0_i32_1 = arith.constant 0 : i32
    return %c0_i32, %arg0, %c0_i32_0, %arg1 : i32, i32, i32, i32
  }
  func.func @transform_1(%arg0: i32, %arg1: i32) -> (i32, i32, i32, i32) {
    %c1_i32 = arith.constant 1 : i32
    %c0_i32 = arith.constant 0 : i32
    %c0_i32_0 = arith.constant 0 : i32
    return %c1_i32, %arg0, %c0_i32, %arg1 : i32, i32, i32, i32
  }
  func.func @transform_2(%arg0: i32, %arg1: i32) -> (i32, i32, i32, i32) {
    %c2_i32 = arith.constant 2 : i32
    %c0_i32 = arith.constant 0 : i32
    %c0_i32_0 = arith.constant 0 : i32
    return %c2_i32, %arg0, %c0_i32, %arg1 : i32, i32, i32, i32
  }
  func.func @transform_3(%arg0: i32, %arg1: i32) -> (i32, i32, i32) {
    %c0_i32 = arith.constant 0 : i32
    %c0_i32_0 = arith.constant 0 : i32
    %c0_i32_1 = arith.constant 0 : i32
    return %arg0, %c0_i32, %c0_i32_0 : i32, i32, i32
  }
  func.func @transform_4(%arg0: i32, %arg1: i32) -> (i32, i32, i32) {
    %c0_i32 = arith.constant 0 : i32
    %c0_i32_0 = arith.constant 0 : i32
    return %arg0, %c0_i32, %arg1 : i32, i32, i32
  }
}

module attributes {stable_mosaic.version = 11 : i64} {
  func.func @kernel(%arg0: i32, %arg1: memref<16x32xbf16, #tpu.memory_space<vmem>>, %arg2: memref<32x32xbf16, #tpu.memory_space<vmem>>, %arg3: memref<1x32xf32, #tpu.memory_space<vmem>>, %arg4: memref<16x32xbf16, #tpu.memory_space<vmem>>, %arg5: memref<1x32xf32, #tpu.memory_space<vmem>>, %arg6: memref<1x32xf32, #tpu.memory_space<vmem>>, %arg7: memref<16x32xbf16, #tpu.memory_space<vmem>>) attributes {dimension_semantics = [#tpu.dimension_semantics<parallel>], iteration_bounds = array<i64: 1>, scalar_prefetch = 0 : i64, scratch_operands = 0 : i64, tpu.core_type = #tpu.core_type<tc>, window_params = [{transform_indices = @transform_0, window_bounds = array<i64: 16, 32>}, {pipeline_mode = #tpu.pipeline_mode<synchronous>, transform_indices = @transform_1, window_bounds = array<i64: 32, 32>}, {pipeline_mode = #tpu.pipeline_mode<synchronous>, transform_indices = @transform_2, window_bounds = array<i64: 1, 32>}, {transform_indices = @transform_3, window_bounds = array<i64: 16, 32>}, {pipeline_mode = #tpu.pipeline_mode<synchronous>, transform_indices = @transform_4, window_bounds = array<i64: 1, 32>}, {pipeline_mode = #tpu.pipeline_mode<synchronous>, transform_indices = @transform_5, window_bounds = array<i64: 1, 32>}, {transform_indices = @transform_6, window_bounds = array<i64: 16, 32>}]} {
    %c0 = arith.constant 0 : index
    %c0_0 = arith.constant 0 : index
    %0 = vector.load %arg1[%c0, %c0_0] : memref<16x32xbf16, #tpu.memory_space<vmem>>, vector<16x32xbf16>
    %c0_1 = arith.constant 0 : index
    %c0_2 = arith.constant 0 : index
    %1 = vector.load %arg2[%c0_1, %c0_2] : memref<32x32xbf16, #tpu.memory_space<vmem>>, vector<32x32xbf16>
    %cst = arith.constant dense<0.000000e+00> : vector<16x32xf32>
    %2 = tpu.matmul %0, %1, %cst {dimension_numbers = #tpu.dot_dimension_numbers<[1], [0], [0], [1], [0, 0, 1, 1], [], []>} : vector<16x32xbf16>, vector<32x32xbf16>, vector<16x32xf32> -> vector<16x32xf32>
    %c0_3 = arith.constant 0 : index
    %c0_4 = arith.constant 0 : index
    %3 = vector.load %arg3[%c0_3, %c0_4] : memref<1x32xf32, #tpu.memory_space<vmem>>, vector<1x32xf32>
    %4 = vector.broadcast %3 : vector<1x32xf32> to vector<16x32xf32>
    %5 = arith.addf %2, %4 : vector<16x32xf32>
    %c0_5 = arith.constant 0 : index
    %c0_6 = arith.constant 0 : index
    %6 = vector.load %arg4[%c0_5, %c0_6] : memref<16x32xbf16, #tpu.memory_space<vmem>>, vector<16x32xbf16>
    %7 = arith.extf %6 : vector<16x32xbf16> to vector<16x32xf32>
    %8 = arith.addf %5, %7 : vector<16x32xf32>
    %cst_7 = arith.constant dense<0.000000e+00> : vector<16xf32>
    %9 = vector.multi_reduction <add>, %8, %cst_7 [1] : vector<16x32xf32> to vector<16xf32>
    %10 = vector.shape_cast %9 : vector<16xf32> to vector<16x1xf32>
    %cst_8 = arith.constant 3.200000e+01 : f32
    %11 = vector.broadcast %cst_8 : f32 to vector<16x1xf32>
    %12 = arith.divf %10, %11 : vector<16x1xf32>
    %13 = vector.broadcast %12 : vector<16x1xf32> to vector<16x32xf32>
    %14 = arith.subf %8, %13 : vector<16x32xf32>
    %15 = arith.mulf %14, %14 : vector<16x32xf32>
    %cst_9 = arith.constant dense<0.000000e+00> : vector<16xf32>
    %16 = vector.multi_reduction <add>, %15, %cst_9 [1] : vector<16x32xf32> to vector<16xf32>
    %17 = vector.shape_cast %16 : vector<16xf32> to vector<16x1xf32>
    %cst_10 = arith.constant 3.200000e+01 : f32
    %18 = vector.broadcast %cst_10 : f32 to vector<16x1xf32>
    %19 = arith.divf %17, %18 : vector<16x1xf32>
    %20 = vector.broadcast %12 : vector<16x1xf32> to vector<16x32xf32>
    %21 = arith.subf %8, %20 : vector<16x32xf32>
    %cst_11 = arith.constant 9.99999996E-13 : f32
    %22 = vector.broadcast %cst_11 : f32 to vector<16x1xf32>
    %23 = arith.addf %19, %22 : vector<16x1xf32>
    %24 = math.rsqrt %23 : vector<16x1xf32>
    %25 = vector.broadcast %24 : vector<16x1xf32> to vector<16x32xf32>
    %26 = arith.mulf %21, %25 : vector<16x32xf32>
    %c0_12 = arith.constant 0 : index
    %c0_13 = arith.constant 0 : index
    %27 = vector.load %arg5[%c0_12, %c0_13] : memref<1x32xf32, #tpu.memory_space<vmem>>, vector<1x32xf32>
    %28 = vector.broadcast %27 : vector<1x32xf32> to vector<16x32xf32>
    %29 = arith.mulf %26, %28 : vector<16x32xf32>
    %c0_14 = arith.constant 0 : index
    %c0_15 = arith.constant 0 : index
    %30 = vector.load %arg6[%c0_14, %c0_15] : memref<1x32xf32, #tpu.memory_space<vmem>>, vector<1x32xf32>
    %31 = vector.broadcast %30 : vector<1x32xf32> to vector<16x32xf32>
    %32 = arith.addf %29, %31 : vector<16x32xf32>
    %33 = arith.truncf %32 : vector<16x32xf32> to vector<16x32xbf16>
    %c0_16 = arith.constant 0 : index
    %c0_17 = arith.constant 0 : index
    %34 = vector.load %arg7[%c0_16, %c0_17] : memref<16x32xbf16, #tpu.memory_space<vmem>>, vector<16x32xbf16>
    tpu.vector_store %arg7[%c0_16, %c0_17], %33 {strides = array<i32>} : memref<16x32xbf16, #tpu.memory_space<vmem>>, vector<16x32xbf16>,
    return
  }
  func.func @transform_0(%arg0: i32) -> (i32, i32) {
    %c0_i32 = arith.constant 0 : i32
    %c0_i32_0 = arith.constant 0 : i32
    return %arg0, %c0_i32 : i32, i32
  }
  func.func @transform_1(%arg0: i32) -> (i32, i32) {
    %c0_i32 = arith.constant 0 : i32
    %c0_i32_0 = arith.constant 0 : i32
    %c0_i32_1 = arith.constant 0 : i32
    return %c0_i32, %c0_i32_0 : i32, i32
  }
  func.func @transform_2(%arg0: i32) -> (i32, i32) {
    %c0_i32 = arith.constant 0 : i32
    %c0_i32_0 = arith.constant 0 : i32
    %c0_i32_1 = arith.constant 0 : i32
    return %c0_i32, %c0_i32_0 : i32, i32
  }
  func.func @transform_3(%arg0: i32) -> (i32, i32) {
    %c0_i32 = arith.constant 0 : i32
    %c0_i32_0 = arith.constant 0 : i32
    return %arg0, %c0_i32 : i32, i32
  }
  func.func @transform_4(%arg0: i32) -> (i32, i32) {
    %c0_i32 = arith.constant 0 : i32
    %c0_i32_0 = arith.constant 0 : i32
    %c0_i32_1 = arith.constant 0 : i32
    return %c0_i32, %c0_i32_0 : i32, i32
  }
  func.func @transform_5(%arg0: i32) -> (i32, i32) {
    %c0_i32 = arith.constant 0 : i32
    %c0_i32_0 = arith.constant 0 : i32
    %c0_i32_1 = arith.constant 0 : i32
    return %c0_i32, %c0_i32_0 : i32, i32
  }
  func.func @transform_6(%arg0: i32) -> (i32, i32) {
    %c0_i32 = arith.constant 0 : i32
    %c0_i32_0 = arith.constant 0 : i32
    return %arg0, %c0_i32 : i32, i32
  }
}

module attributes {stable_mosaic.version = 11 : i64} {
  func.func @kernel(%arg0: i32, %arg1: memref<16x64xbf16, #tpu.memory_space<vmem>>, %arg2: memref<64x32xbf16, #tpu.memory_space<vmem>>, %arg3: memref<1x32xf32, #tpu.memory_space<vmem>>, %arg4: memref<16x32xbf16, #tpu.memory_space<vmem>>, %arg5: memref<1x32xf32, #tpu.memory_space<vmem>>, %arg6: memref<1x32xf32, #tpu.memory_space<vmem>>, %arg7: memref<16x32xf32, #tpu.memory_space<vmem>>) attributes {dimension_semantics = [#tpu.dimension_semantics<parallel>], iteration_bounds = array<i64: 1>, scalar_prefetch = 0 : i64, scratch_operands = 0 : i64, tpu.core_type = #tpu.core_type<tc>, window_params = [{transform_indices = @transform_0, window_bounds = array<i64: 16, 64>}, {pipeline_mode = #tpu.pipeline_mode<synchronous>, transform_indices = @transform_1, window_bounds = array<i64: 64, 32>}, {pipeline_mode = #tpu.pipeline_mode<synchronous>, transform_indices = @transform_2, window_bounds = array<i64: 1, 32>}, {transform_indices = @transform_3, window_bounds = array<i64: 16, 32>}, {pipeline_mode = #tpu.pipeline_mode<synchronous>, transform_indices = @transform_4, window_bounds = array<i64: 1, 32>}, {pipeline_mode = #tpu.pipeline_mode<synchronous>, transform_indices = @transform_5, window_bounds = array<i64: 1, 32>}, {transform_indices = @transform_6, window_bounds = array<i64: 16, 32>}]} {
    %c0 = arith.constant 0 : index
    %c0_0 = arith.constant 0 : index
    %0 = vector.load %arg1[%c0, %c0_0] : memref<16x64xbf16, #tpu.memory_space<vmem>>, vector<16x64xbf16>
    %c0_1 = arith.constant 0 : index
    %c0_2 = arith.constant 0 : index
    %1 = vector.load %arg2[%c0_1, %c0_2] : memref<64x32xbf16, #tpu.memory_space<vmem>>, vector<64x32xbf16>
    %cst = arith.constant dense<0.000000e+00> : vector<16x32xf32>
    %2 = tpu.matmul %0, %1, %cst {dimension_numbers = #tpu.dot_dimension_numbers<[1], [0], [0], [1], [0, 0, 1, 1], [], []>} : vector<16x64xbf16>, vector<64x32xbf16>, vector<16x32xf32> -> vector<16x32xf32>
    %c0_3 = arith.constant 0 : index
    %c0_4 = arith.constant 0 : index
    %3 = vector.load %arg3[%c0_3, %c0_4] : memref<1x32xf32, #tpu.memory_space<vmem>>, vector<1x32xf32>
    %4 = vector.broadcast %3 : vector<1x32xf32> to vector<16x32xf32>
    %5 = arith.addf %2, %4 : vector<16x32xf32>
    %c0_5 = arith.constant 0 : index
    %c0_6 = arith.constant 0 : index
    %6 = vector.load %arg4[%c0_5, %c0_6] : memref<16x32xbf16, #tpu.memory_space<vmem>>, vector<16x32xbf16>
    %7 = arith.extf %6 : vector<16x32xbf16> to vector<16x32xf32>
    %8 = arith.addf %5, %7 : vector<16x32xf32>
    %cst_7 = arith.constant dense<0.000000e+00> : vector<16xf32>
    %9 = vector.multi_reduction <add>, %8, %cst_7 [1] : vector<16x32xf32> to vector<16xf32>
    %10 = vector.shape_cast %9 : vector<16xf32> to vector<16x1xf32>
    %cst_8 = arith.constant 3.200000e+01 : f32
    %11 = vector.broadcast %cst_8 : f32 to vector<16x1xf32>
    %12 = arith.divf %10, %11 : vector<16x1xf32>
    %13 = vector.broadcast %12 : vector<16x1xf32> to vector<16x32xf32>
    %14 = arith.subf %8, %13 : vector<16x32xf32>
    %15 = arith.mulf %14, %14 : vector<16x32xf32>
    %cst_9 = arith.constant dense<0.000000e+00> : vector<16xf32>
    %16 = vector.multi_reduction <add>, %15, %cst_9 [1] : vector<16x32xf32> to vector<16xf32>
    %17 = vector.shape_cast %16 : vector<16xf32> to vector<16x1xf32>
    %cst_10 = arith.constant 3.200000e+01 : f32
    %18 = vector.broadcast %cst_10 : f32 to vector<16x1xf32>
    %19 = arith.divf %17, %18 : vector<16x1xf32>
    %20 = vector.broadcast %12 : vector<16x1xf32> to vector<16x32xf32>
    %21 = arith.subf %8, %20 : vector<16x32xf32>
    %cst_11 = arith.constant 9.99999996E-13 : f32
    %22 = vector.broadcast %cst_11 : f32 to vector<16x1xf32>
    %23 = arith.addf %19, %22 : vector<16x1xf32>
    %24 = math.rsqrt %23 : vector<16x1xf32>
    %25 = vector.broadcast %24 : vector<16x1xf32> to vector<16x32xf32>
    %26 = arith.mulf %21, %25 : vector<16x32xf32>
    %c0_12 = arith.constant 0 : index
    %c0_13 = arith.constant 0 : index
    %27 = vector.load %arg5[%c0_12, %c0_13] : memref<1x32xf32, #tpu.memory_space<vmem>>, vector<1x32xf32>
    %28 = vector.broadcast %27 : vector<1x32xf32> to vector<16x32xf32>
    %29 = arith.mulf %26, %28 : vector<16x32xf32>
    %c0_14 = arith.constant 0 : index
    %c0_15 = arith.constant 0 : index
    %30 = vector.load %arg6[%c0_14, %c0_15] : memref<1x32xf32, #tpu.memory_space<vmem>>, vector<1x32xf32>
    %31 = vector.broadcast %30 : vector<1x32xf32> to vector<16x32xf32>
    %32 = arith.addf %29, %31 : vector<16x32xf32>
    %c0_16 = arith.constant 0 : index
    %c0_17 = arith.constant 0 : index
    %33 = vector.load %arg7[%c0_16, %c0_17] : memref<16x32xf32, #tpu.memory_space<vmem>>, vector<16x32xf32>
    tpu.vector_store %arg7[%c0_16, %c0_17], %32 {strides = array<i32>} : memref<16x32xf32, #tpu.memory_space<vmem>>, vector<16x32xf32>,
    return
  }
  func.func @transform_0(%arg0: i32) -> (i32, i32) {
    %c0_i32 = arith.constant 0 : i32
    %c0_i32_0 = arith.constant 0 : i32
    return %arg0, %c0_i32 : i32, i32
  }
  func.func @transform_1(%arg0: i32) -> (i32, i32) {
    %c0_i32 = arith.constant 0 : i32
    %c0_i32_0 = arith.constant 0 : i32
    %c0_i32_1 = arith.constant 0 : i32
    return %c0_i32, %c0_i32_0 : i32, i32
  }
  func.func @transform_2(%arg0: i32) -> (i32, i32) {
    %c0_i32 = arith.constant 0 : i32
    %c0_i32_0 = arith.constant 0 : i32
    %c0_i32_1 = arith.constant 0 : i32
    return %c0_i32, %c0_i32_0 : i32, i32
  }
  func.func @transform_3(%arg0: i32) -> (i32, i32) {
    %c0_i32 = arith.constant 0 : i32
    %c0_i32_0 = arith.constant 0 : i32
    return %arg0, %c0_i32 : i32, i32
  }
  func.func @transform_4(%arg0: i32) -> (i32, i32) {
    %c0_i32 = arith.constant 0 : i32
    %c0_i32_0 = arith.constant 0 : i32
    %c0_i32_1 = arith.constant 0 : i32
    return %c0_i32, %c0_i32_0 : i32, i32
  }
  func.func @transform_5(%arg0: i32) -> (i32, i32) {
    %c0_i32 = arith.constant 0 : i32
    %c0_i32_0 = arith.constant 0 : i32
    %c0_i32_1 = arith.constant 0 : i32
    return %c0_i32, %c0_i32_0 : i32, i32
  }
  func.func @transform_6(%arg0: i32) -> (i32, i32) {
    %c0_i32 = arith.constant 0 : i32
    %c0_i32_0 = arith.constant 0 : i32
    return %arg0, %c0_i32 : i32, i32
  }
}

module attributes {stable_mosaic.version = 11 : i64} {
  func.func @kernel(%arg0: i32, %arg1: memref<16x64xbf16, #tpu.memory_space<vmem>>, %arg2: memref<64x32xbf16, #tpu.memory_space<vmem>>, %arg3: memref<1x32xf32, #tpu.memory_space<vmem>>, %arg4: memref<16x32xbf16, #tpu.memory_space<vmem>>, %arg5: memref<1x32xf32, #tpu.memory_space<vmem>>, %arg6: memref<1x32xf32, #tpu.memory_space<vmem>>, %arg7: memref<16x32xbf16, #tpu.memory_space<vmem>>) attributes {dimension_semantics = [#tpu.dimension_semantics<parallel>], iteration_bounds = array<i64: 1>, scalar_prefetch = 0 : i64, scratch_operands = 0 : i64, tpu.core_type = #tpu.core_type<tc>, window_params = [{transform_indices = @transform_0, window_bounds = array<i64: 16, 64>}, {pipeline_mode = #tpu.pipeline_mode<synchronous>, transform_indices = @transform_1, window_bounds = array<i64: 64, 32>}, {pipeline_mode = #tpu.pipeline_mode<synchronous>, transform_indices = @transform_2, window_bounds = array<i64: 1, 32>}, {transform_indices = @transform_3, window_bounds = array<i64: 16, 32>}, {pipeline_mode = #tpu.pipeline_mode<synchronous>, transform_indices = @transform_4, window_bounds = array<i64: 1, 32>}, {pipeline_mode = #tpu.pipeline_mode<synchronous>, transform_indices = @transform_5, window_bounds = array<i64: 1, 32>}, {transform_indices = @transform_6, window_bounds = array<i64: 16, 32>}]} {
    %c0 = arith.constant 0 : index
    %c0_0 = arith.constant 0 : index
    %0 = vector.load %arg1[%c0, %c0_0] : memref<16x64xbf16, #tpu.memory_space<vmem>>, vector<16x64xbf16>
    %c0_1 = arith.constant 0 : index
    %c0_2 = arith.constant 0 : index
    %1 = vector.load %arg2[%c0_1, %c0_2] : memref<64x32xbf16, #tpu.memory_space<vmem>>, vector<64x32xbf16>
    %cst = arith.constant dense<0.000000e+00> : vector<16x32xf32>
    %2 = tpu.matmul %0, %1, %cst {dimension_numbers = #tpu.dot_dimension_numbers<[1], [0], [0], [1], [0, 0, 1, 1], [], []>} : vector<16x64xbf16>, vector<64x32xbf16>, vector<16x32xf32> -> vector<16x32xf32>
    %c0_3 = arith.constant 0 : index
    %c0_4 = arith.constant 0 : index
    %3 = vector.load %arg3[%c0_3, %c0_4] : memref<1x32xf32, #tpu.memory_space<vmem>>, vector<1x32xf32>
    %4 = vector.broadcast %3 : vector<1x32xf32> to vector<16x32xf32>
    %5 = arith.addf %2, %4 : vector<16x32xf32>
    %c0_5 = arith.constant 0 : index
    %c0_6 = arith.constant 0 : index
    %6 = vector.load %arg4[%c0_5, %c0_6] : memref<16x32xbf16, #tpu.memory_space<vmem>>, vector<16x32xbf16>
    %7 = arith.extf %6 : vector<16x32xbf16> to vector<16x32xf32>
    %8 = arith.addf %5, %7 : vector<16x32xf32>
    %cst_7 = arith.constant dense<0.000000e+00> : vector<16xf32>
    %9 = vector.multi_reduction <add>, %8, %cst_7 [1] : vector<16x32xf32> to vector<16xf32>
    %10 = vector.shape_cast %9 : vector<16xf32> to vector<16x1xf32>
    %cst_8 = arith.constant 3.200000e+01 : f32
    %11 = vector.broadcast %cst_8 : f32 to vector<16x1xf32>
    %12 = arith.divf %10, %11 : vector<16x1xf32>
    %13 = vector.broadcast %12 : vector<16x1xf32> to vector<16x32xf32>
    %14 = arith.subf %8, %13 : vector<16x32xf32>
    %15 = arith.mulf %14, %14 : vector<16x32xf32>
    %cst_9 = arith.constant dense<0.000000e+00> : vector<16xf32>
    %16 = vector.multi_reduction <add>, %15, %cst_9 [1] : vector<16x32xf32> to vector<16xf32>
    %17 = vector.shape_cast %16 : vector<16xf32> to vector<16x1xf32>
    %cst_10 = arith.constant 3.200000e+01 : f32
    %18 = vector.broadcast %cst_10 : f32 to vector<16x1xf32>
    %19 = arith.divf %17, %18 : vector<16x1xf32>
    %20 = vector.broadcast %12 : vector<16x1xf32> to vector<16x32xf32>
    %21 = arith.subf %8, %20 : vector<16x32xf32>
    %cst_11 = arith.constant 9.99999996E-13 : f32
    %22 = vector.broadcast %cst_11 : f32 to vector<16x1xf32>
    %23 = arith.addf %19, %22 : vector<16x1xf32>
    %24 = math.rsqrt %23 : vector<16x1xf32>
    %25 = vector.broadcast %24 : vector<16x1xf32> to vector<16x32xf32>
    %26 = arith.mulf %21, %25 : vector<16x32xf32>
    %c0_12 = arith.constant 0 : index
    %c0_13 = arith.constant 0 : index
    %27 = vector.load %arg5[%c0_12, %c0_13] : memref<1x32xf32, #tpu.memory_space<vmem>>, vector<1x32xf32>
    %28 = vector.broadcast %27 : vector<1x32xf32> to vector<16x32xf32>
    %29 = arith.mulf %26, %28 : vector<16x32xf32>
    %c0_14 = arith.constant 0 : index
    %c0_15 = arith.constant 0 : index
    %30 = vector.load %arg6[%c0_14, %c0_15] : memref<1x32xf32, #tpu.memory_space<vmem>>, vector<1x32xf32>
    %31 = vector.broadcast %30 : vector<1x32xf32> to vector<16x32xf32>
    %32 = arith.addf %29, %31 : vector<16x32xf32>
    %33 = arith.truncf %32 : vector<16x32xf32> to vector<16x32xbf16>
    %c0_16 = arith.constant 0 : index
    %c0_17 = arith.constant 0 : index
    %34 = vector.load %arg7[%c0_16, %c0_17] : memref<16x32xbf16, #tpu.memory_space<vmem>>, vector<16x32xbf16>
    tpu.vector_store %arg7[%c0_16, %c0_17], %33 {strides = array<i32>} : memref<16x32xbf16, #tpu.memory_space<vmem>>, vector<16x32xbf16>,
    return
  }
  func.func @transform_0(%arg0: i32) -> (i32, i32) {
    %c0_i32 = arith.constant 0 : i32
    %c0_i32_0 = arith.constant 0 : i32
    return %arg0, %c0_i32 : i32, i32
  }
  func.func @transform_1(%arg0: i32) -> (i32, i32) {
    %c0_i32 = arith.constant 0 : i32
    %c0_i32_0 = arith.constant 0 : i32
    %c0_i32_1 = arith.constant 0 : i32
    return %c0_i32, %c0_i32_0 : i32, i32
  }
  func.func @transform_2(%arg0: i32) -> (i32, i32) {
    %c0_i32 = arith.constant 0 : i32
    %c0_i32_0 = arith.constant 0 : i32
    %c0_i32_1 = arith.constant 0 : i32
    return %c0_i32, %c0_i32_0 : i32, i32
  }
  func.func @transform_3(%arg0: i32) -> (i32, i32) {
    %c0_i32 = arith.constant 0 : i32
    %c0_i32_0 = arith.constant 0 : i32
    return %arg0, %c0_i32 : i32, i32
  }
  func.func @transform_4(%arg0: i32) -> (i32, i32) {
    %c0_i32 = arith.constant 0 : i32
    %c0_i32_0 = arith.constant 0 : i32
    %c0_i32_1 = arith.constant 0 : i32
    return %c0_i32, %c0_i32_0 : i32, i32
  }
  func.func @transform_5(%arg0: i32) -> (i32, i32) {
    %c0_i32 = arith.constant 0 : i32
    %c0_i32_0 = arith.constant 0 : i32
    %c0_i32_1 = arith.constant 0 : i32
    return %c0_i32, %c0_i32_0 : i32, i32
  }
  func.func @transform_6(%arg0: i32) -> (i32, i32) {
    %c0_i32 = arith.constant 0 : i32
    %c0_i32_0 = arith.constant 0 : i32
    return %arg0, %c0_i32 : i32, i32
  }
}

module attributes {stable_mosaic.version = 11 : i64} {
  func.func @kernel(%arg0: i32, %arg1: memref<16x32xbf16, #tpu.memory_space<vmem>>, %arg2: memref<32x64xbf16, #tpu.memory_space<vmem>>, %arg3: memref<1x64xf32, #tpu.memory_space<vmem>>, %arg4: memref<16x64xbf16, #tpu.memory_space<vmem>>) attributes {dimension_semantics = [#tpu.dimension_semantics<parallel>], iteration_bounds = array<i64: 1>, scalar_prefetch = 0 : i64, scratch_operands = 0 : i64, tpu.core_type = #tpu.core_type<tc>, window_params = [{transform_indices = @transform_0, window_bounds = array<i64: 16, 32>}, {pipeline_mode = #tpu.pipeline_mode<synchronous>, transform_indices = @transform_1, window_bounds = array<i64: 32, 64>}, {pipeline_mode = #tpu.pipeline_mode<synchronous>, transform_indices = @transform_2, window_bounds = array<i64: 1, 64>}, {transform_indices = @transform_3, window_bounds = array<i64: 16, 64>}]} {
    %c0 = arith.constant 0 : index
    %c0_0 = arith.constant 0 : index
    %0 = vector.load %arg1[%c0, %c0_0] : memref<16x32xbf16, #tpu.memory_space<vmem>>, vector<16x32xbf16>
    %c0_1 = arith.constant 0 : index
    %c0_2 = arith.constant 0 : index
    %1 = vector.load %arg2[%c0_1, %c0_2] : memref<32x64xbf16, #tpu.memory_space<vmem>>, vector<32x64xbf16>
    %cst = arith.constant dense<0.000000e+00> : vector<16x64xf32>
    %2 = tpu.matmul %0, %1, %cst {dimension_numbers = #tpu.dot_dimension_numbers<[1], [0], [0], [1], [0, 0, 1, 1], [], []>} : vector<16x32xbf16>, vector<32x64xbf16>, vector<16x64xf32> -> vector<16x64xf32>
    %c0_3 = arith.constant 0 : index
    %c0_4 = arith.constant 0 : index
    %3 = vector.load %arg3[%c0_3, %c0_4] : memref<1x64xf32, #tpu.memory_space<vmem>>, vector<1x64xf32>
    %4 = vector.broadcast %3 : vector<1x64xf32> to vector<16x64xf32>
    %5 = arith.addf %2, %4 : vector<16x64xf32>
    %6 = arith.mulf %5, %5 : vector<16x64xf32>
    %7 = arith.mulf %5, %6 : vector<16x64xf32>
    %cst_5 = arith.constant 4.471500e-02 : f32
    %8 = vector.broadcast %cst_5 : f32 to vector<16x64xf32>
    %9 = arith.mulf %8, %7 : vector<16x64xf32>
    %10 = arith.addf %5, %9 : vector<16x64xf32>
    %cst_6 = arith.constant 0.797884583 : f32
    %11 = vector.broadcast %cst_6 : f32 to vector<16x64xf32>
    %12 = arith.mulf %11, %10 : vector<16x64xf32>
    %13 = math.tanh %12 : vector<16x64xf32>
    %cst_7 = arith.constant 1.000000e+00 : f32
    %14 = vector.broadcast %cst_7 : f32 to vector<16x64xf32>
    %15 = arith.addf %14, %13 : vector<16x64xf32>
    %cst_8 = arith.constant 5.000000e-01 : f32
    %16 = vector.broadcast %cst_8 : f32 to vector<16x64xf32>
    %17 = arith.mulf %16, %15 : vector<16x64xf32>
    %18 = arith.mulf %5, %17 : vector<16x64xf32>
    %19 = arith.truncf %18 : vector<16x64xf32> to vector<16x64xbf16>
    %c0_9 = arith.constant 0 : index
    %c0_10 = arith.constant 0 : index
    %20 = vector.load %arg4[%c0_9, %c0_10] : memref<16x64xbf16, #tpu.memory_space<vmem>>, vector<16x64xbf16>
    tpu.vector_store %arg4[%c0_9, %c0_10], %19 {strides = array<i32>} : memref<16x64xbf16, #tpu.memory_space<vmem>>, vector<16x64xbf16>,
    return
  }
  func.func @transform_0(%arg0: i32) -> (i32, i32) {
    %c0_i32 = arith.constant 0 : i32
    %c0_i32_0 = arith.constant 0 : i32
    return %arg0, %c0_i32 : i32, i32
  }
  func.func @transform_1(%arg0: i32) -> (i32, i32) {
    %c0_i32 = arith.constant 0 : i32
    %c0_i32_0 = arith.constant 0 : i32
    %c0_i32_1 = arith.constant 0 : i32
    return %c0_i32, %c0_i32_0 : i32, i32
  }
  func.func @transform_2(%arg0: i32) -> (i32, i32) {
    %c0_i32 = arith.constant 0 : i32
    %c0_i32_0 = arith.constant 0 : i32
    %c0_i32_1 = arith.constant 0 : i32
    return %c0_i32, %c0_i32_0 : i32, i32
  }
  func.func @transform_3(%arg0: i32) -> (i32, i32) {
    %c0_i32 = arith.constant 0 : i32
    %c0_i32_0 = arith.constant 0 : i32
    return %arg0, %c0_i32 : i32, i32
  }
}

</mosaic_0001>

<bundles_post_ra>
// kernel: text_encoder_forward.12
= control target key start
LH: loop header
LB: loop body
LE: loop exit
PB: predicated region body
PF: predicated region fallthrough
CT: control target
= control target key end

     0   :  { %8 = vsyncpa [#allocation3], 0  ;;  %s404_s0 = inlined_call_operand.hbm [shape: bf16[16,32], index: 0, kind: input, shape index: {}]   ;;  %s405_s1 = inlined_call_operand.hbm [shape: bf16[32,96], index: 1, kind: input, shape index: {}]   ;;  %s406_s2 = inlined_call_operand.hbm [shape: f32[1,96], index: 2, kind: input, shape index: {}]   ;;  %s407_s3 = inlined_call_operand.hbm [shape: bf16[3,16,32], index: 3, kind: output, shape index: {}]  }
   0x1   :  { %9 = vsyncpa [#allocation6], 0 }
   0x2   :  { %10 = vsyncpa [#allocation4], 0  ;;  %s303_s12 = smov [#allocation5]   ;;  %s304_s14 = smov [#allocation2]  }
   0x3   :  { %s28_s13 = sshll.u32 %s303_s12, 4  ;;  %s16_s15 = sshll.u32 %s304_s14, 4  ;;  %s29_s13 = int_to_ptr.vmem [resolvable:$true] %s28_s13  ;;  %s332_s15 = int_to_ptr.vmem [resolvable:$true] %s16_s15 }
   0x4   :  { %s209_s18 = scalar_lea.hbm %s405_s1, 256 }
   0x5   :  { %p210_p0 = scmp.ne.s32.totalorder %s405_s1, %s209_s18  ;;  %p213_p1 = scmp.lt.u32.totalorder %s209_s18, %s405_s1 }
   0x7   :  { %p215_p2 = pnand %p213_p1, %p210_p0 }
   0x9   :  { %218 = shalt.err (!%p215_p2)
}
   0xa   :  { %s219_s23 = scalar_lea.vmem %s29_s13, 256  ;;  %p224_p4 = scmp.lt.s32.totalorder %s29_s13, %s29_s13 }
   0xb   :  { %p220_p3 = scmp.ne.s32.totalorder %s29_s13, %s219_s23  ;;  %p225_p5 = scmp.lt.s32.totalorder %s219_s23, %s219_s23 }
   0xd   :  { %p226_p6 = por %p225_p5, %p224_p4 }
   0xf   :  { %p227_p7 = pnand %p226_p6, %p220_p3 }
  0x11   :  { %230 = shalt.err (!%p227_p7)
}
  0x12   :  { %s305_s24 = smov 64   ;;  %s306_s25 = smov 4  }
  0x13   :  { %34 = dma.hbm_to_vmem [thread:$0]  %s405_s1, 256, %s29_s13, [#allocation6], %s305_s24, %s305_s24, %s306_s25  }
  0x14   :  { %s231_s30 = scalar_lea.hbm %s404_s0, 128 }
  0x15   :  { %p232_p8 = scmp.ne.s32.totalorder %s404_s0, %s231_s30  ;;  %p235_p9 = scmp.lt.u32.totalorder %s231_s30, %s404_s0 }
  0x17   :  { %p237_p10 = pnand %p235_p9, %p232_p8 }
  0x19   :  { %240 = shalt.err (!%p237_p10)
}
  0x1a   :  { %s241_s8 = scalar_lea.vmem %s332_s15, 128  ;;  %p246_p12 = scmp.lt.s32.totalorder %s332_s15, %s332_s15 }
  0x1b   :  { %p242_p11 = scmp.ne.s32.totalorder %s332_s15, %s241_s8  ;;  %p247_p13 = scmp.lt.s32.totalorder %s241_s8, %s241_s8 }
  0x1d   :  { %p248_p0 = por %p247_p13, %p246_p12 }
  0x1f   :  { %p249_p1 = pnand %p248_p0, %p242_p11 }
  0x21   :  { %252 = shalt.err (!%p249_p1)
}
  0x22   :  { %22 = dma.hbm_to_vmem [thread:$0]  %s404_s0, 128, %s332_s15, [#allocation3], %s305_s24, %s305_s24, %s306_s25  }
  0x23   :  { %s307_s10 = smov [#allocation7]   ;;  %s253_s14 = scalar_lea.hbm %s406_s2, 16 }
  0x24   :  { %s41_s11 = sshll.u32 %s307_s10, 4  ;;  %p254_p2 = scmp.ne.s32.totalorder %s406_s2, %s253_s14  ;;  %s42_s11 = int_to_ptr.vmem [resolvable:$true] %s41_s11 }
  0x25   :  { %p257_p3 = scmp.lt.u32.totalorder %s253_s14, %s406_s2 }
  0x27   :  { %p259_p4 = pnand %p257_p3, %p254_p2 }
  0x29   :  { %262 = shalt.err (!%p259_p4)
}
  0x2a   :  { %s263_s20 = scalar_lea.vmem %s42_s11, 16  ;;  %s267_s0 = scalar_lea.vmem %s42_s11, 32 }
  0x2b   :  { %p264_p5 = scmp.ne.s32.totalorder %s42_s11, %s263_s20  ;;  %p268_p6 = scmp.lt.s32.totalorder %s42_s11, %s42_s11 }
  0x2c   :  { %p269_p7 = scmp.lt.s32.totalorder %s267_s0, %s263_s20 }
  0x2e   :  { %p270_p8 = por %p269_p7, %p268_p6 }
  0x30   :  { %p271_p9 = pnand %p270_p8, %p264_p5 }
  0x32   :  { %274 = shalt.err (!%p271_p9)
}
  0x33   :  { %44 = dma.hbm_to_vmem [thread:$0]  %s406_s2, 16, %s42_s11, [#allocation6]  }
  0x34   :  { %297 = dma.done.wait [#allocation3], 128  }
  0x35   :  { %298 = vsyncadd [#allocation3], 4294967168 }
  0x36   :  { %299 = dma.done.wait [#allocation6], 272  }
  0x37   :  { %300 = vsyncadd [#allocation6], 4294967024  ;;  %v308_v0 = vmov 0.0   ;;  %vm309_vm0 = vmmov 0   ;;  %v206_v1 = vld [vmem:[#allocation5] sm:$0xff]   ;;  %v207_v2 = vld [vmem:[#allocation5 + $0x8] sm:$0xff]  }
  0x38   :  { %189 = vmatprep.subr.bf16.mxu0 %v308_v0  ;;  %193 = vmatprep.mubr.msk.bf16.mxu0 %vm309_vm0, %v308_v0  ;;  %v208_v3 = vld [vmem:[#allocation2] sm:$0xff]   ;;  %vm85_vm1 = vcmask 261120   ;;  %v177_v4 = vld [vmem:[#allocation7] ss:$0 sm:$0xff]  ;;  %vm138_vm2 = vcmask 257024   ;;  %s310_s2 = smov 96  }
  0x39   :  { %190 = vmatpush3.bf16.msra.mxu0 %v206_v1  ;;  %s311_s22 = smov [#allocation8]  }
  0x3a   :  { %191 = vmatprep.subr.bf16.mxu0 %v308_v0  ;;  %s164_s23 = sshll.u32 %s311_s22, 4  ;;  %s165_s23 = int_to_ptr.vmem [resolvable:$true] %s164_s23 }
  0x3b   :  { %s275_s26 = scalar_lea.vmem %s165_s23, 384  ;;  %p280_p11 = scmp.lt.s32.totalorder %s165_s23, %s165_s23 }
  0x3c   :  { %p276_p10 = scmp.ne.s32.totalorder %s165_s23, %s275_s26  ;;  %p281_p12 = scmp.lt.s32.totalorder %s275_s26, %s275_s26 }
  0x3d   :  { %192 = vmatpush3.bf16.msra.mxu0 %v207_v2 }
  0x3e   :  { %p282_p13 = por %p281_p12, %p280_p11 }
  0x40   :  { %194 = vmatmul.mubr.msk.bf16.vlgmr.msra.gmra.mrb[0].mxu0 %vm85_vm1, %v208_v3  ;;  %p283_p0 = pnand %p282_p13, %p276_p10 }
 0x113   :  { %v123_v5 = vpop.f32.mrb[0].mxu0 }
 0x114   :  { %v124_v6 = vadd.f32 %v177_v4, %v123_v5  ;;  %v195_v7 = vpop.f32.mrb[1].mxu0 }
 0x115   :  { %v126_v8 = vpop.f32.mrb[2].mxu0 }
 0x116   :  { %v184_v9 = vpack.c.bf16 %v124_v6, %v124_v6  ;;  %v127_v10 = vadd.f32 %v177_v4, %v126_v8  ;;  %v196_v11 = vpop.f32.mrb[3].mxu0 }
 0x118   :  { %139 = vst.msk [vmem:[#allocation8] sm:$0xf] %vm138_vm2, %v184_v9  ;;  %v185_v12 = vpack.c.bf16 %v127_v10, %v127_v10  ;;  %150 = vrot.lane.b32.xlu1 %v184_v9, %s305_s24  ;;  %141 = vrot.lane.b32.xlu0 %v184_v9, %s310_s2 }
 0x11a   :  { %140 = vst.msk [vmem:[#allocation8 + $0x4] sm:$0xf] %vm138_vm2, %v185_v12 }
 0x11c   :  { %152 = vrot.lane.b32.xlu1 %v185_v12, %s305_s24  ;;  %143 = vrot.lane.b32.xlu0 %v185_v12, %s310_s2 }
 0x18a   :  { %v151_v13 = vpop.permute.xlu1 %150  ;;  %v142_v14 = vpop.permute.xlu0 %141 }
 0x18b   :  { %157 = vst.msk [vmem:[#allocation8 + $0x10] sm:$0xf] %vm138_vm2, %v151_v13  ;;  %148 = vst.msk [vmem:[#allocation8 + $0x8] sm:$0xf] %vm138_vm2, %v142_v14 }
 0x18e   :  { %v153_v15 = vpop.permute.xlu1 %152  ;;  %v144_v16 = vpop.permute.xlu0 %143 }
 0x18f   :  { %158 = vst.msk [vmem:[#allocation8 + $0x14] sm:$0xf] %vm138_vm2, %v153_v15  ;;  %149 = vst.msk [vmem:[#allocation8 + $0xc] sm:$0xf] %vm138_vm2, %v144_v16 }
 0x190   :  { %286 = shalt.err (!%p283_p0)
}
 0x191   :  { %s287_s29 = scalar_lea.hbm %s407_s3, 384 }
 0x192   :  { %p288_p1 = scmp.ne.s32.totalorder %s407_s3, %s287_s29  ;;  %p291_p2 = scmp.lt.u32.totalorder %s287_s29, %s407_s3 }
 0x194   :  { %p293_p3 = pnand %p291_p2, %p288_p1 }
 0x196   :  { %296 = shalt.err (!%p293_p3)
}
 0x197   :  { %170 = dma.vmem_to_hbm [thread:$0]  %s165_s23, 384, %s407_s3, [#allocation4], %s305_s24, %s305_s24, %s306_s25  }
 0x198   :  { %301 = dma.done.wait [#allocation4], 384  }
 0x199   :  { %302 = vsyncadd [#allocation4], 4294966912 }
 0x19a   :  { %174 = vsyncpa [#allocation3], 1 }
 0x19b   :  { %175 = vsyncpa [#allocation6], 1 }
 0x19c   :  { %176 = vsyncpa [#allocation4], 1 }

// kernel: text_encoder_forward.14
= control target key start
LH: loop header
LB: loop body
LE: loop exit
PB: predicated region body
PF: predicated region fallthrough
CT: control target
= control target key end

     0   :  { %11 = vsyncpa [#allocation3], 0  ;;  %s620_s0 = inlined_call_operand.hbm [shape: bf16[16,32], index: 0, kind: input, shape index: {}]   ;;  %s621_s1 = inlined_call_operand.hbm [shape: bf16[32,32], index: 1, kind: input, shape index: {}]   ;;  %s622_s2 = inlined_call_operand.hbm [shape: f32[1,32], index: 2, kind: input, shape index: {}]   ;;  %s623_s3 = inlined_call_operand.hbm [shape: bf16[16,32], index: 3, kind: input, shape index: {}]   ;;  %s624_s4 = inlined_call_operand.hbm [shape: f32[1,32], index: 4, kind: input, shape index: {}]   ;;  %s625_s5 = inlined_call_operand.hbm [shape: f32[1,32], index: 5, kind: input, shape index: {}]   ;;  %s626_s6 = inlined_call_operand.hbm [shape: bf16[16,32], index: 6, kind: output, shape index: {}]  }
   0x1   :  { %12 = vsyncpa [#allocation6], 0 }
   0x2   :  { %13 = vsyncpa [#allocation9], 0 }
   0x3   :  { %14 = vsyncpa [#allocation12], 0 }
   0x4   :  { %15 = vsyncpa [#allocation4], 0  ;;  %s466_s21 = smov [#allocation5]   ;;  %s467_s23 = smov [#allocation8]  }
   0x5   :  { %s33_s22 = sshll.u32 %s466_s21, 4  ;;  %s55_s24 = sshll.u32 %s467_s23, 4  ;;  %s34_s22 = int_to_ptr.vmem [resolvable:$true] %s33_s22  ;;  %s512_s24 = int_to_ptr.vmem [resolvable:$true] %s55_s24 }
   0x6   :  { %s302_s27 = scalar_lea.hbm %s621_s1, 256 }
   0x7   :  { %p303_p0 = scmp.ne.s32.totalorder %s621_s1, %s302_s27  ;;  %p306_p1 = scmp.lt.u32.totalorder %s302_s27, %s621_s1 }
   0x9   :  { %p308_p2 = pnand %p306_p1, %p303_p0 }
   0xb   :  { %311 = shalt.err (!%p308_p2)
}
   0xc   :  { %s312_s8 = scalar_lea.vmem %s34_s22, 256  ;;  %p317_p4 = scmp.lt.s32.totalorder %s34_s22, %s34_s22 }
   0xd   :  { %p313_p3 = scmp.ne.s32.totalorder %s34_s22, %s312_s8  ;;  %p318_p5 = scmp.lt.s32.totalorder %s312_s8, %s312_s8 }
   0xf   :  { %p319_p6 = por %p318_p5, %p317_p4 }
  0x11   :  { %p320_p7 = pnand %p319_p6, %p313_p3 }
  0x13   :  { %323 = shalt.err (!%p320_p7)
}
  0x14   :  { %s468_s9 = smov 64   ;;  %s469_s10 = smov 4  }
  0x15   :  { %39 = dma.hbm_to_vmem [thread:$0]  %s621_s1, 256, %s34_s22, [#allocation6], %s468_s9, %s468_s9, %s469_s10  }
  0x16   :  { %s324_s15 = scalar_lea.hbm %s623_s3, 128 }
  0x17   :  { %p325_p8 = scmp.ne.s32.totalorder %s623_s3, %s324_s15  ;;  %p328_p9 = scmp.lt.u32.totalorder %s324_s15, %s623_s3 }
  0x19   :  { %p330_p10 = pnand %p328_p9, %p325_p8 }
  0x1b   :  { %333 = shalt.err (!%p330_p10)
}
  0x1c   :  { %s334_s20 = scalar_lea.vmem %s512_s24, 128  ;;  %p339_p12 = scmp.lt.s32.totalorder %s512_s24, %s512_s24 }
  0x1d   :  { %p335_p11 = scmp.ne.s32.totalorder %s512_s24, %s334_s20  ;;  %p340_p13 = scmp.lt.s32.totalorder %s334_s20, %s334_s20 }
  0x1f   :  { %p341_p0 = por %p340_p13, %p339_p12 }
  0x21   :  { %p342_p1 = pnand %p341_p0, %p335_p11 }
  0x23   :  { %345 = shalt.err (!%p342_p1)
}
  0x24   :  { %61 = dma.hbm_to_vmem [thread:$0]  %s623_s3, 128, %s512_s24, [#allocation9], %s468_s9, %s468_s9, %s469_s10  }
  0x25   :  { %s470_s22 = smov [#allocation2]   ;;  %s471_s25 = smov [#allocation7]  }
  0x26   :  { %s21_s23 = sshll.u32 %s470_s22, 4  ;;  %s46_s26 = sshll.u32 %s471_s25, 4  ;;  %s22_s23 = int_to_ptr.vmem [resolvable:$true] %s21_s23  ;;  %s47_s26 = int_to_ptr.vmem [resolvable:$true] %s46_s26 }
  0x27   :  { %s346_s29 = scalar_lea.hbm %s620_s0, 128 }
  0x28   :  { %p347_p2 = scmp.ne.s32.totalorder %s620_s0, %s346_s29  ;;  %p350_p3 = scmp.lt.u32.totalorder %s346_s29, %s620_s0 }
  0x2a   :  { %p352_p4 = pnand %p350_p3, %p347_p2 }
  0x2c   :  { %355 = shalt.err (!%p352_p4)
}
  0x2d   :  { %s356_s3 = scalar_lea.vmem %s22_s23, 128  ;;  %p361_p6 = scmp.lt.s32.totalorder %s22_s23, %s22_s23 }
  0x2e   :  { %p357_p5 = scmp.ne.s32.totalorder %s22_s23, %s356_s3  ;;  %p362_p7 = scmp.lt.s32.totalorder %s356_s3, %s356_s3 }
  0x30   :  { %p363_p8 = por %p362_p7, %p361_p6 }
  0x32   :  { %p364_p9 = pnand %p363_p8, %p357_p5 }
  0x34   :  { %367 = shalt.err (!%p364_p9)
}
  0x35   :  { %27 = dma.hbm_to_vmem [thread:$0]  %s620_s0, 128, %s22_s23, [#allocation3], %s468_s9, %s468_s9, %s469_s10  }
  0x36   :  { %s368_s15 = scalar_lea.hbm %s622_s2, 16 }
  0x37   :  { %p369_p10 = scmp.ne.s32.totalorder %s622_s2, %s368_s15  ;;  %p372_p11 = scmp.lt.u32.totalorder %s368_s15, %s622_s2 }
  0x39   :  { %p374_p12 = pnand %p372_p11, %p369_p10 }
  0x3b   :  { %377 = shalt.err (!%p374_p12)
}
  0x3c   :  { %s378_s20 = scalar_lea.vmem %s47_s26, 16  ;;  %s382_s1 = scalar_lea.vmem %s47_s26, 32 }
  0x3d   :  { %p379_p13 = scmp.ne.s32.totalorder %s47_s26, %s378_s20  ;;  %p383_p0 = scmp.lt.s32.totalorder %s47_s26, %s47_s26 }
  0x3e   :  { %p384_p1 = scmp.lt.s32.totalorder %s382_s1, %s378_s20 }
  0x40   :  { %p385_p2 = por %p384_p1, %p383_p0 }
  0x42   :  { %p386_p3 = pnand %p385_p2, %p379_p13 }
  0x44   :  { %389 = shalt.err (!%p386_p3)
}
  0x45   :  { %49 = dma.hbm_to_vmem [thread:$0]  %s622_s2, 16, %s47_s26, [#allocation6]  }
  0x46   :  { %s472_s22 = smov [#allocation10]   ;;  %s473_s25 = smov [#allocation11]  }
  0x47   :  { %s68_s23 = sshll.u32 %s472_s22, 4  ;;  %s78_s27 = sshll.u32 %s473_s25, 4  ;;  %s69_s23 = int_to_ptr.vmem [resolvable:$true] %s68_s23  ;;  %s79_s27 = int_to_ptr.vmem [resolvable:$true] %s78_s27 }
  0x48   :  { %s390_s30 = scalar_lea.hbm %s624_s4, 16 }
  0x49   :  { %p391_p4 = scmp.ne.s32.totalorder %s624_s4, %s390_s30  ;;  %p394_p5 = scmp.lt.u32.totalorder %s390_s30, %s624_s4 }
  0x4b   :  { %p396_p6 = pnand %p394_p5, %p391_p4 }
  0x4d   :  { %399 = shalt.err (!%p396_p6)
}
  0x4e   :  { %s400_s2 = scalar_lea.vmem %s69_s23, 16  ;;  %s404_s26 = scalar_lea.vmem %s69_s23, 32 }
  0x4f   :  { %p401_p7 = scmp.ne.s32.totalorder %s69_s23, %s400_s2  ;;  %p405_p8 = scmp.lt.s32.totalorder %s69_s23, %s69_s23 }
  0x50   :  { %p406_p9 = scmp.lt.s32.totalorder %s404_s26, %s400_s2 }
  0x52   :  { %p407_p10 = por %p406_p9, %p405_p8 }
  0x54   :  { %p408_p11 = pnand %p407_p10, %p401_p7 }
  0x56   :  { %411 = shalt.err (!%p408_p11)
}
  0x57   :  { %71 = dma.hbm_to_vmem [thread:$0]  %s624_s4, 16, %s69_s23, [#allocation9]  }
  0x58   :  { %s412_s15 = scalar_lea.hbm %s625_s5, 16 }
  0x59   :  { %p413_p12 = scmp.ne.s32.totalorder %s625_s5, %s412_s15  ;;  %p416_p13 = scmp.lt.u32.totalorder %s412_s15, %s625_s5 }
  0x5b   :  { %p418_p0 = pnand %p416_p13, %p413_p12 }
  0x5d   :  { %421 = shalt.err (!%p418_p0)
}
  0x5e   :  { %s422_s20 = scalar_lea.vmem %s79_s27, 16  ;;  %s426_s1 = scalar_lea.vmem %s79_s27, 32 }
  0x5f   :  { %p423_p1 = scmp.ne.s32.totalorder %s79_s27, %s422_s20  ;;  %p427_p2 = scmp.lt.s32.totalorder %s79_s27, %s79_s27 }
  0x60   :  { %p428_p3 = scmp.lt.s32.totalorder %s426_s1, %s422_s20 }
  0x62   :  { %p429_p4 = por %p428_p3, %p427_p2 }
  0x64   :  { %p430_p5 = pnand %p429_p4, %p423_p1 }
  0x66   :  { %433 = shalt.err (!%p430_p5)
}
  0x67   :  { %81 = dma.hbm_to_vmem [thread:$0]  %s625_s5, 16, %s79_s27, [#allocation12]  }
  0x68   :  { %456 = dma.done.wait [#allocation3], 128  }
  0x69   :  { %457 = vsyncadd [#allocation3], 4294967168 }
  0x6a   :  { %458 = dma.done.wait [#allocation6], 272  }
  0x6b   :  { %459 = vsyncadd [#allocation6], 4294967024 }
  0x6c   :  { %460 = dma.done.wait [#allocation9], 144  }
  0x6d   :  { %461 = vsyncadd [#allocation9], 4294967152 }
  0x6e   :  { %462 = dma.done.wait [#allocation12], 16  }
  0x6f   :  { %463 = vsyncadd [#allocation12], 4294967280  ;;  %v474_v0 = vmov 0.0   ;;  %vm475_vm0 = vmmov 0   ;;  %v295_v1 = vld [vmem:[#allocation5] sm:$0xff]   ;;  %v296_v2 = vld [vmem:[#allocation5 + $0x8] sm:$0xff]  }
  0x70   :  { %276 = vmatprep.subr.bf16.mxu0 %v474_v0  ;;  %280 = vmatprep.mubr.msk.bf16.mxu0 %vm475_vm0, %v474_v0  ;;  %v297_v3 = vld [vmem:[#allocation2] sm:$0xff]   ;;  %vm131_vm1 = vcmask 261120   ;;  %v258_v5 = vld [vmem:[#allocation7] ss:$0 sm:$0xff]  ;;  %vm235_vm2 = vcmask 257024   ;;  %s476_s5 = smov [#allocation13]  }
  0x71   :  { %277 = vmatpush3.bf16.msra.mxu0 %v295_v1  ;;  %v270_v4 = vld [vmem:[#allocation8] sm:$0xff]   ;;  %v263_v35 = vld [vmem:[#allocation10] ss:$0 sm:$0xff]  ;;  %v264_v37 = vld [vmem:[#allocation11] ss:$0 sm:$0xff]  ;;  %s243_s21 = sshll.u32 %s476_s5, 4  ;;  %s244_s21 = int_to_ptr.vmem [resolvable:$true] %s243_s21 }
  0x72   :  { %278 = vmatprep.subr.bf16.mxu0 %v474_v0  ;;  %v271_v6 = vunpack.c.l.bf16 %v270_v4  ;;  %v272_v10 = vunpack.c.h.bf16 %v270_v4  ;;  %s434_s22 = scalar_lea.vmem %s244_s21, 128  ;;  %p439_p7 = scmp.lt.s32.totalorder %s244_s21, %s244_s21 }
  0x73   :  { %p435_p6 = scmp.ne.s32.totalorder %s244_s21, %s434_s22  ;;  %p440_p8 = scmp.lt.s32.totalorder %s434_s22, %s434_s22 }
  0x75   :  { %279 = vmatpush3.bf16.msra.mxu0 %v296_v2  ;;  %p441_p9 = por %p440_p8, %p439_p7 }
  0x77   :  { %p442_p10 = pnand %p441_p9, %p435_p6 }
  0x78   :  { %281 = vmatmul.mubr.msk.bf16.vlgmr.msra.gmra.mrb[0].mxu0 %vm131_vm1, %v297_v3 }
 0x14b   :  { %v169_v7 = vpop.f32.mrb[0].mxu0 }
 0x14c   :  { %v170_v8 = vadd.f32 %v258_v5, %v169_v7  ;;  %v282_v9 = vpop.f32.mrb[1].mxu0 }
 0x14d   :  { %v172_v11 = vpop.f32.mrb[2].mxu0 }
 0x14e   :  { %v173_v12 = vadd.f32 %v258_v5, %v172_v11  ;;  %v283_v13 = vpop.f32.mrb[3].mxu0  ;;  %v180_v14 = vadd.f32 %v271_v6, %v170_v8 }
 0x150   :  { %v182_v15 = vsel %vm131_vm1, %v180_v14, 0.0  ;;  %v181_v16 = vadd.f32 %v272_v10, %v173_v12 }
 0x151   :  { %183 = vadd.xlane.f32.xlu0 %v182_v15 }
 0x152   :  { %v185_v17 = vsel %vm131_vm1, %v181_v16, 0.0 }
 0x155   :  { %186 = vadd.xlane.f32.xlu0 %v185_v17 }
 0x1de   :  { %v184_v18 = vpop.xlane.xlu0 %183 }
 0x1df   :  { %v189_v19 = vmul.f32 0.03125, %v184_v18 }
 0x1e1   :  { %v191_v20 = vsub.f32 %v180_v14, %v189_v19 }
 0x1e2   :  { %v187_v21 = vpop.xlane.xlu0 %186 }
 0x1e3   :  { %v190_v22 = vmul.f32 0.03125, %v187_v21  ;;  %v193_v23 = vmul.f32 %v191_v20, %v191_v20 }
 0x1e5   :  { %v192_v24 = vsub.f32 %v181_v16, %v190_v22  ;;  %v195_v25 = vsel %vm131_vm1, %v193_v23, 0.0 }
 0x1e6   :  { %196 = vadd.xlane.f32.xlu1 %v195_v25 }
 0x1e7   :  { %v194_v26 = vmul.f32 %v192_v24, %v192_v24 }
 0x1e9   :  { %v198_v27 = vsel %vm131_vm1, %v194_v26, 0.0 }
 0x1ea   :  { %199 = vadd.xlane.f32.xlu1 %v198_v27 }
 0x273   :  { %v197_v28 = vpop.xlane.xlu1 %196 }
 0x274   :  { %v201_v29 = vmul.f32 0.03125, %v197_v28 }
 0x276   :  { %v203_v30 = vadd.f32 1e-12, %v201_v29 }
 0x277   :  { %v200_v31 = vpop.xlane.xlu1 %199 }
 0x278   :  { %298 = vrsqrt.f32 %v203_v30  ;;  %v202_v32 = vmul.f32 0.03125, %v200_v31 }
 0x27a   :  { %v204_v33 = vadd.f32 1e-12, %v202_v32 }
 0x27c   :  { %300 = vrsqrt.f32 %v204_v33 }
 0x282   :  { %v299_v34 = vpop.eup %298 }
 0x283   :  { %v207_v36 = vmul.f32 %v299_v34, %v191_v20 }
 0x285   :  { %v216_v38 = vmul.f32 %v263_v35, %v207_v36 }
 0x286   :  { %v301_v39 = vpop.eup %300 }
 0x287   :  { %v208_v40 = vmul.f32 %v301_v39, %v192_v24  ;;  %v225_v41 = vadd.f32 %v264_v37, %v216_v38 }
 0x289   :  { %v217_v42 = vmul.f32 %v263_v35, %v208_v40  ;;  %v267_v43 = vpack.c.bf16 %v225_v41, %v225_v41 }
 0x28b   :  { %v226_v44 = vadd.f32 %v264_v37, %v217_v42  ;;  %236 = vst.msk [vmem:[#allocation13] sm:$0xf] %vm235_vm2, %v267_v43 }
 0x28d   :  { %v268_v45 = vpack.c.bf16 %v226_v44, %v226_v44 }
 0x28f   :  { %237 = vst.msk [vmem:[#allocation13 + $0x4] sm:$0xf] %vm235_vm2, %v268_v45 }
 0x290   :  { %445 = shalt.err (!%p442_p10)
}
 0x291   :  { %s446_s27 = scalar_lea.hbm %s626_s6, 128 }
 0x292   :  { %p447_p11 = scmp.ne.s32.totalorder %s626_s6, %s446_s27  ;;  %p450_p12 = scmp.lt.u32.totalorder %s446_s27, %s626_s6 }
 0x294   :  { %p452_p13 = pnand %p450_p12, %p447_p11 }
 0x296   :  { %455 = shalt.err (!%p452_p13)
}
 0x297   :  { %249 = dma.vmem_to_hbm [thread:$0]  %s244_s21, 128, %s626_s6, [#allocation4], %s468_s9, %s468_s9, %s469_s10  }
 0x298   :  { %464 = dma.done.wait [#allocation4], 128  }
 0x299   :  { %465 = vsyncadd [#allocation4], 4294967168 }
 0x29a   :  { %253 = vsyncpa [#allocation3], 1 }
 0x29b   :  { %254 = vsyncpa [#allocation6], 1 }
 0x29c   :  { %255 = vsyncpa [#allocation9], 1 }
 0x29d   :  { %256 = vsyncpa [#allocation12], 1 }
 0x29e   :  { %257 = vsyncpa [#allocation4], 1 }

// kernel: text_encoder_forward.11
= control target key start
LH: loop header
LB: loop body
LE: loop exit
PB: predicated region body
PF: predicated region fallthrough
CT: control target
= control target key end

     0   :  { %8 = vsyncpa [#allocation3], 0  ;;  %s336_s0 = inlined_call_operand.hbm [shape: bf16[16,32], index: 0, kind: input, shape index: {}]   ;;  %s337_s1 = inlined_call_operand.hbm [shape: f32[1,32], index: 1, kind: input, shape index: {}]   ;;  %s338_s2 = inlined_call_operand.hbm [shape: f32[1,32], index: 2, kind: input, shape index: {}]   ;;  %s339_s3 = inlined_call_operand.hbm [shape: bf16[16,32], index: 3, kind: output, shape index: {}]  }
   0x1   :  { %9 = vsyncpa [#allocation6], 0 }
   0x2   :  { %10 = vsyncpa [#allocation4], 0  ;;  %s245_s12 = smov [#allocation5]   ;;  %s246_s14 = smov [#allocation2]  }
   0x3   :  { %s29_s13 = sshll.u32 %s245_s12, 4  ;;  %s16_s15 = sshll.u32 %s246_s14, 4  ;;  %s30_s13 = int_to_ptr.vmem [resolvable:$true] %s29_s13  ;;  %s271_s15 = int_to_ptr.vmem [resolvable:$true] %s16_s15 }
   0x4   :  { %s151_s18 = scalar_lea.hbm %s337_s1, 16 }
   0x5   :  { %p152_p0 = scmp.ne.s32.totalorder %s337_s1, %s151_s18  ;;  %p155_p1 = scmp.lt.u32.totalorder %s151_s18, %s337_s1 }
   0x7   :  { %p157_p2 = pnand %p155_p1, %p152_p0 }
   0x9   :  { %160 = shalt.err (!%p157_p2)
}
   0xa   :  { %s161_s23 = scalar_lea.vmem %s30_s13, 16  ;;  %s165_s24 = scalar_lea.vmem %s30_s13, 32 }
   0xb   :  { %p162_p3 = scmp.ne.s32.totalorder %s30_s13, %s161_s23  ;;  %p166_p4 = scmp.lt.s32.totalorder %s30_s13, %s30_s13 }
   0xc   :  { %p167_p5 = scmp.lt.s32.totalorder %s165_s24, %s161_s23 }
   0xe   :  { %p168_p6 = por %p167_p5, %p166_p4 }
  0x10   :  { %p169_p7 = pnand %p168_p6, %p162_p3 }
  0x12   :  { %172 = shalt.err (!%p169_p7)
}
  0x13   :  { %32 = dma.hbm_to_vmem [thread:$0]  %s337_s1, 16, %s30_s13, [#allocation6]  }
  0x14   :  { %s173_s29 = scalar_lea.hbm %s336_s0, 128 }
  0x15   :  { %p174_p8 = scmp.ne.s32.totalorder %s336_s0, %s173_s29  ;;  %p177_p9 = scmp.lt.u32.totalorder %s173_s29, %s336_s0 }
  0x17   :  { %p179_p10 = pnand %p177_p9, %p174_p8 }
  0x19   :  { %182 = shalt.err (!%p179_p10)
}
  0x1a   :  { %s183_s7 = scalar_lea.vmem %s271_s15, 128  ;;  %p188_p12 = scmp.lt.s32.totalorder %s271_s15, %s271_s15 }
  0x1b   :  { %p184_p11 = scmp.ne.s32.totalorder %s271_s15, %s183_s7  ;;  %p189_p13 = scmp.lt.s32.totalorder %s183_s7, %s183_s7 }
  0x1d   :  { %p190_p0 = por %p189_p13, %p188_p12 }
  0x1f   :  { %p191_p1 = pnand %p190_p0, %p184_p11 }
  0x21   :  { %194 = shalt.err (!%p191_p1)
}
  0x22   :  { %s247_s1 = smov 64   ;;  %s248_s8 = smov 4  }
  0x23   :  { %22 = dma.hbm_to_vmem [thread:$0]  %s336_s0, 128, %s271_s15, [#allocation3], %s247_s1, %s247_s1, %s248_s8  }
  0x24   :  { %s249_s11 = smov [#allocation7]   ;;  %s195_s16 = scalar_lea.hbm %s338_s2, 16 }
  0x25   :  { %s39_s12 = sshll.u32 %s249_s11, 4  ;;  %p196_p2 = scmp.ne.s32.totalorder %s338_s2, %s195_s16  ;;  %s40_s12 = int_to_ptr.vmem [resolvable:$true] %s39_s12 }
  0x26   :  { %p199_p3 = scmp.lt.u32.totalorder %s195_s16, %s338_s2 }
  0x28   :  { %p201_p4 = pnand %p199_p3, %p196_p2 }
  0x2a   :  { %204 = shalt.err (!%p201_p4)
}
  0x2b   :  { %s205_s21 = scalar_lea.vmem %s40_s12, 16  ;;  %s209_s0 = scalar_lea.vmem %s40_s12, 32 }
  0x2c   :  { %p206_p5 = scmp.ne.s32.totalorder %s40_s12, %s205_s21  ;;  %p210_p6 = scmp.lt.s32.totalorder %s40_s12, %s40_s12 }
  0x2d   :  { %p211_p7 = scmp.lt.s32.totalorder %s209_s0, %s205_s21 }
  0x2f   :  { %p212_p8 = por %p211_p7, %p210_p6 }
  0x31   :  { %p213_p9 = pnand %p212_p8, %p206_p5 }
  0x33   :  { %216 = shalt.err (!%p213_p9)
}
  0x34   :  { %42 = dma.hbm_to_vmem [thread:$0]  %s338_s2, 16, %s40_s12, [#allocation6]  }
  0x35   :  { %239 = dma.done.wait [#allocation3], 128  }
  0x36   :  { %240 = vsyncadd [#allocation3], 4294967168 }
  0x37   :  { %241 = dma.done.wait [#allocation6], 32  }
  0x38   :  { %242 = vsyncadd [#allocation6], 4294967264  ;;  %v138_v0 = vld [vmem:[#allocation2] sm:$0xff]   ;;  %vm56_vm0 = vcmask 261120   ;;  %v131_v22 = vld [vmem:[#allocation5] ss:$0 sm:$0xff] }
  0x39   :  { %v139_v1 = vunpack.c.l.bf16 %v138_v0  ;;  %v140_v2 = vunpack.c.h.bf16 %v138_v0  ;;  %v132_v24 = vld [vmem:[#allocation7] ss:$0 sm:$0xff]  ;;  %vm110_vm1 = vcmask 257024   ;;  %s250_s2 = smov [#allocation8]  }
  0x3a   :  { %s118_s23 = sshll.u32 %s250_s2, 4  ;;  %s119_s23 = int_to_ptr.vmem [resolvable:$true] %s118_s23 }
  0x3b   :  { %v57_v3 = vsel %vm56_vm0, %v139_v1, 0.0  ;;  %v60_v4 = vsel %vm56_vm0, %v140_v2, 0.0  ;;  %s217_s24 = scalar_lea.vmem %s119_s23, 128  ;;  %p222_p11 = scmp.lt.s32.totalorder %s119_s23, %s119_s23 }
  0x3c   :  { %58 = vadd.xlane.f32.xlu0 %v57_v3  ;;  %p218_p10 = scmp.ne.s32.totalorder %s119_s23, %s217_s24  ;;  %p223_p12 = scmp.lt.s32.totalorder %s217_s24, %s217_s24 }
  0x3e   :  { %p224_p13 = por %p223_p12, %p222_p11 }
  0x40   :  { %61 = vadd.xlane.f32.xlu0 %v60_v4  ;;  %p225_p0 = pnand %p224_p13, %p218_p10 }
  0xc9   :  { %v59_v5 = vpop.xlane.xlu0 %58 }
  0xca   :  { %v64_v6 = vmul.f32 0.03125, %v59_v5 }
  0xcc   :  { %v66_v7 = vsub.f32 %v139_v1, %v64_v6 }
  0xcd   :  { %v62_v8 = vpop.xlane.xlu0 %61 }
  0xce   :  { %v65_v9 = vmul.f32 0.03125, %v62_v8  ;;  %v68_v10 = vmul.f32 %v66_v7, %v66_v7 }
  0xd0   :  { %v67_v11 = vsub.f32 %v140_v2, %v65_v9  ;;  %v70_v12 = vsel %vm56_vm0, %v68_v10, 0.0 }
  0xd1   :  { %71 = vadd.xlane.f32.xlu1 %v70_v12 }
  0xd2   :  { %v69_v13 = vmul.f32 %v67_v11, %v67_v11 }
  0xd4   :  { %v73_v14 = vsel %vm56_vm0, %v69_v13, 0.0 }
  0xd5   :  { %74 = vadd.xlane.f32.xlu1 %v73_v14 }
 0x15e   :  { %v72_v15 = vpop.xlane.xlu1 %71 }
 0x15f   :  { %v76_v16 = vmul.f32 0.03125, %v72_v15 }
 0x161   :  { %v78_v17 = vadd.f32 1e-12, %v76_v16 }
 0x162   :  { %v75_v18 = vpop.xlane.xlu1 %74 }
 0x163   :  { %147 = vrsqrt.f32 %v78_v17  ;;  %v77_v19 = vmul.f32 0.03125, %v75_v18 }
 0x165   :  { %v79_v20 = vadd.f32 1e-12, %v77_v19 }
 0x167   :  { %149 = vrsqrt.f32 %v79_v20 }
 0x16d   :  { %v148_v21 = vpop.eup %147 }
 0x16e   :  { %v82_v23 = vmul.f32 %v148_v21, %v66_v7 }
 0x170   :  { %v91_v25 = vmul.f32 %v131_v22, %v82_v23 }
 0x171   :  { %v150_v26 = vpop.eup %149 }
 0x172   :  { %v83_v27 = vmul.f32 %v150_v26, %v67_v11  ;;  %v100_v28 = vadd.f32 %v132_v24, %v91_v25 }
 0x174   :  { %v92_v29 = vmul.f32 %v131_v22, %v83_v27  ;;  %v135_v30 = vpack.c.bf16 %v100_v28, %v100_v28 }
 0x176   :  { %v101_v31 = vadd.f32 %v132_v24, %v92_v29  ;;  %111 = vst.msk [vmem:[#allocation8] sm:$0xf] %vm110_vm1, %v135_v30 }
 0x178   :  { %v136_v32 = vpack.c.bf16 %v101_v31, %v101_v31 }
 0x17a   :  { %112 = vst.msk [vmem:[#allocation8 + $0x4] sm:$0xf] %vm110_vm1, %v136_v32 }
 0x17b   :  { %228 = shalt.err (!%p225_p0)
}
 0x17c   :  { %s229_s27 = scalar_lea.hbm %s339_s3, 128 }
 0x17d   :  { %p230_p1 = scmp.ne.s32.totalorder %s339_s3, %s229_s27  ;;  %p233_p2 = scmp.lt.u32.totalorder %s229_s27, %s339_s3 }
 0x17f   :  { %p235_p3 = pnand %p233_p2, %p230_p1 }
 0x181   :  { %238 = shalt.err (!%p235_p3)
}
 0x182   :  { %124 = dma.vmem_to_hbm [thread:$0]  %s119_s23, 128, %s339_s3, [#allocation4], %s247_s1, %s247_s1, %s248_s8  }
 0x183   :  { %243 = dma.done.wait [#allocation4], 128  }
 0x184   :  { %244 = vsyncadd [#allocation4], 4294967168 }
 0x185   :  { %128 = vsyncpa [#allocation3], 1 }
 0x186   :  { %129 = vsyncpa [#allocation6], 1 }
 0x187   :  { %130 = vsyncpa [#allocation4], 1 }

// kernel: text_encoder_forward.13
= control target key start
LH: loop header
LB: loop body
LE: loop exit
PB: predicated region body
PF: predicated region fallthrough
CT: control target
= control target key end

     0   :  { %s1805_s0 = inlined_call_operand.hbm [shape: bf16[3,2,8,32], index: 0, kind: input, shape index: {}, may-alias: {0,1,2}]   ;;  %s1806_s1 = inlined_call_operand.hbm [shape: bf16[3,2,8,32], index: 1, kind: input, shape index: {}, may-alias: {0,1,2}]   ;;  %s1807_s2 = inlined_call_operand.hbm [shape: bf16[3,2,8,32], index: 2, kind: input, shape index: {}, may-alias: {0,1,2}]   ;;  %s1808_s3 = inlined_call_operand.hbm [shape: f32[2,1,8], index: 3, kind: input, shape index: {}]   ;;  %s1809_s4 = inlined_call_operand.hbm [shape: bf16[2,8,32], index: 4, kind: output, shape index: {}]  }
   0x1   :  { %1820 = sst [smem:[#allocation21_spill]] %s1805_s0 }
   0x2   :  { %1821 = sst [smem:[#allocation22_spill]] %s1806_s1 }
   0x3   :  { %9 = vsyncpa [#allocation3], 0 }
   0x4   :  { %11 = vsyncpa [#allocation3 + $0x1], 0 }
   0x5   :  { %12 = vsyncpa [#allocation6], 0 }
   0x6   :  { %14 = vsyncpa [#allocation6 + $0x1], 0 }
   0x7   :  { %15 = vsyncpa [#allocation9], 0 }
   0x8   :  { %17 = vsyncpa [#allocation9 + $0x1], 0 }
   0x9   :  { %18 = vsyncpa [#allocation4], 0 }
   0xa   :  { %20 = vsyncpa [#allocation4 + $0x1], 0  ;;  %s1449_s15 = smov 0   ;;  %s1451_s16 = smov 0  }
   0xb   :  { %s1453_s17 = smov 0   ;;  %s1455_s18 = smov 0  }
   0xc   :  { %s1457_s19 = smov 0   ;;  %s1459_s20 = smov 0  }
   0xd LB: > { %1822 = sst [smem:[#allocation15_spill]] %s1389_s15  ;;  %s1480_s21 = sadd.s32 4294967295, %s1409_s20   ;;  %s1409_s20 = sphi %s1459_s20, %s26_s20   ;;  %s1405_s19 = sphi %s1457_s19, %s1855_s19   ;;  %s1401_s18 = sphi %s1455_s18, %s1854_s18   ;;  %s1397_s17 = sphi %s1453_s17, %s1850_s17   ;;  %s1393_s16 = sphi %s1451_s16, %s1853_s16   ;;  %s1389_s15 = sphi %s1449_s15, %s1852_s15  }
   0xe   : > { %1823 = sst [smem:[#allocation16_spill]] %s1397_s17  ;;  %s992_s22 = sadd.s32 4294967294, %s1409_s20  }
   0xf   : > { %1824 = sst [smem:[#allocation17_spill]] %s1409_s20  ;;  %s38_s23 = sadd.s32 1, %s1405_s19 }
  0x10   : > { %s47_s24 = sadd.s32 1, %s1397_s17  ;;  %p40_p0 = scmp.ge.s32.totalorder %s38_s23, 2 }
  0x11   : > { %p54_p1 = scmp.ne.s32.totalorder %s1397_s17, %s1393_s16  ;;  %p55_p2 = scmp.eq.s32.totalorder %s1409_s20, 0 }
  0x12   : > { %p60_p3 = scmp.ne.s32.totalorder %s1393_s16, %s1389_s15  ;;  %s1857_s23 = smov (%p40_p0, %s38_s23), 0 }
  0x13   : > { %1825 = sst [smem:[#allocation18_spill]] %s1857_s23  ;;  %p1492_p4 = por %p55_p2, %p54_p1 }
  0x14   : > { %p61_p5 = scmp.eq.s32.totalorder %s1480_s21, 0  ;;  %s42_s26 = ssub.s32 %s1405_s19, %s1857_s23 }
  0x15   : > { %p168_p6 = scmp.eq.s32.totalorder %s1480_s21, 1  ;;  %p45_p7 = scmp.eq.s32.totalorder %s42_s26, 0 }
  0x16   : > { %p1500_p8 = por %p61_p5, %p60_p3  ;;  %p174_p10 = scmp.eq.s32.totalorder %s992_s22, 1 }
  0x17   : > { %p1504_p9 = por %p168_p6, %p54_p1  ;;  %p1120_p13 = scmp.lt.s32.totalorder %s1409_s20, 2 }
  0x18   : > { %s1827_s27 = scalar_select %p1500_p8, 1, 0 }
  0x19   : > { %s1828_s28 = scalar_select %p1504_p9, 1, 0 }
  0x1a   : > { %s1509_s29 = scalar_select %p45_p7, %s1397_s17, %s47_s24  }
  0x1b   : > { %p1511_p11 = por %p174_p10, %p60_p3  ;;  %s1518_s5 = sand.u32 1, %s1397_s17  }
  0x1c   : > { %1829 = sst [smem:[#allocation19_spill]] %s1509_s29  ;;  %s1521_s6 = sshll.u32 %s1518_s5, 2 }
  0x1d   : > { %s1830_s30 = scalar_select %p1511_p11, 1, 0 }
  0x1e   : > { %s1524_s7 = sshll.u32 %s1405_s19, 6  ;;  %p1528_p0 = pnand %p1120_p13, %p1492_p4 }
  0x1f   : > { %1831 = sst [smem:[#allocation20_spill]] %s1830_s30  ;;  %s213_s9 = sand.u32 1, %s1409_s20  }
  0x20   : > { %s1832_s8 = scalar_select %p1528_p0, 1, 0 }
  0x21   : > { %s1833_s1 = sld [smem:[#allocation22_spill]]  ;;  %s217_s14 = scalar_lea.vmem [#allocation5], %s1521_s6 }
  0x22   : > { %s226_s22 = sshll.u32 %s217_s14, 4  ;;  %s1543_s24 = scalar_lea.sflag [#allocation6], %s213_s9  ;;  %s1540_s22 = int_to_ptr.vmem [resolvable:$true] %s226_s22 }
  0x23   : > { %p1548_p3 = pneg %p1528_p0 }
  0x27   : > { %s885_s12 = scalar_lea.hbm %s1833_s1, %s1524_s7  ;;  %s1202_s14 = scalar_lea.hbm %s1833_s1, 384 }
  0x28   : > { %s1537_s13 = scalar_lea.hbm %s885_s12, 128  ;;  %s1227_s25 = scalar_lea.hbm %s885_s12, 192 }
  0x29   : > { %p1198_p2 = scmp.ne.s32.totalorder %s1537_s13, %s1227_s25  ;;  %p1203_p6 = scmp.lt.u32.totalorder %s1537_s13, %s1833_s1 }
  0x2a   : > { %p1204_p7 = scmp.lt.u32.totalorder %s1202_s14, %s1227_s25  ;;  %p1206_p13 = scmp.lt.u32.totalorder %s1227_s25, %s1537_s13 }
  0x2b   : > { %p1200_p4 = pnand %p1548_p3, %p1198_p2 }
  0x2c   : > { %p1205_p10 = por %p1204_p7, %p1203_p6 }
  0x2d   : > { %p1201_p5 = pneg %p1200_p4 }
  0x2e   : > { %p1207_p12 = por %p1206_p13, %p1205_p10 }
  0x30   : > { %p1208_p1 = pnand %p1207_p12, %p1201_p5 }
  0x32   : > { %1211 = shalt.err (!%p1208_p1)
}
  0x33   : > { %s1212_s9 = scalar_lea.vmem %s1540_s22, 64  ;;  %s1411_s12 = smov [#allocation5]  }
  0x34   : > { %p1213_p2 = scmp.ne.s32.totalorder %s1540_s22, %s1212_s9  ;;  %s1217_s10 = sshll.u32 %s1411_s12, 4  ;;  %s1218_s10 = int_to_ptr.vmem [resolvable:$false] %s1217_s10 }
  0x35   : > { %s1219_s23 = scalar_lea.vmem %s1218_s10, 128  ;;  %p1220_p9 = scmp.lt.s32.totalorder %s1540_s22, %s1218_s10 }
  0x36   : > { %p1215_p4 = pnand %p1213_p2, %p1548_p3  ;;  %p1221_p8 = scmp.lt.s32.totalorder %s1219_s23, %s1212_s9 }
  0x38   : > { %p1216_p11 = pneg %p1215_p4  ;;  %p1222_p6 = por %p1221_p8, %p1220_p9 }
  0x3a   : > { %p1223_p7 = pnand %p1222_p6, %p1216_p11 }
  0x3c   : > { %1226 = shalt.err (!%p1223_p7)
}
  0x3d   : > { %1109 = dma.hbm_to_vmem [thread:$0]  (!%p1528_p0), %s1537_s13, 64, %s1540_s22, %s1543_s24  }
  0x3e   : > { %p268_p12 = scmp.lt.s32.totalorder %s1409_s20, 3  ;;  %p1835_p1 = scmp.ge.s32.totalorder %s1409_s20, 1 }
  0x3f   : > { %s1837_s0 = sld [smem:[#allocation21_spill]]  ;;  %s198_s9 = scalar_lea.vmem [#allocation2], %s1521_s6 }
  0x40   : > { %p1575_p5 = pnand %p1835_p1, %p268_p12  ;;  %s206_s12 = sshll.u32 %s198_s9, 4  ;;  %s207_s12 = int_to_ptr.vmem [resolvable:$true] %s206_s12 }
  0x41   : > { %s195_s10 = scalar_lea.sflag [#allocation3], %s1518_s5 }
  0x42   : > { %s1836_s29 = scalar_select %p1575_p5, 1, 0 }
  0x45   : > { %s1583_s14 = scalar_lea.hbm %s1837_s0, %s1524_s7  ;;  %s1233_s1 = scalar_lea.hbm %s1837_s0, 384 }
  0x46   : > { %s1228_s13 = scalar_lea.hbm %s1583_s14, 64  ;;  %p1234_p10 = scmp.lt.u32.totalorder %s1583_s14, %s1837_s0 }
  0x47   : > { %p1229_p8 = scmp.ne.s32.totalorder %s1583_s14, %s1228_s13  ;;  %p1235_p13 = scmp.lt.u32.totalorder %s1233_s1, %s1228_s13 }
  0x48   : > { %p1237_p4 = scmp.lt.u32.totalorder %s1228_s13, %s1583_s14 }
  0x49   : > { %p1231_p9 = pnand %p1229_p8, %p1548_p3  ;;  %p1236_p2 = por %p1235_p13, %p1234_p10 }
  0x4b   : > { %p1232_p11 = pneg %p1231_p9  ;;  %p1238_p6 = por %p1237_p4, %p1236_p2 }
  0x4d   : > { %p1239_p7 = pnand %p1238_p6, %p1232_p11 }
  0x4f   : > { %1242 = shalt.err (!%p1239_p7)
}
  0x50   : > { %s1243_s9 = scalar_lea.vmem %s207_s12, 64  ;;  %s1412_s17 = smov [#allocation2]  }
  0x51   : > { %p1244_p12 = scmp.ne.s32.totalorder %s207_s12, %s1243_s9  ;;  %s1248_s20 = sshll.u32 %s1412_s17, 4  ;;  %s1249_s20 = int_to_ptr.vmem [resolvable:$false] %s1248_s20 }
  0x52   : > { %s1250_s22 = scalar_lea.vmem %s1249_s20, 128  ;;  %p1251_p9 = scmp.lt.s32.totalorder %s207_s12, %s1249_s20 }
  0x53   : > { %p1246_p1 = pnand %p1244_p12, %p1548_p3  ;;  %p1252_p5 = scmp.lt.s32.totalorder %s1250_s22, %s1243_s9 }
  0x55   : > { %p1247_p8 = pneg %p1246_p1  ;;  %p1253_p0 = por %p1252_p5, %p1251_p9 }
  0x57   : > { %p1254_p10 = pnand %p1253_p0, %p1247_p8 }
  0x59   : > { %1257 = shalt.err (!%p1254_p10)
}
  0x5a   : > { %p1838_p13 = scmp.ne.s32.totalorder %s1832_s8, 0  ;;  %s892_s23 = scalar_lea.hbm %s1807_s2, %s1524_s7 }
  0x5b   : > { %s237_s25 = scalar_lea.vmem [#allocation7], %s1521_s6  ;;  %s893_s11 = scalar_lea.hbm %s892_s23, 256 }
  0x5c   : > { %1106 = dma.hbm_to_vmem [thread:$0]  (!%p1838_p13), %s1583_s14, 64, %s207_s12, %s195_s10  }
  0x5d   : > { %s246_s17 = sshll.u32 %s237_s25, 4  ;;  %s1288_s20 = scalar_lea.hbm %s892_s23, 320  ;;  %s247_s17 = int_to_ptr.vmem [resolvable:$true] %s246_s17 }
  0x5e   : > { %p1259_p11 = scmp.ne.s32.totalorder %s893_s11, %s1288_s20  ;;  %s1263_s0 = scalar_lea.hbm %s1807_s2, 384 }
  0x5f   : > { %p1264_p2 = scmp.lt.u32.totalorder %s893_s11, %s1807_s2  ;;  %p1265_p4 = scmp.lt.u32.totalorder %s1263_s0, %s1288_s20 }
  0x60   : > { %p1261_p0 = pnand %p1259_p11, %p1548_p3  ;;  %p1267_p7 = scmp.lt.u32.totalorder %s1288_s20, %s893_s11 }
  0x61   : > { %p1266_p6 = por %p1265_p4, %p1264_p2 }
  0x62   : > { %p1262_p5 = pneg %p1261_p0 }
  0x63   : > { %p1268_p12 = por %p1267_p7, %p1266_p6 }
  0x65   : > { %p1269_p1 = pnand %p1268_p12, %p1262_p5 }
  0x67   : > { %1272 = shalt.err (!%p1269_p1)
}
  0x68   : > { %s1273_s6 = scalar_lea.vmem %s247_s17, 64  ;;  %s1413_s7 = smov [#allocation7]  }
  0x69   : > { %p1274_p8 = scmp.ne.s32.totalorder %s247_s17, %s1273_s6  ;;  %s1278_s14 = sshll.u32 %s1413_s7, 4  ;;  %s1279_s14 = int_to_ptr.vmem [resolvable:$false] %s1278_s14 }
  0x6a   : > { %s1280_s12 = scalar_lea.vmem %s1279_s14, 128  ;;  %p1281_p11 = scmp.lt.s32.totalorder %s247_s17, %s1279_s14 }
  0x6b   : > { %p1276_p9 = pnand %p1274_p8, %p1548_p3  ;;  %p1282_p0 = scmp.lt.s32.totalorder %s1280_s12, %s1273_s6 }
  0x6d   : > { %p1277_p10 = pneg %p1276_p9  ;;  %p1283_p13 = por %p1282_p0, %p1281_p11 }
  0x6f   : > { %p1284_p2 = pnand %p1283_p13, %p1277_p10 }
  0x71   : > { %1287 = shalt.err (!%p1284_p2)
}
  0x72   : > { %p1839_p4 = scmp.ne.s32.totalorder %s1832_s8, 0  ;;  %s1001_s0 = sshll.u32 %s1405_s19, 4 }
  0x73   : > { %s256_s15 = scalar_lea.vmem [#allocation8], %s1518_s5  ;;  %s1627_s13 = scalar_lea.hbm %s1808_s3, %s1001_s0 }
  0x74   : > { %1112 = dma.hbm_to_vmem [thread:$0]  (!%p1839_p4), %s893_s11, 64, %s247_s17, %s1543_s24  }
  0x75   : > { %s263_s30 = sshll.u32 %s256_s15, 4  ;;  %s254_s23 = scalar_lea.sflag [#allocation9], %s1518_s5  ;;  %s264_s30 = int_to_ptr.vmem [resolvable:$true] %s263_s30 }
  0x76   : > { %s1289_s25 = scalar_lea.hbm %s1627_s13, 16  ;;  %s1294_s11 = scalar_lea.hbm %s1808_s3, 32 }
  0x77   : > { %p1290_p13 = scmp.ne.s32.totalorder %s1627_s13, %s1289_s25  ;;  %p1295_p7 = scmp.lt.u32.totalorder %s1627_s13, %s1808_s3 }
  0x78   : > { %p1296_p12 = scmp.lt.u32.totalorder %s1294_s11, %s1289_s25  ;;  %p1298_p8 = scmp.lt.u32.totalorder %s1289_s25, %s1627_s13 }
  0x79   : > { %p1292_p5 = pnand %p1290_p13, %p1548_p3 }
  0x7a   : > { %p1297_p1 = por %p1296_p12, %p1295_p7 }
  0x7b   : > { %p1293_p6 = pneg %p1292_p5 }
  0x7c   : > { %p1299_p9 = por %p1298_p8, %p1297_p1 }
  0x7e   : > { %p1300_p10 = pnand %p1299_p9, %p1293_p6 }
  0x80   : > { %1303 = shalt.err (!%p1300_p10)
}
  0x81   : > { %s1304_s5 = scalar_lea.vmem %s264_s30, 16  ;;  %s1414_s22 = smov [#allocation8]  }
  0x82   : > { %p1305_p11 = scmp.ne.s32.totalorder %s264_s30, %s1304_s5  ;;  %s1309_s6 = sshll.u32 %s1414_s22, 4  ;;  %s1310_s6 = int_to_ptr.vmem [resolvable:$false] %s1309_s6 }
  0x83   : > { %s1311_s7 = scalar_lea.vmem %s1310_s6, 32  ;;  %p1312_p13 = scmp.lt.s32.totalorder %s264_s30, %s1310_s6 }
  0x84   : > { %p1307_p0 = pnand %p1305_p11, %p1548_p3  ;;  %p1313_p5 = scmp.lt.s32.totalorder %s1311_s7, %s1304_s5 }
  0x86   : > { %p1308_p2 = pneg %p1307_p0  ;;  %p1314_p4 = por %p1313_p5, %p1312_p13 }
  0x88   : > { %p1315_p7 = pnand %p1314_p4, %p1308_p2 }
  0x8a   : > { %1318 = shalt.err (!%p1315_p7)
}
  0x8b   : > { %p1840_p12 = scmp.ne.s32.totalorder %s1832_s8, 0  ;;  %p1841_p6 = scmp.ne.s32.totalorder %s1836_s29, 0 }
  0x8c   : > { %s1650_s26 = sand.u32 (!%p1841_p6), 1, %s1393_s16   ;;  %p1842_p3 = scmp.ne.s32.totalorder (!%p1841_p6), %s1827_s27, 0 }
  0x8d   : > { %1115 = dma.hbm_to_vmem [thread:$0]  (!%p1840_p12), %s1627_s13, 16, %s264_s30, %s254_s23  }
  0x8e   : > { %272 = sbr.rel (%p1841_p6) target bundleno = 1630 (0x65e), region = 36  ;;  %s1653_s14 = sshll.u32 (!%p1841_p6), %s1650_s26, 2 }
  0x8f   : > { %s275_s12 = scalar_lea.sflag (!%p1841_p6), [#allocation3], %s1650_s26  ;;  %s278_s0 = scalar_lea.vmem (!%p1841_p6), [#allocation2], %s1653_s14 }
  0x95   : > { %1372 = dma.done.wait (%p1842_p3), %s275_s12, 64  }
  0x96   : > { %1374 = vsyncadd (%p1842_p3), %s275_s12, 4294967232  ;;  %s283_s8 = sand.u32 1, %s1480_s21   ;;  %s287_s15 = scalar_lea.vmem [#allocation5], %s1653_s14 }
  0x97   : > { %s284_s29 = scalar_lea.sflag [#allocation6], %s283_s8 }
  0x98   : > { %1376 = dma.done.wait (%p1842_p3), %s284_s29, 128  }
  0x99   : > { %1378 = vsyncadd (%p1842_p3), %s284_s29, 4294967168  ;;  %s296_s30 = scalar_lea.vmem [#allocation7], %s1653_s14  ;;  %s302_s10 = scalar_lea.sflag [#allocation9], %s1650_s26 }
  0x9a   : > { %s304_s1 = scalar_lea.vmem [#allocation8], %s1650_s26 }
  0x9b   : > { %1380 = dma.done.wait (%p1842_p3), %s302_s10, 16  }
  0x9c   : > { %1382 = vsyncadd (%p1842_p3), %s302_s10, 4294967280  ;;  %v1415_v0 = vmov 0.0   ;;  %vm1416_vm0 = vmmov 0   ;;  %vm354_vm1 = vcmask 64512   ;;  %v346_v1 = vld [vmem:[%s287_s15] sm:$0xf] }
  0x9d   : > { %1045 = vmatprep.subr.bf16.mxu0 %v1415_v0  ;;  %1047 = vmatprep.mubr.msk.bf16.mxu0 %vm1416_vm0, %v1415_v0  ;;  %v359_v2 = vsel %vm354_vm1, %v346_v1, 0  ;;  %v345_v3 = vld [vmem:[%s278_s0] sm:$0xf]  ;;  %v1011_v11 = vcombine.low %v346_v1, %v346_v1  ;;  %s1417_s21 = smov 120   ;;  %s1418_s27 = smov 112   ;;  %vm416_vm2 = vcmask 1043456  }
  0x9e   : > { %1051 = vmatprep.subr.bf16.mxu1 %v1415_v0  ;;  %1053 = vmatprep.mubr.msk.bf16.mxu1 %vm1416_vm0, %v1415_v0  ;;  %v1685_v4 = vld [vmem:[%s304_s1] ss:$0 sm:$0xff]  ;;  %v1010_v12 = vcombine.low %v345_v3, %v345_v3  ;;  %s1419_s13 = smov 104   ;;  %v1697_v18 = vld [vmem:[%s296_s30] sm:$0xf]  ;;  %vm461_vm3 = vcmask 60416  }
  0x9f   : > { %1046 = vmatpush3.bf16.xpose.msra.mxu0 %v359_v2  ;;  %471 = vrot.lane.b32.xlu1 %v1011_v11, %s1417_s21  ;;  %v418_v19 = vsel %vm416_vm2, %v1697_v18, 0  ;;  %s1719_s23 = scalar_lea.vmem [#allocation10], %s1653_s14  ;;  %s1420_s25 = smov 8   ;;  %vm589_vm4 = vcmask 126016   ;;  %vm708_vm5 = vcmask 191616   ;;  %vm827_vm6 = vcmask 257216  }
  0xa0   : > { %1063 = vmatprep.subr.bf16.mxu0 %v1415_v0  ;;  %1052 = vmatpush3.bf16.msra.mxu1 %v418_v19  ;;  %s1421_s24 = smov 16   ;;  %s1422_s17 = smov 24  }
  0xa1   : > { %1057 = vmatprep.subr.bf16.mxu1 %v1415_v0  ;;  %s1023_s11 = sshll.u32 %s1401_s18, 6  ;;  %s844_s20 = sshll.u32 %s1719_s23, 4  ;;  %s1757_s20 = int_to_ptr.vmem [resolvable:$true] %s844_s20 }
  0xa2   : > { %s1755_s22 = scalar_lea.hbm %s1809_s4, %s1023_s11  ;;  %s830_s6 = scalar_lea.sflag [#allocation4], %s1650_s26 }
  0xa3   : > { %466 = vrot.lane.b32.xlu1 %v1010_v12, %s1417_s21  ;;  %s1319_s7 = scalar_lea.vmem %s1757_s20, 64  ;;  %p1843_p1 = scmp.ne.s32.totalorder %s1828_s28, 0 }
  0xa4   : > { %p1320_p4 = scmp.ne.s32.totalorder %s1757_s20, %s1319_s7  ;;  %s1423_s18 = smov [#allocation10]  }
  0xa5   : > { %s1323_s14 = sshll.u32 %s1423_s18, 4  ;;  %s1324_s14 = int_to_ptr.vmem [resolvable:$false] %s1323_s14 }
  0xa6   : > { %1048 = vmatmul.mubr.msk.bf16.vlgmr.msra.gmra.mrb[0].mxu0 %vm354_vm1, %v345_v3  ;;  %v1013_v3 = vcombine.low %v1697_v18, %v1697_v18  ;;  %p1321_p8 = pnand %p1320_p4, %p1843_p1  ;;  %s1325_s12 = scalar_lea.vmem %s1324_s14, 128 }
  0xa7   : > { %1065 = vmatprep.mubr.msk.bf16.mxu0 %vm1416_vm0, %v1415_v0  ;;  %591 = vrot.lane.b32.xlu1 %v1010_v12, %s1418_s27  ;;  %p1326_p10 = scmp.lt.s32.totalorder %s1757_s20, %s1324_s14  ;;  %p1327_p11 = scmp.lt.s32.totalorder %s1325_s12, %s1319_s7 }
  0xa8   : > { %p1322_p9 = pneg %p1321_p8 }
  0xa9   : > { %p1328_p0 = por %p1327_p11, %p1326_p10 }
  0xab   : > { %712 = vrot.lane.b32.xlu1 %v1011_v11, %s1419_s13  ;;  %p1329_p2 = pnand %p1328_p0, %p1322_p9 }
  0xaf   : > { %710 = vrot.lane.b32.xlu1 %v1010_v12, %s1419_s13 }
 0x111   : > { %v472_v22 = vpop.permute.xlu1 %471 }
 0x112   : > { %v477_v24 = vsel %vm354_vm1, %v472_v22, 0 }
 0x115   : > { %v467_v26 = vpop.permute.xlu1 %466 }
 0x119   : > { %v592_v28 = vpop.permute.xlu1 %591 }
 0x11d   : > { %v713_v30 = vpop.permute.xlu1 %712 }
 0x11e   : > { %v718_v31 = vsel %vm354_vm1, %v713_v30, 0 }
 0x121   : > { %v711_v32 = vpop.permute.xlu1 %710 }
 0x179   : > { %v395_v5 = vpop.f32.mrb[0].mxu0 }
 0x17a   : > { %v396_v6 = vadd.f32 %v1685_v4, %v395_v5  ;;  %v1049_v7 = vpop.f32.mrb[1].mxu0 }
 0x17b   : > { %v398_v8 = vpop.f32.mrb[2].mxu0 }
 0x17c   : > { %v1050_v9 = vpop.f32.mrb[3].mxu0  ;;  %v401_v10 = vsel %vm354_vm1, %v396_v6, -inf }
 0x17d   : > { %402 = vmax.xlane.f32.xlu0 %v401_v10 }
 0x20a   : > { %v403_v13 = vpop.xlane.xlu0 %402 }
 0x20b   : > { %v404_v14 = vsub.f32 %v396_v6, %v403_v13 }
 0x20d   : > { %v405_v15 = vmul.f32 1.442695, %v404_v14 }
 0x20f   : > { %1181 = vpow2.f32 %v405_v15 }
 0x219   : > { %v1182_v16 = vpop.eup %1181 }
 0x21a   : > { %v407_v17 = vsel %vm354_vm1, %v1182_v16, 0.0 }
 0x21b   : > { %408 = vadd.xlane.f32.xlu0 %v407_v17 }
 0x231   : > { %593 = vrot.lane.b32.xlu0 %v1011_v11, %s1418_s27 }
 0x2a8   : > { %v409_v20 = vpop.xlane.xlu0 %408 }
 0x2a9   : > { %1183 = vrcp.f32 %v409_v20 }
 0x2ac   : > { %v594_v27 = vpop.permute.xlu0 %593 }
 0x2ad   : > { %v599_v29 = vsel %vm354_vm1, %v594_v27, 0 }
 0x2b3   : > { %v1184_v21 = vpop.eup %1183 }
 0x2b4   : > { %v411_v23 = vmul.f32 %v1184_v21, %v1182_v16 }
 0x2b6   : > { %v412_v25 = vpack.c.bf16 %v411_v23, %v411_v23 }
 0x2b8   : > { %1054 = vmatmul.mubr.msk.bf16.vlgmr.msra.gmra.mrb[0].mxu1 %vm354_vm1, %v412_v25 }
 0x2b9   : > { %1058 = vmatpush3.bf16.xpose.msra.mxu1 %v477_v24  ;;  %1059 = vmatprep.mubr.msk.bf16.mxu1 %vm1416_vm0, %v1415_v0 }
 0x2ba   : > { %1069 = vmatprep.subr.bf16.mxu1 %v1415_v0 }
 0x2c0   : > { %1060 = vmatmul.mubr.msk.bf16.vlgmr.msra.gmra.mrb[4].mxu1 %vm354_vm1, %v467_v26 }
 0x2c1   : > { %1070 = vmatpush3.bf16.xpose.msra.mxu1 %v599_v29  ;;  %1071 = vmatprep.mubr.msk.bf16.mxu1 %vm1416_vm0, %v1415_v0 }
 0x2c2   : > { %1081 = vmatprep.subr.bf16.mxu1 %v1415_v0 }
 0x2c8   : > { %1072 = vmatmul.mubr.msk.bf16.vlgmr.msra.gmra.mrb[8].mxu1 %vm354_vm1, %v592_v28 }
 0x2c9   : > { %1082 = vmatpush3.bf16.xpose.msra.mxu1 %v718_v31  ;;  %1083 = vmatprep.mubr.msk.bf16.mxu1 %vm1416_vm0, %v1415_v0 }
 0x2d0   : > { %1084 = vmatmul.mubr.msk.bf16.vlgmr.msra.gmra.mrb[12].mxu1 %vm354_vm1, %v711_v32 }
 0x38b   : > { %v454_v33 = vpop.f32.mrb[0].mxu1 }
 0x38c   : > { %v460_v34 = vpack.c.bf16 %v454_v33, %v454_v33  ;;  %v1055_v35 = vpop.f32.mrb[1].mxu1 }
 0x38d   : > { %v457_v36 = vpop.f32.mrb[2].mxu1 }
 0x38e   : > { %462 = vst.msk [vmem:[%s1719_s23] sm:$0xf] %vm461_vm3, %v460_v34  ;;  %v1056_v37 = vpop.f32.mrb[3].mxu1 }
 0x393   : > { %v513_v38 = vpop.f32.mrb[4].mxu1 }
 0x394   : > { %v514_v39 = vadd.f32 %v1685_v4, %v513_v38  ;;  %v1061_v40 = vpop.f32.mrb[5].mxu1 }
 0x395   : > { %v516_v41 = vpop.f32.mrb[6].mxu1 }
 0x396   : > { %v1062_v42 = vpop.f32.mrb[7].mxu1  ;;  %v519_v43 = vsel %vm354_vm1, %v514_v39, -inf }
 0x397   : > { %520 = vmax.xlane.f32.xlu1 %v519_v43 }
 0x39b   : > { %v635_v44 = vpop.f32.mrb[8].mxu1 }
 0x39c   : > { %v636_v45 = vadd.f32 %v1685_v4, %v635_v44  ;;  %v1073_v46 = vpop.f32.mrb[9].mxu1 }
 0x39d   : > { %v638_v47 = vpop.f32.mrb[10].mxu1 }
 0x39e   : > { %v641_v48 = vsel %vm354_vm1, %v636_v45, -inf  ;;  %v1074_v49 = vpop.f32.mrb[11].mxu1 }
 0x39f   : > { %642 = vmax.xlane.f32.xlu0 %v641_v48 }
 0x3a3   : > { %v754_v50 = vpop.f32.mrb[12].mxu1 }
 0x3a4   : > { %v755_v51 = vadd.f32 %v1685_v4, %v754_v50  ;;  %v1085_v52 = vpop.f32.mrb[13].mxu1 }
 0x3a5   : > { %v757_v53 = vpop.f32.mrb[14].mxu1 }
 0x3a6   : > { %v760_v54 = vsel %vm354_vm1, %v755_v51, -inf  ;;  %v1086_v55 = vpop.f32.mrb[15].mxu1 }
 0x3a7   : > { %761 = vmax.xlane.f32.xlu1 %v760_v54 }
 0x424   : > { %v521_v56 = vpop.xlane.xlu1 %520 }
 0x425   : > { %v522_v57 = vsub.f32 %v514_v39, %v521_v56 }
 0x427   : > { %v523_v58 = vmul.f32 1.442695, %v522_v57 }
 0x429   : > { %1185 = vpow2.f32 %v523_v58 }
 0x42c   : > { %v643_v59 = vpop.xlane.xlu0 %642 }
 0x42d   : > { %v644_v60 = vsub.f32 %v636_v45, %v643_v59 }
 0x42f   : > { %v645_v61 = vmul.f32 1.442695, %v644_v60 }
 0x431   : > { %1187 = vpow2.f32 %v645_v61 }
 0x433   : > { %v1186_v62 = vpop.eup %1185 }
 0x434   : > { %v525_v63 = vsel %vm354_vm1, %v1186_v62, 0.0  ;;  %v762_v4 = vpop.xlane.xlu1 %761 }
 0x435   : > { %526 = vadd.xlane.f32.xlu1 %v525_v63  ;;  %v763_v5 = vsub.f32 %v755_v51, %v762_v4 }
 0x437   : > { %v764_v6 = vmul.f32 1.442695, %v763_v5 }
 0x439   : > { %1189 = vpow2.f32 %v764_v6 }
 0x43b   : > { %v1188_v1 = vpop.eup %1187 }
 0x43c   : > { %v647_v2 = vsel %vm354_vm1, %v1188_v1, 0.0 }
 0x43d   : > { %648 = vadd.xlane.f32.xlu0 %v647_v2 }
 0x443   : > { %v1190_v7 = vpop.eup %1189 }
 0x444   : > { %v766_v8 = vsel %vm354_vm1, %v1190_v7, 0.0 }
 0x446   : > { %653 = vrot.lane.b32.xlu1 %v1013_v3, %s1418_s27 }
 0x453   : > { %534 = vrot.lane.b32.xlu0 %v1013_v3, %s1417_s21 }
 0x46a   : > { %767 = vadd.xlane.f32.xlu1 %v766_v8 }
 0x47b   : > { %772 = vrot.lane.b32.xlu1 %v1013_v3, %s1419_s13 }
 0x4c2   : > { %v527_v9 = vpop.xlane.xlu1 %526 }
 0x4c3   : > { %1191 = vrcp.f32 %v527_v9 }
 0x4c6   : > { %v654_v15 = vpop.permute.xlu1 %653 }
 0x4c7   : > { %v659_v17 = vsel %vm416_vm2, %v654_v15, 0 }
 0x4ca   : > { %v649_v10 = vpop.xlane.xlu0 %648 }
 0x4cb   : > { %1193 = vrcp.f32 %v649_v10 }
 0x4cd   : > { %v1192_v11 = vpop.eup %1191 }
 0x4ce   : > { %v529_v12 = vmul.f32 %v1192_v11, %v1186_v62  ;;  %v535_v13 = vpop.permute.xlu0 %534 }
 0x4cf   : > { %v540_v14 = vsel %vm416_vm2, %v535_v13, 0 }
 0x4d0   : > { %1064 = vmatpush3.bf16.msra.mxu0 %v540_v14  ;;  %v530_v16 = vpack.c.bf16 %v529_v12, %v529_v12 }
 0x4d1   : > { %1075 = vmatprep.subr.bf16.mxu0 %v1415_v0 }
 0x4d3   : > { %1066 = vmatmul.mubr.msk.bf16.vlgmr.msra.gmra.mrb[4].mxu0 %vm354_vm1, %v530_v16 }
 0x4d4   : > { %1076 = vmatpush3.bf16.msra.mxu0 %v659_v17  ;;  %1077 = vmatprep.mubr.msk.bf16.mxu0 %vm1416_vm0, %v1415_v0 }
 0x4d5   : > { %v1194_v18 = vpop.eup %1193  ;;  %1087 = vmatprep.subr.bf16.mxu0 %v1415_v0 }
 0x4d6   : > { %v651_v19 = vmul.f32 %v1194_v18, %v1188_v1 }
 0x4d8   : > { %v652_v20 = vpack.c.bf16 %v651_v19, %v651_v19 }
 0x4db   : > { %1078 = vmatmul.mubr.msk.bf16.vlgmr.msra.gmra.mrb[8].mxu0 %vm354_vm1, %v652_v20 }
 0x4dc   : > { %1089 = vmatprep.mubr.msk.bf16.mxu0 %vm1416_vm0, %v1415_v0 }
 0x4f7   : > { %v768_v21 = vpop.xlane.xlu1 %767 }
 0x4f8   : > { %1195 = vrcp.f32 %v768_v21 }
 0x4fb   : > { %v773_v22 = vpop.permute.xlu1 %772 }
 0x4fc   : > { %v778_v23 = vsel %vm416_vm2, %v773_v22, 0 }
 0x4fd   : > { %1088 = vmatpush3.bf16.msra.mxu0 %v778_v23 }
 0x502   : > { %v1196_v24 = vpop.eup %1195 }
 0x503   : > { %v770_v25 = vmul.f32 %v1196_v24, %v1190_v7 }
 0x505   : > { %v771_v26 = vpack.c.bf16 %v770_v25, %v770_v25 }
 0x507   : > { %1090 = vmatmul.mubr.msk.bf16.vlgmr.msra.gmra.mrb[12].mxu0 %vm354_vm1, %v771_v26 }
 0x5a6   : > { %v576_v27 = vpop.f32.mrb[4].mxu0 }
 0x5a7   : > { %v1026_v28 = vpack.c.bf16 %v576_v27, %v576_v27  ;;  %v1067_v29 = vpop.f32.mrb[5].mxu0 }
 0x5a8   : > { %v579_v30 = vpop.f32.mrb[6].mxu0 }
 0x5a9   : > { %586 = vrot.lane.b32.xlu0 %v1026_v28, %s1420_s25  ;;  %v1068_v31 = vpop.f32.mrb[7].mxu0 }
 0x5ae   : > { %v695_v32 = vpop.f32.mrb[8].mxu0 }
 0x5af   : > { %v1027_v0 = vpack.c.bf16 %v695_v32, %v695_v32  ;;  %v1079_v33 = vpop.f32.mrb[9].mxu0 }
 0x5b0   : > { %v698_v34 = vpop.f32.mrb[10].mxu0 }
 0x5b1   : > { %705 = vrot.lane.b32.xlu1 %v1027_v0, %s1421_s24  ;;  %v1080_v35 = vpop.f32.mrb[11].mxu0 }
 0x5da   : > { %v814_v36 = vpop.f32.mrb[12].mxu0 }
 0x5db   : > { %v1028_v37 = vpack.c.bf16 %v814_v36, %v814_v36  ;;  %v1091_v38 = vpop.f32.mrb[13].mxu0 }
 0x5dc   : > { %v817_v39 = vpop.f32.mrb[14].mxu0 }
 0x5dd   : > { %824 = vrot.lane.b32.xlu0 %v1028_v37, %s1422_s17  ;;  %v1092_v40 = vpop.f32.mrb[15].mxu0 }
 0x61b   : > { %v587_v41 = vpop.permute.xlu0 %586 }
 0x61c   : > { %590 = vst.msk [vmem:[%s1719_s23] sm:$0xf] %vm589_vm4, %v587_v41 }
 0x623   : > { %v706_v42 = vpop.permute.xlu1 %705 }
 0x624   : > { %709 = vst.msk [vmem:[%s1719_s23] sm:$0xf] %vm708_vm5, %v706_v42 }
 0x64f   : > { %v825_v43 = vpop.permute.xlu0 %824 }
 0x650   : > { %828 = vst.msk [vmem:[%s1719_s23] sm:$0xf] %vm827_vm6, %v825_v43 }
 0x651   : > { %1332 = shalt.err (!%p1329_p2)
}
 0x652   : > { %s1333_s26 = scalar_lea.hbm %s1755_s22, 64  ;;  %s1337_s29 = scalar_lea.hbm %s1809_s4, 128 }
 0x653   : > { %p1334_p13 = scmp.ne.s32.totalorder %s1755_s22, %s1333_s26  ;;  %p1338_p12 = scmp.lt.u32.totalorder %s1755_s22, %s1809_s4 }
 0x654   : > { %p1339_p6 = scmp.lt.u32.totalorder %s1337_s29, %s1333_s26  ;;  %p1341_p4 = scmp.lt.u32.totalorder %s1333_s26, %s1755_s22 }
 0x655   : > { %p1335_p5 = pnand %p1334_p13, %p1843_p1 }
 0x656   : > { %p1340_p3 = por %p1339_p6, %p1338_p12 }
 0x657   : > { %p1336_p7 = pneg %p1335_p5 }
 0x658   : > { %p1342_p8 = por %p1341_p4, %p1340_p3 }
 0x65a   : > { %p1343_p9 = pnand %p1342_p8, %p1336_p7 }
 0x65c   : > { %1346 = shalt.err (!%p1343_p9)
}
 0x65d   : > { %1101 = dma.vmem_to_hbm [thread:$0]  (%p1843_p1), %s1757_s20, 64, %s1755_s22, %s830_s6  }
 0x65e PF: > { %s1844_s10 = sld [smem:[#allocation15_spill]]  ;;  %s1845_s1 = sld [smem:[#allocation20_spill]] }
 0x65f   : > { %s1846_s21 = sld [smem:[#allocation17_spill]] }
 0x664   : > { %s856_s27 = sand.u32 1, %s1844_s10   ;;  %p1847_p10 = scmp.ne.s32.totalorder %s1845_s1, 0 }
 0x665   : > { %p1848_p11 = scmp.ge.s32.totalorder %s1846_s21, 2  ;;  %s857_s13 = scalar_lea.sflag [#allocation4], %s856_s27 }
 0x667   : > { %p1117_p0 = pnand %p1848_p11, %p1847_p10 }
 0x669   : > { %1384 = dma.done.wait (!%p1117_p0), %s857_s13, 64  }
 0x66a   : > { %1386 = vsyncadd (!%p1117_p0), %s857_s13, 4294967232  ;;  %s26_s20 = sadd.s32 1, %s1846_s21   ;;  %s1849_s23 = sld [smem:[#allocation16_spill]] }
 0x66b   : > { %p23_p2 = scmp.ge.s32.totalorder %s26_s20, 4   ;;  %s1850_s17 = sld [smem:[#allocation19_spill]] }
 0x66c   : > { %s1851_s28 = sld [smem:[#allocation18_spill]]  ;;  %s1852_s15 = smov %s1393_s16 }
 0x66d   : > { %s1854_s18 = smov %s1405_s19  ;;  %25 = sbr.rel (!%p23_p2) target bundleno = 13 (0xd), region = 118 }
 0x670   : > { %s1853_s16 = smov %s1849_s23 }
 0x672   : > { %s1855_s19 = smov %s1851_s28 }
 0x674   :  { %862 = vsyncpa [#allocation3], 1 }
 0x675   :  { %864 = vsyncpa [#allocation3 + $0x1], 1 }
 0x676   :  { %865 = vsyncpa [#allocation6], 1 }
 0x677   :  { %867 = vsyncpa [#allocation6 + $0x1], 1 }
 0x678   :  { %868 = vsyncpa [#allocation9], 1 }
 0x679   :  { %870 = vsyncpa [#allocation9 + $0x1], 1 }
 0x67a   :  { %871 = vsyncpa [#allocation4], 1 }
 0x67b   :  { %873 = vsyncpa [#allocation4 + $0x1], 1 }

// kernel: text_encoder_forward.21
= control target key start
LH: loop header
LB: loop body
LE: loop exit
PB: predicated region body
PF: predicated region fallthrough
CT: control target
= control target key end

     0   :  { %11 = vsyncpa [#allocation3], 0  ;;  %s636_s0 = inlined_call_operand.hbm [shape: bf16[16,64], index: 0, kind: input, shape index: {}]   ;;  %s637_s1 = inlined_call_operand.hbm [shape: bf16[64,32], index: 1, kind: input, shape index: {}]   ;;  %s638_s2 = inlined_call_operand.hbm [shape: f32[1,32], index: 2, kind: input, shape index: {}]   ;;  %s639_s3 = inlined_call_operand.hbm [shape: bf16[16,32], index: 3, kind: input, shape index: {}]   ;;  %s640_s4 = inlined_call_operand.hbm [shape: f32[1,32], index: 4, kind: input, shape index: {}]   ;;  %s641_s5 = inlined_call_operand.hbm [shape: f32[1,32], index: 5, kind: input, shape index: {}]   ;;  %s642_s6 = inlined_call_operand.hbm [shape: f32[16,32], index: 6, kind: output, shape index: {}]  }
   0x1   :  { %12 = vsyncpa [#allocation6], 0 }
   0x2   :  { %13 = vsyncpa [#allocation9], 0 }
   0x3   :  { %14 = vsyncpa [#allocation12], 0 }
   0x4   :  { %15 = vsyncpa [#allocation4], 0  ;;  %s482_s21 = smov [#allocation5]   ;;  %s483_s23 = smov [#allocation8]  }
   0x5   :  { %s33_s22 = sshll.u32 %s482_s21, 4  ;;  %s55_s24 = sshll.u32 %s483_s23, 4  ;;  %s34_s22 = int_to_ptr.vmem [resolvable:$true] %s33_s22  ;;  %s530_s24 = int_to_ptr.vmem [resolvable:$true] %s55_s24 }
   0x6   :  { %s318_s27 = scalar_lea.hbm %s637_s1, 512 }
   0x7   :  { %p319_p0 = scmp.ne.s32.totalorder %s637_s1, %s318_s27  ;;  %p322_p1 = scmp.lt.u32.totalorder %s318_s27, %s637_s1 }
   0x9   :  { %p324_p2 = pnand %p322_p1, %p319_p0 }
   0xb   :  { %327 = shalt.err (!%p324_p2)
}
   0xc   :  { %s328_s8 = scalar_lea.vmem %s34_s22, 512  ;;  %p333_p4 = scmp.lt.s32.totalorder %s34_s22, %s34_s22 }
   0xd   :  { %p329_p3 = scmp.ne.s32.totalorder %s34_s22, %s328_s8  ;;  %p334_p5 = scmp.lt.s32.totalorder %s328_s8, %s328_s8 }
   0xf   :  { %p335_p6 = por %p334_p5, %p333_p4 }
  0x11   :  { %p336_p7 = pnand %p335_p6, %p329_p3 }
  0x13   :  { %339 = shalt.err (!%p336_p7)
}
  0x14   :  { %s484_s9 = smov 64   ;;  %s485_s10 = smov 4  }
  0x15   :  { %39 = dma.hbm_to_vmem [thread:$0]  %s637_s1, 512, %s34_s22, [#allocation6], %s484_s9, %s484_s9, %s485_s10  }
  0x16   :  { %s340_s15 = scalar_lea.hbm %s639_s3, 128 }
  0x17   :  { %p341_p8 = scmp.ne.s32.totalorder %s639_s3, %s340_s15  ;;  %p344_p9 = scmp.lt.u32.totalorder %s340_s15, %s639_s3 }
  0x19   :  { %p346_p10 = pnand %p344_p9, %p341_p8 }
  0x1b   :  { %349 = shalt.err (!%p346_p10)
}
  0x1c   :  { %s350_s20 = scalar_lea.vmem %s530_s24, 128  ;;  %p355_p12 = scmp.lt.s32.totalorder %s530_s24, %s530_s24 }
  0x1d   :  { %p351_p11 = scmp.ne.s32.totalorder %s530_s24, %s350_s20  ;;  %p356_p13 = scmp.lt.s32.totalorder %s350_s20, %s350_s20 }
  0x1f   :  { %p357_p0 = por %p356_p13, %p355_p12 }
  0x21   :  { %p358_p1 = pnand %p357_p0, %p351_p11 }
  0x23   :  { %361 = shalt.err (!%p358_p1)
}
  0x24   :  { %61 = dma.hbm_to_vmem [thread:$0]  %s639_s3, 128, %s530_s24, [#allocation9], %s484_s9, %s484_s9, %s485_s10  }
  0x25   :  { %s486_s22 = smov [#allocation2]   ;;  %s487_s25 = smov [#allocation7]  }
  0x26   :  { %s21_s23 = sshll.u32 %s486_s22, 4  ;;  %s46_s26 = sshll.u32 %s487_s25, 4  ;;  %s22_s23 = int_to_ptr.vmem [resolvable:$true] %s21_s23  ;;  %s47_s26 = int_to_ptr.vmem [resolvable:$true] %s46_s26 }
  0x27   :  { %s362_s29 = scalar_lea.hbm %s636_s0, 128 }
  0x28   :  { %p363_p2 = scmp.ne.s32.totalorder %s636_s0, %s362_s29  ;;  %p366_p3 = scmp.lt.u32.totalorder %s362_s29, %s636_s0 }
  0x2a   :  { %p368_p4 = pnand %p366_p3, %p363_p2 }
  0x2c   :  { %371 = shalt.err (!%p368_p4)
}
  0x2d   :  { %s372_s3 = scalar_lea.vmem %s22_s23, 128  ;;  %p377_p6 = scmp.lt.s32.totalorder %s22_s23, %s22_s23 }
  0x2e   :  { %p373_p5 = scmp.ne.s32.totalorder %s22_s23, %s372_s3  ;;  %p378_p7 = scmp.lt.s32.totalorder %s372_s3, %s372_s3 }
  0x30   :  { %p379_p8 = por %p378_p7, %p377_p6 }
  0x32   :  { %p380_p9 = pnand %p379_p8, %p373_p5 }
  0x34   :  { %383 = shalt.err (!%p380_p9)
}
  0x35   :  { %27 = dma.hbm_to_vmem [thread:$0]  %s636_s0, 128, %s22_s23, [#allocation3], %s484_s9, %s484_s9, %s485_s10  }
  0x36   :  { %s384_s15 = scalar_lea.hbm %s638_s2, 16 }
  0x37   :  { %p385_p10 = scmp.ne.s32.totalorder %s638_s2, %s384_s15  ;;  %p388_p11 = scmp.lt.u32.totalorder %s384_s15, %s638_s2 }
  0x39   :  { %p390_p12 = pnand %p388_p11, %p385_p10 }
  0x3b   :  { %393 = shalt.err (!%p390_p12)
}
  0x3c   :  { %s394_s20 = scalar_lea.vmem %s47_s26, 16  ;;  %s398_s1 = scalar_lea.vmem %s47_s26, 32 }
  0x3d   :  { %p395_p13 = scmp.ne.s32.totalorder %s47_s26, %s394_s20  ;;  %p399_p0 = scmp.lt.s32.totalorder %s47_s26, %s47_s26 }
  0x3e   :  { %p400_p1 = scmp.lt.s32.totalorder %s398_s1, %s394_s20 }
  0x40   :  { %p401_p2 = por %p400_p1, %p399_p0 }
  0x42   :  { %p402_p3 = pnand %p401_p2, %p395_p13 }
  0x44   :  { %405 = shalt.err (!%p402_p3)
}
  0x45   :  { %49 = dma.hbm_to_vmem [thread:$0]  %s638_s2, 16, %s47_s26, [#allocation6]  }
  0x46   :  { %s488_s10 = smov [#allocation10]   ;;  %s489_s22 = smov [#allocation11]  }
  0x47   :  { %s68_s21 = sshll.u32 %s488_s10, 4  ;;  %s78_s23 = sshll.u32 %s489_s22, 4  ;;  %s69_s21 = int_to_ptr.vmem [resolvable:$true] %s68_s21  ;;  %s79_s23 = int_to_ptr.vmem [resolvable:$true] %s78_s23 }
  0x48   :  { %s406_s28 = scalar_lea.hbm %s640_s4, 16 }
  0x49   :  { %p407_p4 = scmp.ne.s32.totalorder %s640_s4, %s406_s28  ;;  %p410_p5 = scmp.lt.u32.totalorder %s406_s28, %s640_s4 }
  0x4b   :  { %p412_p6 = pnand %p410_p5, %p407_p4 }
  0x4d   :  { %415 = shalt.err (!%p412_p6)
}
  0x4e   :  { %s416_s2 = scalar_lea.vmem %s69_s21, 16  ;;  %s420_s26 = scalar_lea.vmem %s69_s21, 32 }
  0x4f   :  { %p417_p7 = scmp.ne.s32.totalorder %s69_s21, %s416_s2  ;;  %p421_p8 = scmp.lt.s32.totalorder %s69_s21, %s69_s21 }
  0x50   :  { %p422_p9 = scmp.lt.s32.totalorder %s420_s26, %s416_s2 }
  0x52   :  { %p423_p10 = por %p422_p9, %p421_p8 }
  0x54   :  { %p424_p11 = pnand %p423_p10, %p417_p7 }
  0x56   :  { %427 = shalt.err (!%p424_p11)
}
  0x57   :  { %71 = dma.hbm_to_vmem [thread:$0]  %s640_s4, 16, %s69_s21, [#allocation9]  }
  0x58   :  { %s428_s13 = scalar_lea.hbm %s641_s5, 16 }
  0x59   :  { %p429_p12 = scmp.ne.s32.totalorder %s641_s5, %s428_s13  ;;  %p432_p13 = scmp.lt.u32.totalorder %s428_s13, %s641_s5 }
  0x5b   :  { %p434_p0 = pnand %p432_p13, %p429_p12 }
  0x5d   :  { %437 = shalt.err (!%p434_p0)
}
  0x5e   :  { %s438_s18 = scalar_lea.vmem %s79_s23, 16  ;;  %s442_s19 = scalar_lea.vmem %s79_s23, 32 }
  0x5f   :  { %p439_p1 = scmp.ne.s32.totalorder %s79_s23, %s438_s18  ;;  %p443_p2 = scmp.lt.s32.totalorder %s79_s23, %s79_s23 }
  0x60   :  { %p444_p3 = scmp.lt.s32.totalorder %s442_s19, %s438_s18 }
  0x62   :  { %p445_p4 = por %p444_p3, %p443_p2 }
  0x64   :  { %p446_p5 = pnand %p445_p4, %p439_p1 }
  0x66   :  { %449 = shalt.err (!%p446_p5)
}
  0x67   :  { %81 = dma.hbm_to_vmem [thread:$0]  %s641_s5, 16, %s79_s23, [#allocation12]  }
  0x68   :  { %472 = dma.done.wait [#allocation3], 128  }
  0x69   :  { %473 = vsyncadd [#allocation3], 4294967168 }
  0x6a   :  { %474 = dma.done.wait [#allocation6], 528  }
  0x6b   :  { %475 = vsyncadd [#allocation6], 4294966768 }
  0x6c   :  { %476 = dma.done.wait [#allocation9], 144  }
  0x6d   :  { %477 = vsyncadd [#allocation9], 4294967152 }
  0x6e   :  { %478 = dma.done.wait [#allocation12], 16  }
  0x6f   :  { %479 = vsyncadd [#allocation12], 4294967280  ;;  %v490_v0 = vmov 0.0   ;;  %vm491_vm0 = vmmov 0   ;;  %v309_v1 = vld [vmem:[#allocation5] sm:$0xff]   ;;  %v310_v2 = vld [vmem:[#allocation5 + $0x8] sm:$0xff]  }
  0x70   :  { %284 = vmatprep.subr.bf16.mxu0 %v490_v0  ;;  %292 = vmatprep.mubr.msk.bf16.mxu0 %vm491_vm0, %v490_v0  ;;  %v311_v3 = vld [vmem:[#allocation5 + $0x10] sm:$0xff]   ;;  %v312_v4 = vld [vmem:[#allocation5 + $0x18] sm:$0xff]   ;;  %vm147_vm1 = vcmask 523264   ;;  %v276_v6 = vld [vmem:[#allocation8] sm:$0xff]   ;;  %vm198_vm2 = vcmask 261120   ;;  %s492_s5 = smov [#allocation13]  }
  0x71   :  { %285 = vmatpush3.bf16.msra.mxu0 %v309_v1  ;;  %v313_v5 = vld [vmem:[#allocation2] sm:$0xff]   ;;  %v266_v7 = vld [vmem:[#allocation7] ss:$0 sm:$0xff]  ;;  %v277_v8 = vunpack.c.l.bf16 %v276_v6  ;;  %v278_v12 = vunpack.c.h.bf16 %v276_v6  ;;  %v273_v37 = vld [vmem:[#allocation10] ss:$0 sm:$0xff]  ;;  %s251_s1 = sshll.u32 %s492_s5, 4  ;;  %s252_s1 = int_to_ptr.vmem [resolvable:$true] %s251_s1 }
  0x72   :  { %286 = vmatprep.subr.bf16.mxu0 %v490_v0  ;;  %v274_v39 = vld [vmem:[#allocation11] ss:$0 sm:$0xff]  ;;  %s450_s0 = scalar_lea.vmem %s252_s1, 256  ;;  %p455_p7 = scmp.lt.s32.totalorder %s252_s1, %s252_s1 }
  0x73   :  { %p451_p6 = scmp.ne.s32.totalorder %s252_s1, %s450_s0  ;;  %p456_p8 = scmp.lt.s32.totalorder %s450_s0, %s450_s0 }
  0x75   :  { %287 = vmatpush3.bf16.msra.mxu0 %v310_v2  ;;  %p457_p9 = por %p456_p8, %p455_p7 }
  0x76   :  { %288 = vmatprep.subr.bf16.mxu0 %v490_v0 }
  0x77   :  { %p458_p10 = pnand %p457_p9, %p451_p6 }
  0x79   :  { %289 = vmatpush3.bf16.msra.mxu0 %v311_v3 }
  0x7a   :  { %290 = vmatprep.subr.bf16.mxu0 %v490_v0 }
  0x7d   :  { %291 = vmatpush3.bf16.msra.mxu0 %v312_v4 }
  0x80   :  { %293 = vmatmul.mubr.msk.bf16.vlgmr.msra.gmra.mrb[0].mxu0 %vm147_vm1, %v313_v5 }
 0x153   :  { %v185_v9 = vpop.f32.mrb[0].mxu0 }
 0x154   :  { %v186_v10 = vadd.f32 %v266_v7, %v185_v9  ;;  %v294_v11 = vpop.f32.mrb[1].mxu0 }
 0x155   :  { %v188_v13 = vpop.f32.mrb[2].mxu0 }
 0x156   :  { %v189_v14 = vadd.f32 %v266_v7, %v188_v13  ;;  %v295_v15 = vpop.f32.mrb[3].mxu0  ;;  %v196_v16 = vadd.f32 %v277_v8, %v186_v10 }
 0x158   :  { %v199_v17 = vsel %vm198_vm2, %v196_v16, 0.0  ;;  %v197_v18 = vadd.f32 %v278_v12, %v189_v14 }
 0x159   :  { %200 = vadd.xlane.f32.xlu0 %v199_v17 }
 0x15a   :  { %v202_v19 = vsel %vm198_vm2, %v197_v18, 0.0 }
 0x15d   :  { %203 = vadd.xlane.f32.xlu0 %v202_v19 }
 0x1e6   :  { %v201_v20 = vpop.xlane.xlu0 %200 }
 0x1e7   :  { %v206_v21 = vmul.f32 0.03125, %v201_v20 }
 0x1e9   :  { %v208_v22 = vsub.f32 %v196_v16, %v206_v21 }
 0x1ea   :  { %v204_v23 = vpop.xlane.xlu0 %203 }
 0x1eb   :  { %v207_v24 = vmul.f32 0.03125, %v204_v23  ;;  %v210_v25 = vmul.f32 %v208_v22, %v208_v22 }
 0x1ed   :  { %v209_v26 = vsub.f32 %v197_v18, %v207_v24  ;;  %v212_v27 = vsel %vm198_vm2, %v210_v25, 0.0 }
 0x1ee   :  { %213 = vadd.xlane.f32.xlu1 %v212_v27 }
 0x1ef   :  { %v211_v28 = vmul.f32 %v209_v26, %v209_v26 }
 0x1f1   :  { %v215_v29 = vsel %vm198_vm2, %v211_v28, 0.0 }
 0x1f2   :  { %216 = vadd.xlane.f32.xlu1 %v215_v29 }
 0x27b   :  { %v214_v30 = vpop.xlane.xlu1 %213 }
 0x27c   :  { %v218_v31 = vmul.f32 0.03125, %v214_v30 }
 0x27e   :  { %v220_v32 = vadd.f32 1e-12, %v218_v31 }
 0x27f   :  { %v217_v33 = vpop.xlane.xlu1 %216 }
 0x280   :  { %314 = vrsqrt.f32 %v220_v32  ;;  %v219_v34 = vmul.f32 0.03125, %v217_v33 }
 0x282   :  { %v221_v35 = vadd.f32 1e-12, %v219_v34 }
 0x284   :  { %316 = vrsqrt.f32 %v221_v35 }
 0x28a   :  { %v315_v36 = vpop.eup %314 }
 0x28b   :  { %v224_v38 = vmul.f32 %v315_v36, %v208_v22 }
 0x28d   :  { %v233_v40 = vmul.f32 %v273_v37, %v224_v38 }
 0x28e   :  { %v317_v41 = vpop.eup %316 }
 0x28f   :  { %v225_v42 = vmul.f32 %v317_v41, %v209_v26  ;;  %v242_v43 = vadd.f32 %v274_v39, %v233_v40 }
 0x291   :  { %v234_v44 = vmul.f32 %v273_v37, %v225_v42  ;;  %244 = vst.msk [vmem:[#allocation13] sm:$0xff] %vm198_vm2, %v242_v43 }
 0x293   :  { %v243_v45 = vadd.f32 %v274_v39, %v234_v44 }
 0x295   :  { %245 = vst.msk [vmem:[#allocation13 + $0x8] sm:$0xff] %vm198_vm2, %v243_v45 }
 0x296   :  { %461 = shalt.err (!%p458_p10)
}
 0x297   :  { %s462_s21 = scalar_lea.hbm %s642_s6, 256 }
 0x298   :  { %p463_p11 = scmp.ne.s32.totalorder %s642_s6, %s462_s21  ;;  %p466_p12 = scmp.lt.u32.totalorder %s462_s21, %s642_s6 }
 0x29a   :  { %p468_p13 = pnand %p466_p12, %p463_p11 }
 0x29c   :  { %471 = shalt.err (!%p468_p13)
}
 0x29d   :  { %s493_s28 = smov 128   ;;  %s494_s29 = smov 8  }
 0x29e   :  { %257 = dma.vmem_to_hbm [thread:$0]  %s252_s1, 256, %s642_s6, [#allocation4], %s493_s28, %s493_s28, %s494_s29  }
 0x29f   :  { %480 = dma.done.wait [#allocation4], 256  }
 0x2a0   :  { %481 = vsyncadd [#allocation4], 4294967040 }
 0x2a1   :  { %261 = vsyncpa [#allocation3], 1 }
 0x2a2   :  { %262 = vsyncpa [#allocation6], 1 }
 0x2a3   :  { %263 = vsyncpa [#allocation9], 1 }
 0x2a4   :  { %264 = vsyncpa [#allocation12], 1 }
 0x2a5   :  { %265 = vsyncpa [#allocation4], 1 }

// kernel: text_encoder_forward.15
= control target key start
LH: loop header
LB: loop body
LE: loop exit
PB: predicated region body
PF: predicated region fallthrough
CT: control target
= control target key end

     0   :  { %8 = vsyncpa [#allocation3], 0  ;;  %s398_s0 = inlined_call_operand.hbm [shape: bf16[16,32], index: 0, kind: input, shape index: {}]   ;;  %s399_s1 = inlined_call_operand.hbm [shape: bf16[32,64], index: 1, kind: input, shape index: {}]   ;;  %s400_s2 = inlined_call_operand.hbm [shape: f32[1,64], index: 2, kind: input, shape index: {}]   ;;  %s401_s3 = inlined_call_operand.hbm [shape: bf16[16,64], index: 3, kind: output, shape index: {}]  }
   0x1   :  { %9 = vsyncpa [#allocation6], 0 }
   0x2   :  { %10 = vsyncpa [#allocation4], 0  ;;  %s306_s12 = smov [#allocation5]   ;;  %s307_s14 = smov [#allocation2]  }
   0x3   :  { %s28_s13 = sshll.u32 %s306_s12, 4  ;;  %s16_s15 = sshll.u32 %s307_s14, 4  ;;  %s29_s13 = int_to_ptr.vmem [resolvable:$true] %s28_s13  ;;  %s334_s15 = int_to_ptr.vmem [resolvable:$true] %s16_s15 }
   0x4   :  { %s212_s18 = scalar_lea.hbm %s399_s1, 256 }
   0x5   :  { %p213_p0 = scmp.ne.s32.totalorder %s399_s1, %s212_s18  ;;  %p216_p1 = scmp.lt.u32.totalorder %s212_s18, %s399_s1 }
   0x7   :  { %p218_p2 = pnand %p216_p1, %p213_p0 }
   0x9   :  { %221 = shalt.err (!%p218_p2)
}
   0xa   :  { %s222_s23 = scalar_lea.vmem %s29_s13, 256  ;;  %p227_p4 = scmp.lt.s32.totalorder %s29_s13, %s29_s13 }
   0xb   :  { %p223_p3 = scmp.ne.s32.totalorder %s29_s13, %s222_s23  ;;  %p228_p5 = scmp.lt.s32.totalorder %s222_s23, %s222_s23 }
   0xd   :  { %p229_p6 = por %p228_p5, %p227_p4 }
   0xf   :  { %p230_p7 = pnand %p229_p6, %p223_p3 }
  0x11   :  { %233 = shalt.err (!%p230_p7)
}
  0x12   :  { %s308_s24 = smov 64   ;;  %s309_s25 = smov 4  }
  0x13   :  { %34 = dma.hbm_to_vmem [thread:$0]  %s399_s1, 256, %s29_s13, [#allocation6], %s308_s24, %s308_s24, %s309_s25  }
  0x14   :  { %s234_s30 = scalar_lea.hbm %s398_s0, 128 }
  0x15   :  { %p235_p8 = scmp.ne.s32.totalorder %s398_s0, %s234_s30  ;;  %p238_p9 = scmp.lt.u32.totalorder %s234_s30, %s398_s0 }
  0x17   :  { %p240_p10 = pnand %p238_p9, %p235_p8 }
  0x19   :  { %243 = shalt.err (!%p240_p10)
}
  0x1a   :  { %s244_s8 = scalar_lea.vmem %s334_s15, 128  ;;  %p249_p12 = scmp.lt.s32.totalorder %s334_s15, %s334_s15 }
  0x1b   :  { %p245_p11 = scmp.ne.s32.totalorder %s334_s15, %s244_s8  ;;  %p250_p13 = scmp.lt.s32.totalorder %s244_s8, %s244_s8 }
  0x1d   :  { %p251_p0 = por %p250_p13, %p249_p12 }
  0x1f   :  { %p252_p1 = pnand %p251_p0, %p245_p11 }
  0x21   :  { %255 = shalt.err (!%p252_p1)
}
  0x22   :  { %22 = dma.hbm_to_vmem [thread:$0]  %s398_s0, 128, %s334_s15, [#allocation3], %s308_s24, %s308_s24, %s309_s25  }
  0x23   :  { %s310_s10 = smov [#allocation7]   ;;  %s256_s14 = scalar_lea.hbm %s400_s2, 16 }
  0x24   :  { %s41_s11 = sshll.u32 %s310_s10, 4  ;;  %p257_p2 = scmp.ne.s32.totalorder %s400_s2, %s256_s14  ;;  %s42_s11 = int_to_ptr.vmem [resolvable:$true] %s41_s11 }
  0x25   :  { %p260_p3 = scmp.lt.u32.totalorder %s256_s14, %s400_s2 }
  0x27   :  { %p262_p4 = pnand %p260_p3, %p257_p2 }
  0x29   :  { %265 = shalt.err (!%p262_p4)
}
  0x2a   :  { %s266_s20 = scalar_lea.vmem %s42_s11, 16  ;;  %s270_s0 = scalar_lea.vmem %s42_s11, 32 }
  0x2b   :  { %p267_p5 = scmp.ne.s32.totalorder %s42_s11, %s266_s20  ;;  %p271_p6 = scmp.lt.s32.totalorder %s42_s11, %s42_s11 }
  0x2c   :  { %p272_p7 = scmp.lt.s32.totalorder %s270_s0, %s266_s20 }
  0x2e   :  { %p273_p8 = por %p272_p7, %p271_p6 }
  0x30   :  { %p274_p9 = pnand %p273_p8, %p267_p5 }
  0x32   :  { %277 = shalt.err (!%p274_p9)
}
  0x33   :  { %44 = dma.hbm_to_vmem [thread:$0]  %s400_s2, 16, %s42_s11, [#allocation6]  }
  0x34   :  { %300 = dma.done.wait [#allocation3], 128  }
  0x35   :  { %301 = vsyncadd [#allocation3], 4294967168 }
  0x36   :  { %302 = dma.done.wait [#allocation6], 272  }
  0x37   :  { %303 = vsyncadd [#allocation6], 4294967024  ;;  %v311_v0 = vmov 0.0   ;;  %vm312_vm0 = vmmov 0   ;;  %v205_v1 = vld [vmem:[#allocation5] sm:$0xff]   ;;  %v206_v2 = vld [vmem:[#allocation5 + $0x8] sm:$0xff]  }
  0x38   :  { %189 = vmatprep.subr.bf16.mxu0 %v311_v0  ;;  %193 = vmatprep.mubr.msk.bf16.mxu0 %vm312_vm0, %v311_v0  ;;  %v207_v3 = vld [vmem:[#allocation2] sm:$0xff]   ;;  %vm85_vm1 = vcmask 261120   ;;  %v177_v4 = vld [vmem:[#allocation7] ss:$0 sm:$0xff]  ;;  %vm156_vm2 = vcmask 519168   ;;  %s313_s2 = smov [#allocation8]  }
  0x39   :  { %190 = vmatpush3.bf16.msra.mxu0 %v205_v1  ;;  %s164_s22 = sshll.u32 %s313_s2, 4  ;;  %s165_s22 = int_to_ptr.vmem [resolvable:$true] %s164_s22 }
  0x3a   :  { %191 = vmatprep.subr.bf16.mxu0 %v311_v0  ;;  %s278_s23 = scalar_lea.vmem %s165_s22, 128  ;;  %p283_p11 = scmp.lt.s32.totalorder %s165_s22, %s165_s22 }
  0x3b   :  { %p279_p10 = scmp.ne.s32.totalorder %s165_s22, %s278_s23  ;;  %p284_p12 = scmp.lt.s32.totalorder %s278_s23, %s278_s23 }
  0x3d   :  { %192 = vmatpush3.bf16.msra.mxu0 %v206_v2  ;;  %p285_p13 = por %p284_p12, %p283_p11 }
  0x3f   :  { %p286_p0 = pnand %p285_p13, %p279_p10 }
  0x40   :  { %194 = vmatmul.mubr.msk.bf16.vlgmr.msra.gmra.mrb[0].mxu0 %vm85_vm1, %v207_v3 }
 0x113   :  { %v123_v5 = vpop.f32.mrb[0].mxu0 }
 0x114   :  { %v124_v6 = vadd.f32 %v177_v4, %v123_v5  ;;  %v195_v7 = vpop.f32.mrb[1].mxu0 }
 0x115   :  { %v126_v8 = vpop.f32.mrb[2].mxu0 }
 0x116   :  { %v130_v9 = vmul.f32 %v124_v6, %v124_v6  ;;  %v127_v10 = vadd.f32 %v177_v4, %v126_v8  ;;  %v196_v11 = vpop.f32.mrb[3].mxu0 }
 0x118   :  { %v132_v12 = vmul.f32 %v130_v9, %v124_v6  ;;  %v131_v13 = vmul.f32 %v127_v10, %v127_v10 }
 0x11a   :  { %v134_v14 = vmul.f32 0.044715, %v132_v12  ;;  %v133_v15 = vmul.f32 %v131_v13, %v127_v10 }
 0x11c   :  { %v136_v16 = vadd.f32 %v134_v14, %v124_v6  ;;  %v135_v17 = vmul.f32 0.044715, %v133_v15 }
 0x11e   :  { %v138_v18 = vmul.f32 0.7978846, %v136_v16  ;;  %v137_v19 = vadd.f32 %v135_v17, %v127_v10 }
 0x120   :  { %208 = vtanh.f32 %v138_v18  ;;  %v139_v20 = vmul.f32 0.7978846, %v137_v19 }
 0x122   :  { %210 = vtanh.f32 %v139_v20 }
 0x12a   :  { %v209_v21 = vpop.eup %208 }
 0x12b   :  { %v142_v22 = vadd.f32 1.0, %v209_v21 }
 0x12c   :  { %v211_v23 = vpop.eup %210 }
 0x12d   :  { %v143_v24 = vadd.f32 1.0, %v211_v23  ;;  %v144_v25 = vmul.f32 0.5, %v142_v22 }
 0x12f   :  { %v145_v26 = vmul.f32 0.5, %v143_v24  ;;  %v146_v27 = vmul.f32 %v144_v25, %v124_v6 }
 0x131   :  { %v147_v28 = vmul.f32 %v145_v26, %v127_v10  ;;  %v184_v29 = vpack.c.bf16 %v146_v27, %v146_v27 }
 0x133   :  { %v185_v30 = vpack.c.bf16 %v147_v28, %v147_v28  ;;  %157 = vst.msk [vmem:[#allocation8] sm:$0xf] %vm156_vm2, %v184_v29 }
 0x135   :  { %158 = vst.msk [vmem:[#allocation8 + $0x4] sm:$0xf] %vm156_vm2, %v185_v30 }
 0x136   :  { %289 = shalt.err (!%p286_p0)
}
 0x137   :  { %s290_s28 = scalar_lea.hbm %s401_s3, 128 }
 0x138   :  { %p291_p1 = scmp.ne.s32.totalorder %s401_s3, %s290_s28  ;;  %p294_p2 = scmp.lt.u32.totalorder %s290_s28, %s401_s3 }
 0x13a   :  { %p296_p3 = pnand %p294_p2, %p291_p1 }
 0x13c   :  { %299 = shalt.err (!%p296_p3)
}
 0x13d   :  { %170 = dma.vmem_to_hbm [thread:$0]  %s165_s22, 128, %s401_s3, [#allocation4], %s308_s24, %s308_s24, %s309_s25  }
 0x13e   :  { %304 = dma.done.wait [#allocation4], 128  }
 0x13f   :  { %305 = vsyncadd [#allocation4], 4294967168 }
 0x140   :  { %174 = vsyncpa [#allocation3], 1 }
 0x141   :  { %175 = vsyncpa [#allocation6], 1 }
 0x142   :  { %176 = vsyncpa [#allocation4], 1 }

// kernel: text_encoder_forward.16
= control target key start
LH: loop header
LB: loop body
LE: loop exit
PB: predicated region body
PF: predicated region fallthrough
CT: control target
= control target key end

     0   :  { %11 = vsyncpa [#allocation3], 0  ;;  %s646_s0 = inlined_call_operand.hbm [shape: bf16[16,64], index: 0, kind: input, shape index: {}]   ;;  %s647_s1 = inlined_call_operand.hbm [shape: bf16[64,32], index: 1, kind: input, shape index: {}]   ;;  %s648_s2 = inlined_call_operand.hbm [shape: f32[1,32], index: 2, kind: input, shape index: {}]   ;;  %s649_s3 = inlined_call_operand.hbm [shape: bf16[16,32], index: 3, kind: input, shape index: {}]   ;;  %s650_s4 = inlined_call_operand.hbm [shape: f32[1,32], index: 4, kind: input, shape index: {}]   ;;  %s651_s5 = inlined_call_operand.hbm [shape: f32[1,32], index: 5, kind: input, shape index: {}]   ;;  %s652_s6 = inlined_call_operand.hbm [shape: bf16[16,32], index: 6, kind: output, shape index: {}]  }
   0x1   :  { %12 = vsyncpa [#allocation6], 0 }
   0x2   :  { %13 = vsyncpa [#allocation9], 0 }
   0x3   :  { %14 = vsyncpa [#allocation12], 0 }
   0x4   :  { %15 = vsyncpa [#allocation4], 0  ;;  %s493_s21 = smov [#allocation5]   ;;  %s494_s23 = smov [#allocation8]  }
   0x5   :  { %s33_s22 = sshll.u32 %s493_s21, 4  ;;  %s55_s24 = sshll.u32 %s494_s23, 4  ;;  %s34_s22 = int_to_ptr.vmem [resolvable:$true] %s33_s22  ;;  %s539_s24 = int_to_ptr.vmem [resolvable:$true] %s55_s24 }
   0x6   :  { %s329_s27 = scalar_lea.hbm %s647_s1, 512 }
   0x7   :  { %p330_p0 = scmp.ne.s32.totalorder %s647_s1, %s329_s27  ;;  %p333_p1 = scmp.lt.u32.totalorder %s329_s27, %s647_s1 }
   0x9   :  { %p335_p2 = pnand %p333_p1, %p330_p0 }
   0xb   :  { %338 = shalt.err (!%p335_p2)
}
   0xc   :  { %s339_s8 = scalar_lea.vmem %s34_s22, 512  ;;  %p344_p4 = scmp.lt.s32.totalorder %s34_s22, %s34_s22 }
   0xd   :  { %p340_p3 = scmp.ne.s32.totalorder %s34_s22, %s339_s8  ;;  %p345_p5 = scmp.lt.s32.totalorder %s339_s8, %s339_s8 }
   0xf   :  { %p346_p6 = por %p345_p5, %p344_p4 }
  0x11   :  { %p347_p7 = pnand %p346_p6, %p340_p3 }
  0x13   :  { %350 = shalt.err (!%p347_p7)
}
  0x14   :  { %s495_s9 = smov 64   ;;  %s496_s10 = smov 4  }
  0x15   :  { %39 = dma.hbm_to_vmem [thread:$0]  %s647_s1, 512, %s34_s22, [#allocation6], %s495_s9, %s495_s9, %s496_s10  }
  0x16   :  { %s351_s15 = scalar_lea.hbm %s649_s3, 128 }
  0x17   :  { %p352_p8 = scmp.ne.s32.totalorder %s649_s3, %s351_s15  ;;  %p355_p9 = scmp.lt.u32.totalorder %s351_s15, %s649_s3 }
  0x19   :  { %p357_p10 = pnand %p355_p9, %p352_p8 }
  0x1b   :  { %360 = shalt.err (!%p357_p10)
}
  0x1c   :  { %s361_s20 = scalar_lea.vmem %s539_s24, 128  ;;  %p366_p12 = scmp.lt.s32.totalorder %s539_s24, %s539_s24 }
  0x1d   :  { %p362_p11 = scmp.ne.s32.totalorder %s539_s24, %s361_s20  ;;  %p367_p13 = scmp.lt.s32.totalorder %s361_s20, %s361_s20 }
  0x1f   :  { %p368_p0 = por %p367_p13, %p366_p12 }
  0x21   :  { %p369_p1 = pnand %p368_p0, %p362_p11 }
  0x23   :  { %372 = shalt.err (!%p369_p1)
}
  0x24   :  { %61 = dma.hbm_to_vmem [thread:$0]  %s649_s3, 128, %s539_s24, [#allocation9], %s495_s9, %s495_s9, %s496_s10  }
  0x25   :  { %s497_s22 = smov [#allocation2]   ;;  %s498_s25 = smov [#allocation7]  }
  0x26   :  { %s21_s23 = sshll.u32 %s497_s22, 4  ;;  %s46_s26 = sshll.u32 %s498_s25, 4  ;;  %s22_s23 = int_to_ptr.vmem [resolvable:$true] %s21_s23  ;;  %s47_s26 = int_to_ptr.vmem [resolvable:$true] %s46_s26 }
  0x27   :  { %s373_s29 = scalar_lea.hbm %s646_s0, 128 }
  0x28   :  { %p374_p2 = scmp.ne.s32.totalorder %s646_s0, %s373_s29  ;;  %p377_p3 = scmp.lt.u32.totalorder %s373_s29, %s646_s0 }
  0x2a   :  { %p379_p4 = pnand %p377_p3, %p374_p2 }
  0x2c   :  { %382 = shalt.err (!%p379_p4)
}
  0x2d   :  { %s383_s3 = scalar_lea.vmem %s22_s23, 128  ;;  %p388_p6 = scmp.lt.s32.totalorder %s22_s23, %s22_s23 }
  0x2e   :  { %p384_p5 = scmp.ne.s32.totalorder %s22_s23, %s383_s3  ;;  %p389_p7 = scmp.lt.s32.totalorder %s383_s3, %s383_s3 }
  0x30   :  { %p390_p8 = por %p389_p7, %p388_p6 }
  0x32   :  { %p391_p9 = pnand %p390_p8, %p384_p5 }
  0x34   :  { %394 = shalt.err (!%p391_p9)
}
  0x35   :  { %27 = dma.hbm_to_vmem [thread:$0]  %s646_s0, 128, %s22_s23, [#allocation3], %s495_s9, %s495_s9, %s496_s10  }
  0x36   :  { %s395_s15 = scalar_lea.hbm %s648_s2, 16 }
  0x37   :  { %p396_p10 = scmp.ne.s32.totalorder %s648_s2, %s395_s15  ;;  %p399_p11 = scmp.lt.u32.totalorder %s395_s15, %s648_s2 }
  0x39   :  { %p401_p12 = pnand %p399_p11, %p396_p10 }
  0x3b   :  { %404 = shalt.err (!%p401_p12)
}
  0x3c   :  { %s405_s20 = scalar_lea.vmem %s47_s26, 16  ;;  %s409_s1 = scalar_lea.vmem %s47_s26, 32 }
  0x3d   :  { %p406_p13 = scmp.ne.s32.totalorder %s47_s26, %s405_s20  ;;  %p410_p0 = scmp.lt.s32.totalorder %s47_s26, %s47_s26 }
  0x3e   :  { %p411_p1 = scmp.lt.s32.totalorder %s409_s1, %s405_s20 }
  0x40   :  { %p412_p2 = por %p411_p1, %p410_p0 }
  0x42   :  { %p413_p3 = pnand %p412_p2, %p406_p13 }
  0x44   :  { %416 = shalt.err (!%p413_p3)
}
  0x45   :  { %49 = dma.hbm_to_vmem [thread:$0]  %s648_s2, 16, %s47_s26, [#allocation6]  }
  0x46   :  { %s499_s22 = smov [#allocation10]   ;;  %s500_s25 = smov [#allocation11]  }
  0x47   :  { %s68_s23 = sshll.u32 %s499_s22, 4  ;;  %s78_s27 = sshll.u32 %s500_s25, 4  ;;  %s69_s23 = int_to_ptr.vmem [resolvable:$true] %s68_s23  ;;  %s79_s27 = int_to_ptr.vmem [resolvable:$true] %s78_s27 }
  0x48   :  { %s417_s30 = scalar_lea.hbm %s650_s4, 16 }
  0x49   :  { %p418_p4 = scmp.ne.s32.totalorder %s650_s4, %s417_s30  ;;  %p421_p5 = scmp.lt.u32.totalorder %s417_s30, %s650_s4 }
  0x4b   :  { %p423_p6 = pnand %p421_p5, %p418_p4 }
  0x4d   :  { %426 = shalt.err (!%p423_p6)
}
  0x4e   :  { %s427_s2 = scalar_lea.vmem %s69_s23, 16  ;;  %s431_s26 = scalar_lea.vmem %s69_s23, 32 }
  0x4f   :  { %p428_p7 = scmp.ne.s32.totalorder %s69_s23, %s427_s2  ;;  %p432_p8 = scmp.lt.s32.totalorder %s69_s23, %s69_s23 }
  0x50   :  { %p433_p9 = scmp.lt.s32.totalorder %s431_s26, %s427_s2 }
  0x52   :  { %p434_p10 = por %p433_p9, %p432_p8 }
  0x54   :  { %p435_p11 = pnand %p434_p10, %p428_p7 }
  0x56   :  { %438 = shalt.err (!%p435_p11)
}
  0x57   :  { %71 = dma.hbm_to_vmem [thread:$0]  %s650_s4, 16, %s69_s23, [#allocation9]  }
  0x58   :  { %s439_s15 = scalar_lea.hbm %s651_s5, 16 }
  0x59   :  { %p440_p12 = scmp.ne.s32.totalorder %s651_s5, %s439_s15  ;;  %p443_p13 = scmp.lt.u32.totalorder %s439_s15, %s651_s5 }
  0x5b   :  { %p445_p0 = pnand %p443_p13, %p440_p12 }
  0x5d   :  { %448 = shalt.err (!%p445_p0)
}
  0x5e   :  { %s449_s20 = scalar_lea.vmem %s79_s27, 16  ;;  %s453_s1 = scalar_lea.vmem %s79_s27, 32 }
  0x5f   :  { %p450_p1 = scmp.ne.s32.totalorder %s79_s27, %s449_s20  ;;  %p454_p2 = scmp.lt.s32.totalorder %s79_s27, %s79_s27 }
  0x60   :  { %p455_p3 = scmp.lt.s32.totalorder %s453_s1, %s449_s20 }
  0x62   :  { %p456_p4 = por %p455_p3, %p454_p2 }
  0x64   :  { %p457_p5 = pnand %p456_p4, %p450_p1 }
  0x66   :  { %460 = shalt.err (!%p457_p5)
}
  0x67   :  { %81 = dma.hbm_to_vmem [thread:$0]  %s651_s5, 16, %s79_s27, [#allocation12]  }
  0x68   :  { %483 = dma.done.wait [#allocation3], 128  }
  0x69   :  { %484 = vsyncadd [#allocation3], 4294967168 }
  0x6a   :  { %485 = dma.done.wait [#allocation6], 528  }
  0x6b   :  { %486 = vsyncadd [#allocation6], 4294966768 }
  0x6c   :  { %487 = dma.done.wait [#allocation9], 144  }
  0x6d   :  { %488 = vsyncadd [#allocation9], 4294967152 }
  0x6e   :  { %489 = dma.done.wait [#allocation12], 16  }
  0x6f   :  { %490 = vsyncadd [#allocation12], 4294967280  ;;  %v501_v0 = vmov 0.0   ;;  %vm502_vm0 = vmmov 0   ;;  %v320_v1 = vld [vmem:[#allocation5] sm:$0xff]   ;;  %v321_v2 = vld [vmem:[#allocation5 + $0x8] sm:$0xff]  }
  0x70   :  { %297 = vmatprep.subr.bf16.mxu0 %v501_v0  ;;  %305 = vmatprep.mubr.msk.bf16.mxu0 %vm502_vm0, %v501_v0  ;;  %v322_v3 = vld [vmem:[#allocation5 + $0x10] sm:$0xff]   ;;  %v323_v4 = vld [vmem:[#allocation5 + $0x18] sm:$0xff]   ;;  %vm147_vm1 = vcmask 523264   ;;  %v289_v6 = vld [vmem:[#allocation8] sm:$0xff]   ;;  %vm198_vm2 = vcmask 261120   ;;  %vm252_vm3 = vcmask 257024  }
  0x71   :  { %298 = vmatpush3.bf16.msra.mxu0 %v320_v1  ;;  %v324_v5 = vld [vmem:[#allocation2] sm:$0xff]   ;;  %v275_v7 = vld [vmem:[#allocation7] ss:$0 sm:$0xff]  ;;  %v290_v8 = vunpack.c.l.bf16 %v289_v6  ;;  %v291_v12 = vunpack.c.h.bf16 %v289_v6  ;;  %v282_v37 = vld [vmem:[#allocation10] ss:$0 sm:$0xff]  ;;  %s503_s5 = smov [#allocation13]  }
  0x72   :  { %299 = vmatprep.subr.bf16.mxu0 %v501_v0  ;;  %v283_v39 = vld [vmem:[#allocation11] ss:$0 sm:$0xff]  ;;  %s260_s21 = sshll.u32 %s503_s5, 4  ;;  %s261_s21 = int_to_ptr.vmem [resolvable:$true] %s260_s21 }
  0x73   :  { %s461_s22 = scalar_lea.vmem %s261_s21, 128  ;;  %p466_p7 = scmp.lt.s32.totalorder %s261_s21, %s261_s21 }
  0x74   :  { %p462_p6 = scmp.ne.s32.totalorder %s261_s21, %s461_s22  ;;  %p467_p8 = scmp.lt.s32.totalorder %s461_s22, %s461_s22 }
  0x75   :  { %300 = vmatpush3.bf16.msra.mxu0 %v321_v2 }
  0x76   :  { %301 = vmatprep.subr.bf16.mxu0 %v501_v0  ;;  %p468_p9 = por %p467_p8, %p466_p7 }
  0x78   :  { %p469_p10 = pnand %p468_p9, %p462_p6 }
  0x79   :  { %302 = vmatpush3.bf16.msra.mxu0 %v322_v3 }
  0x7a   :  { %303 = vmatprep.subr.bf16.mxu0 %v501_v0 }
  0x7d   :  { %304 = vmatpush3.bf16.msra.mxu0 %v323_v4 }
  0x80   :  { %306 = vmatmul.mubr.msk.bf16.vlgmr.msra.gmra.mrb[0].mxu0 %vm147_vm1, %v324_v5 }
 0x153   :  { %v185_v9 = vpop.f32.mrb[0].mxu0 }
 0x154   :  { %v186_v10 = vadd.f32 %v275_v7, %v185_v9  ;;  %v307_v11 = vpop.f32.mrb[1].mxu0 }
 0x155   :  { %v188_v13 = vpop.f32.mrb[2].mxu0 }
 0x156   :  { %v189_v14 = vadd.f32 %v275_v7, %v188_v13  ;;  %v308_v15 = vpop.f32.mrb[3].mxu0  ;;  %v196_v16 = vadd.f32 %v290_v8, %v186_v10 }
 0x158   :  { %v199_v17 = vsel %vm198_vm2, %v196_v16, 0.0  ;;  %v197_v18 = vadd.f32 %v291_v12, %v189_v14 }
 0x159   :  { %200 = vadd.xlane.f32.xlu0 %v199_v17 }
 0x15a   :  { %v202_v19 = vsel %vm198_vm2, %v197_v18, 0.0 }
 0x15d   :  { %203 = vadd.xlane.f32.xlu0 %v202_v19 }
 0x1e6   :  { %v201_v20 = vpop.xlane.xlu0 %200 }
 0x1e7   :  { %v206_v21 = vmul.f32 0.03125, %v201_v20 }
 0x1e9   :  { %v208_v22 = vsub.f32 %v196_v16, %v206_v21 }
 0x1ea   :  { %v204_v23 = vpop.xlane.xlu0 %203 }
 0x1eb   :  { %v207_v24 = vmul.f32 0.03125, %v204_v23  ;;  %v210_v25 = vmul.f32 %v208_v22, %v208_v22 }
 0x1ed   :  { %v209_v26 = vsub.f32 %v197_v18, %v207_v24  ;;  %v212_v27 = vsel %vm198_vm2, %v210_v25, 0.0 }
 0x1ee   :  { %213 = vadd.xlane.f32.xlu1 %v212_v27 }
 0x1ef   :  { %v211_v28 = vmul.f32 %v209_v26, %v209_v26 }
 0x1f1   :  { %v215_v29 = vsel %vm198_vm2, %v211_v28, 0.0 }
 0x1f2   :  { %216 = vadd.xlane.f32.xlu1 %v215_v29 }
 0x27b   :  { %v214_v30 = vpop.xlane.xlu1 %213 }
 0x27c   :  { %v218_v31 = vmul.f32 0.03125, %v214_v30 }
 0x27e   :  { %v220_v32 = vadd.f32 1e-12, %v218_v31 }
 0x27f   :  { %v217_v33 = vpop.xlane.xlu1 %216 }
 0x280   :  { %325 = vrsqrt.f32 %v220_v32  ;;  %v219_v34 = vmul.f32 0.03125, %v217_v33 }
 0x282   :  { %v221_v35 = vadd.f32 1e-12, %v219_v34 }
 0x284   :  { %327 = vrsqrt.f32 %v221_v35 }
 0x28a   :  { %v326_v36 = vpop.eup %325 }
 0x28b   :  { %v224_v38 = vmul.f32 %v326_v36, %v208_v22 }
 0x28d   :  { %v233_v40 = vmul.f32 %v282_v37, %v224_v38 }
 0x28e   :  { %v328_v41 = vpop.eup %327 }
 0x28f   :  { %v225_v42 = vmul.f32 %v328_v41, %v209_v26  ;;  %v242_v43 = vadd.f32 %v283_v39, %v233_v40 }
 0x291   :  { %v234_v44 = vmul.f32 %v282_v37, %v225_v42  ;;  %v286_v45 = vpack.c.bf16 %v242_v43, %v242_v43 }
 0x293   :  { %v243_v46 = vadd.f32 %v283_v39, %v234_v44  ;;  %253 = vst.msk [vmem:[#allocation13] sm:$0xf] %vm252_vm3, %v286_v45 }
 0x295   :  { %v287_v47 = vpack.c.bf16 %v243_v46, %v243_v46 }
 0x297   :  { %254 = vst.msk [vmem:[#allocation13 + $0x4] sm:$0xf] %vm252_vm3, %v287_v47 }
 0x298   :  { %472 = shalt.err (!%p469_p10)
}
 0x299   :  { %s473_s27 = scalar_lea.hbm %s652_s6, 128 }
 0x29a   :  { %p474_p11 = scmp.ne.s32.totalorder %s652_s6, %s473_s27  ;;  %p477_p12 = scmp.lt.u32.totalorder %s473_s27, %s652_s6 }
 0x29c   :  { %p479_p13 = pnand %p477_p12, %p474_p11 }
 0x29e   :  { %482 = shalt.err (!%p479_p13)
}
 0x29f   :  { %266 = dma.vmem_to_hbm [thread:$0]  %s261_s21, 128, %s652_s6, [#allocation4], %s495_s9, %s495_s9, %s496_s10  }
 0x2a0   :  { %491 = dma.done.wait [#allocation4], 128  }
 0x2a1   :  { %492 = vsyncadd [#allocation4], 4294967168 }
 0x2a2   :  { %270 = vsyncpa [#allocation3], 1 }
 0x2a3   :  { %271 = vsyncpa [#allocation6], 1 }
 0x2a4   :  { %272 = vsyncpa [#allocation9], 1 }
 0x2a5   :  { %273 = vsyncpa [#allocation12], 1 }
 0x2a6   :  { %274 = vsyncpa [#allocation4], 1 }

</bundles_post_ra>
